<compile_context>
chip_gen: v5e
topology: v5e:2x2
jax: 0.10.0
libtpu: 0.0.40
codegen_flags: <defaults>
</compile_context>

<pallas_src>
import numpy as np
import jax
import jax.numpy as jnp
from jax import lax
from jax.experimental import pallas as pl
from jax.experimental.pallas import tpu as pltpu


def _round_up(a, b):
    return (a + b - 1) // b * b


def get_cum_prod(shape):
    ms = shape[0]
    return [int(np.prod(ms[k + 1:])) for k in range(len(ms))]


# ----------------------------------------------------------------------------
# Fused TT-embedding lookup kernel (one pallas_call for the whole chain).
# ----------------------------------------------------------------------------
def _make_tt_lookup_kernel(d, ns, ranks, m_offs, row_offs, m_total, padding_idx):
    """Build the fused TT-lookup kernel.

    Kernel refs:
      codes_ref : [d+1, T] int32   (row 0 = raw id, rows 1..d = mixed-radix digits)
      w_ref     : [R_total, m_total] float32 block-diagonal core matrix
                  core 0 rows ordered (r1, n0)   (r-major -> per-r slices contiguous)
                  core k rows ordered (r_k, n_k, r_{k+1})
      out_ref   : [prod(ns[:-1]), ns[-1], T] float32
    Every per-token tensor keeps the token axis last (lanes).
    """

    def kernel(codes_ref, w_ref, out_ref):
        T = codes_ref.shape[1]

        # ---- one-hot gather of every core's per-token slice on the MXU ------
        iota = lax.broadcasted_iota(jnp.int32, (m_total, T), 0)
        sel = None
        for k in range(d):                                     # static, d small
            dig = codes_ref[k + 1:k + 2, :] + m_offs[k]        # [1, T] int32
            eq = iota == dig                                   # [m_total, T]
            sel = eq if sel is None else jnp.logical_or(sel, eq)
        oh = sel.astype(jnp.float32)
        if padding_idx is not None:
            # Fused padding mask: zero one-hot column -> zero gathered slices
            # -> zero output row (chain is multilinear in the core slices).
            keep = (codes_ref[0:1, :] != padding_idx).astype(jnp.float32)
            oh = oh * keep
        # gath[row, t] = core entry selected by token t's digits (exact f32).
        gath = jnp.dot(w_ref[...], oh,
                       preferred_element_type=jnp.float32,
                       precision=jax.lax.Precision.HIGHEST)    # [R_total, T]

        # ---- TT rank-contraction chain: unrolled VPU broadcast-FMAs ---------
        n0 = ns[0]
        P = n0
        acc = None                                             # [P, r_prev, T] for k >= 2
        for k in range(1, d):
            r_prev, n_k, r_next = ranks[k], ns[k], ranks[k + 1]
            q = n_k * r_next
            base = row_offs[k]
            tmp = None
            for r in range(r_prev):                            # static, r_prev <= max_rank
                if k == 1:
                    # core-0 rows are r-major -> contiguous slice per r
                    a_r = gath[row_offs[0] + r * n0:
                               row_offs[0] + (r + 1) * n0, :][:, None, :]     # [n0,1,T]
                else:
                    a_r = acc[:, r:r + 1, :]                                   # [P,1,T]
                g_r = gath[base + r * q: base + (r + 1) * q, :][None, :, :]    # [1,q,T]
                contrib = a_r * g_r                                            # [P,q,T]
                tmp = contrib if tmp is None else tmp + contrib
            if k < d - 1:
                acc = tmp.reshape(P * n_k, r_next, T)          # lane dim unchanged
                P = P * n_k
            else:
                acc = tmp                                      # [P_last, n_last, T]

        out_ref[...] = acc.astype(out_ref.dtype)

    return kernel


def tt_embedding_lookup(codes, w_all, *, ns, ranks, m_offs, row_offs,
                        m_total, padding_idx, tile):
    """codes: [d+1, Npad] int32; w_all: block-diagonal core matrix.

    Returns lane-dense rows [prod(ns[:-1]), ns[-1], Npad] float32.
    """
    d = len(ns)
    Npad = codes.shape[1]
    assert Npad % tile == 0 and tile % 128 == 0
    P_last = int(np.prod(ns[:-1]))
    n_last = int(ns[-1])

    kernel = _make_tt_lookup_kernel(d, list(ns), list(ranks), list(m_offs),
                                    list(row_offs), m_total, padding_idx)

    return pl.pallas_call(
        kernel,
        out_shape=jax.ShapeDtypeStruct((P_last, n_last, Npad), jnp.float32),
        grid_spec=pltpu.PrefetchScalarGridSpec(
            num_scalar_prefetch=0,
            grid=(Npad // tile,),
            in_specs=[pl.BlockSpec((codes.shape[0], tile), lambda i: (0, i)),
                      # Tiny constant core matrix: full-shape block, constant
                      # index_map -> fetched once, stays resident in VMEM.
                      pl.BlockSpec(tuple(w_all.shape), lambda i: (0, 0))],
            out_specs=pl.BlockSpec((P_last, n_last, tile), lambda i: (0, 0, i)),
        ),
        compiler_params=pltpu.CompilerParams(
            dimension_semantics=("parallel",),
            vmem_limit_bytes=32 * 1024 * 1024,
        ),
    )(codes, w_all)


# ----------------------------------------------------------------------------
# TensorizedEmbedding (forward only).
# ----------------------------------------------------------------------------
class TensorizedEmbedding:
    def __init__(self, shape, max_rank=8, padding_idx=None, seed=0):
        self.shape = shape
        self.voc_size = int(np.prod(shape[0]))
        self.emb_size = int(np.prod(shape[1]))
        self.padding_idx = padding_idx
        self.cum_prod = get_cum_prod(shape)
        d = len(shape[0])
        assert len(shape[1]) == d and d >= 2

        # TT ranks [1, r, ..., r, 1], capped by the admissible TT-matrix rank.
        ranks = [1] + [max_rank] * (d - 1) + [1]
        for k in range(1, d):
            left = int(np.prod([shape[0][i] * shape[1][i] for i in range(k)]))
            right = int(np.prod([shape[0][i] * shape[1][i] for i in range(k, d)]))
            ranks[k] = min(ranks[k], left, right)
        self.ranks = ranks

        # Deterministic synthetic init (mimics the 'nn' init target stddev).
        target_stddev = float(np.sqrt(2.0 / (self.voc_size + self.emb_size)))
        core_std = target_stddev ** (1.0 / d)
        key = jax.random.PRNGKey(seed)
        self.factors = []
        for k in range(d):
            key, sub = jax.random.split(key)
            shp = (ranks[k], shape[0][k], shape[1][k], ranks[k + 1])
            self.factors.append(
                core_std * jax.random.normal(sub, shp, dtype=jnp.float32))

        # TODO(synk): low-rank prior / rank masks (get_masked_factors) and
        # tensor.update_rank_parameters() are training-time variational-EM
        # machinery with no forward-pass compute; not implemented here.

        # Block-diagonal gather matrix for the in-kernel MXU one-hot lookup:
        #   core 0 block : [r1*n0, m0]              rows ordered (r1, n0)
        #   core k block : [r_k*n_k*r_{k+1}, m_k]   rows ordered (r, n, r')
        blocks = [jnp.transpose(self.factors[0][0], (2, 1, 0))
                  .reshape(ranks[1] * shape[1][0], shape[0][0])]
        for k in range(1, d):
            G = self.factors[k]                                  # [r, m, n, r']
            r_p, m, n, r_n = G.shape
            blocks.append(jnp.transpose(G, (0, 2, 3, 1)).reshape(r_p * n * r_n, m))
        rows = [int(b.shape[0]) for b in blocks]
        mks = [int(b.shape[1]) for b in blocks]
        self.row_offs = [int(v) for v in np.cumsum([0] + rows[:-1])]
        self.m_offs = [int(v) for v in np.cumsum([0] + mks[:-1])]
        self.m_total = int(sum(mks))
        r_total = int(sum(rows))
        W = jnp.zeros((r_total, self.m_total), jnp.float32)
        for k, b in enumerate(blocks):
            W = W.at[self.row_offs[k]:self.row_offs[k] + rows[k],
                     self.m_offs[k]:self.m_offs[k] + mks[k]].set(b)
        self.w_all = W
        # TODO(synk): bf16 core storage (v6e/v7x) with f32 MXU accumulation.

    def dense_matrix(self):
        """Dense reconstruction of the full embedding table (validation only)."""
        T = self.factors[0][0]                      # [m0, n0, r1]
        for k in range(1, len(self.factors)):
            G = self.factors[k]                     # [r, m, n, r']
            M, Nn, _ = T.shape
            _, m, n, r_next = G.shape
            T = jnp.einsum("abr,rmns->ambns", T, G)
            T = T.reshape(M * m, Nn * n, r_next)
        return T[:, :, 0]                           # [voc_size, emb_size]

    def __call__(self, x, tile=1024):
        xshape = list(x.shape)
        x_flat = x.reshape(-1).astype(jnp.int32)
        N = int(x_flat.shape[0])
        d = len(self.factors)
        ms = [int(v) for v in self.shape[0]]
        ns = [int(v) for v in self.shape[1]]

        assert tile % 128 == 0
        tile = min(tile, _round_up(max(N, 1), 128))
        Npad = _round_up(N, tile)
        x_pad = x_flat if Npad == N else jnp.pad(x_flat, (0, Npad - N))

        # Mixed-radix digits of the row index (most-significant digit first);
        # row 0 carries the raw token id for the in-kernel padding mask.
        digits = [((x_pad // self.cum_prod[k]) % ms[k]).astype(jnp.int32)
                  for k in range(d)]
        codes = jnp.stack([x_pad] + digits, axis=0)              # [d+1, Npad]

        out = tt_embedding_lookup(
            codes, self.w_all, ns=ns, ranks=self.ranks,
            m_offs=self.m_offs, row_offs=self.row_offs, m_total=self.m_total,
            padding_idx=self.padding_idx, tile=tile)
        # lane-dense [emb_size, Npad] -> [N, emb_size] (layout plumbing in XLA)
        rows = out.reshape(self.emb_size, Npad).T[:N]
        return rows.reshape(xshape + [self.emb_size])


if __name__ == "__main__":
    # voc_size = 8*4*4 = 128, emb_size = 4*4*4 = 64
    shape = [[8, 4, 4], [4, 4, 4]]

    # --- small batch, single tile ------------------------------------------
    emb = TensorizedEmbedding(shape, max_rank=8, padding_idx=None, seed=0)
    key = jax.random.PRNGKey(0)
    x = jax.random.randint(key, (2, 8), 0, emb.voc_size, dtype=jnp.int32)
    rows = jax.block_until_ready(emb(x))
    assert rows.shape == (2, 8, emb.emb_size), rows.shape
    assert rows.dtype == jnp.float32
    E = emb.dense_matrix()
    ref = jnp.take(E, x.reshape(-1), axis=0).reshape(2, 8, emb.emb_size)
    np.testing.assert_allclose(np.asarray(rows), np.asarray(ref),
                               rtol=1e-5, atol=1e-5)

    # --- multi-tile grid + padding_idx + batch padding path -----------------
    emb_p = TensorizedEmbedding(shape, max_rank=8, padding_idx=0, seed=1)
    x2 = jax.random.randint(jax.random.PRNGKey(1), (3, 100), 0,
                            emb_p.voc_size, dtype=jnp.int32)
    x2 = x2.at[0, :7].set(0)                     # exercise padding_idx
    rows2 = jax.block_until_ready(emb_p(x2, tile=128))  # 300 tok -> Npad=384, grid=3
    E2 = emb_p.dense_matrix()
    ref2 = jnp.take(E2, x2.reshape(-1), axis=0)
    ref2 = jnp.where(x2.reshape(-1, 1) != 0, ref2, 0.0)
    ref2 = ref2.reshape(3, 100, emb_p.emb_size)
    np.testing.assert_allclose(np.asarray(rows2), np.asarray(ref2),
                               rtol=1e-5, atol=1e-5)

    print("KERNEL_OK")
</pallas_src>

<mosaic_0001>
module attributes {stable_mosaic.version = 11 : i64} {
  func.func @kernel(%arg0: i32, %arg1: memref<4x128xi32, #tpu.memory_space<vmem>>, %arg2: memref<320x16xf32, #tpu.memory_space<vmem>>, %arg3: memref<16x4x128xf32, #tpu.memory_space<vmem>>) attributes {dimension_semantics = [#tpu.dimension_semantics<parallel>], iteration_bounds = array<i64: 1>, scalar_prefetch = 0 : i64, scratch_operands = 0 : i64, tpu.core_type = #tpu.core_type<tc>, window_params = [{transform_indices = @transform_0, window_bounds = array<i64: 4, 128>}, {pipeline_mode = #tpu.pipeline_mode<synchronous>, transform_indices = @transform_1, window_bounds = array<i64: 320, 16>}, {transform_indices = @transform_2, window_bounds = array<i64: 16, 4, 128>}]} {
    %0 = tpu.iota {dimensions = array<i32: 0>} : vector<16x128xi32>
    %c1 = arith.constant 1 : index
    %c0 = arith.constant 0 : index
    %1 = vector.load %arg1[%c1, %c0] : memref<4x128xi32, #tpu.memory_space<vmem>>, vector<1x128xi32>
    %c0_i32 = arith.constant 0 : i32
    %2 = vector.broadcast %c0_i32 : i32 to vector<1x128xi32>
    %3 = arith.addi %1, %2 : vector<1x128xi32>
    %4 = vector.broadcast %3 : vector<1x128xi32> to vector<16x128xi32>
    %5 = arith.cmpi eq, %0, %4 : vector<16x128xi32>
    %c2 = arith.constant 2 : index
    %c0_0 = arith.constant 0 : index
    %6 = vector.load %arg1[%c2, %c0_0] : memref<4x128xi32, #tpu.memory_space<vmem>>, vector<1x128xi32>
    %c8_i32 = arith.constant 8 : i32
    %7 = vector.broadcast %c8_i32 : i32 to vector<1x128xi32>
    %8 = arith.addi %6, %7 : vector<1x128xi32>
    %9 = vector.broadcast %8 : vector<1x128xi32> to vector<16x128xi32>
    %10 = arith.cmpi eq, %0, %9 : vector<16x128xi32>
    %11 = arith.ori %5, %10 : vector<16x128xi1>
    %c3 = arith.constant 3 : index
    %c0_1 = arith.constant 0 : index
    %12 = vector.load %arg1[%c3, %c0_1] : memref<4x128xi32, #tpu.memory_space<vmem>>, vector<1x128xi32>
    %c12_i32 = arith.constant 12 : i32
    %13 = vector.broadcast %c12_i32 : i32 to vector<1x128xi32>
    %14 = arith.addi %12, %13 : vector<1x128xi32>
    %15 = vector.broadcast %14 : vector<1x128xi32> to vector<16x128xi32>
    %16 = arith.cmpi eq, %0, %15 : vector<16x128xi32>
    %17 = arith.ori %11, %16 : vector<16x128xi1>
    %18 = arith.extui %17 : vector<16x128xi1> to vector<16x128xi32>
    %19 = arith.sitofp %18 : vector<16x128xi32> to vector<16x128xf32>
    %c0_2 = arith.constant 0 : index
    %c0_3 = arith.constant 0 : index
    %20 = vector.load %arg2[%c0_2, %c0_3] : memref<320x16xf32, #tpu.memory_space<vmem>>, vector<320x16xf32>
    %cst = arith.constant dense<0.000000e+00> : vector<320x128xf32>
    %21 = tpu.matmul %20, %19, %cst {dimension_numbers = #tpu.dot_dimension_numbers<[1], [0], [0], [1], [0, 0, 1, 1], [], []>, precision = #tpu.contract_precision<fp32>} : vector<320x16xf32>, vector<16x128xf32>, vector<320x128xf32> -> vector<320x128xf32>
    %22 = vector.extract_strided_slice %21 {offsets = [0, 0], sizes = [4, 128], strides = [1, 1]} : vector<320x128xf32> to vector<4x128xf32>
    %23 = vector.shape_cast %22 : vector<4x128xf32> to vector<4x1x128xf32>
    %24 = vector.extract_strided_slice %21 {offsets = [32, 0], sizes = [32, 128], strides = [1, 1]} : vector<320x128xf32> to vector<32x128xf32>
    %25 = vector.shape_cast %24 : vector<32x128xf32> to vector<1x32x128xf32>
    %26 = vector.broadcast %23 : vector<4x1x128xf32> to vector<4x32x128xf32>
    %27 = vector.broadcast %25 : vector<1x32x128xf32> to vector<4x32x128xf32>
    %28 = arith.mulf %26, %27 : vector<4x32x128xf32>
    %29 = vector.extract_strided_slice %21 {offsets = [4, 0], sizes = [4, 128], strides = [1, 1]} : vector<320x128xf32> to vector<4x128xf32>
    %30 = vector.shape_cast %29 : vector<4x128xf32> to vector<4x1x128xf32>
    %31 = vector.extract_strided_slice %21 {offsets = [64, 0], sizes = [32, 128], strides = [1, 1]} : vector<320x128xf32> to vector<32x128xf32>
    %32 = vector.shape_cast %31 : vector<32x128xf32> to vector<1x32x128xf32>
    %33 = vector.broadcast %30 : vector<4x1x128xf32> to vector<4x32x128xf32>
    %34 = vector.broadcast %32 : vector<1x32x128xf32> to vector<4x32x128xf32>
    %35 = arith.mulf %33, %34 : vector<4x32x128xf32>
    %36 = arith.addf %28, %35 : vector<4x32x128xf32>
    %37 = vector.extract_strided_slice %21 {offsets = [8, 0], sizes = [4, 128], strides = [1, 1]} : vector<320x128xf32> to vector<4x128xf32>
    %38 = vector.shape_cast %37 : vector<4x128xf32> to vector<4x1x128xf32>
    %39 = vector.extract_strided_slice %21 {offsets = [96, 0], sizes = [32, 128], strides = [1, 1]} : vector<320x128xf32> to vector<32x128xf32>
    %40 = vector.shape_cast %39 : vector<32x128xf32> to vector<1x32x128xf32>
    %41 = vector.broadcast %38 : vector<4x1x128xf32> to vector<4x32x128xf32>
    %42 = vector.broadcast %40 : vector<1x32x128xf32> to vector<4x32x128xf32>
    %43 = arith.mulf %41, %42 : vector<4x32x128xf32>
    %44 = arith.addf %36, %43 : vector<4x32x128xf32>
    %45 = vector.extract_strided_slice %21 {offsets = [12, 0], sizes = [4, 128], strides = [1, 1]} : vector<320x128xf32> to vector<4x128xf32>
    %46 = vector.shape_cast %45 : vector<4x128xf32> to vector<4x1x128xf32>
    %47 = vector.extract_strided_slice %21 {offsets = [128, 0], sizes = [32, 128], strides = [1, 1]} : vector<320x128xf32> to vector<32x128xf32>
    %48 = vector.shape_cast %47 : vector<32x128xf32> to vector<1x32x128xf32>
    %49 = vector.broadcast %46 : vector<4x1x128xf32> to vector<4x32x128xf32>
    %50 = vector.broadcast %48 : vector<1x32x128xf32> to vector<4x32x128xf32>
    %51 = arith.mulf %49, %50 : vector<4x32x128xf32>
    %52 = arith.addf %44, %51 : vector<4x32x128xf32>
    %53 = vector.extract_strided_slice %21 {offsets = [16, 0], sizes = [4, 128], strides = [1, 1]} : vector<320x128xf32> to vector<4x128xf32>
    %54 = vector.shape_cast %53 : vector<4x128xf32> to vector<4x1x128xf32>
    %55 = vector.extract_strided_slice %21 {offsets = [160, 0], sizes = [32, 128], strides = [1, 1]} : vector<320x128xf32> to vector<32x128xf32>
    %56 = vector.shape_cast %55 : vector<32x128xf32> to vector<1x32x128xf32>
    %57 = vector.broadcast %54 : vector<4x1x128xf32> to vector<4x32x128xf32>
    %58 = vector.broadcast %56 : vector<1x32x128xf32> to vector<4x32x128xf32>
    %59 = arith.mulf %57, %58 : vector<4x32x128xf32>
    %60 = arith.addf %52, %59 : vector<4x32x128xf32>
    %61 = vector.extract_strided_slice %21 {offsets = [20, 0], sizes = [4, 128], strides = [1, 1]} : vector<320x128xf32> to vector<4x128xf32>
    %62 = vector.shape_cast %61 : vector<4x128xf32> to vector<4x1x128xf32>
    %63 = vector.extract_strided_slice %21 {offsets = [192, 0], sizes = [32, 128], strides = [1, 1]} : vector<320x128xf32> to vector<32x128xf32>
    %64 = vector.shape_cast %63 : vector<32x128xf32> to vector<1x32x128xf32>
    %65 = vector.broadcast %62 : vector<4x1x128xf32> to vector<4x32x128xf32>
    %66 = vector.broadcast %64 : vector<1x32x128xf32> to vector<4x32x128xf32>
    %67 = arith.mulf %65, %66 : vector<4x32x128xf32>
    %68 = arith.addf %60, %67 : vector<4x32x128xf32>
    %69 = vector.extract_strided_slice %21 {offsets = [24, 0], sizes = [4, 128], strides = [1, 1]} : vector<320x128xf32> to vector<4x128xf32>
    %70 = vector.shape_cast %69 : vector<4x128xf32> to vector<4x1x128xf32>
    %71 = vector.extract_strided_slice %21 {offsets = [224, 0], sizes = [32, 128], strides = [1, 1]} : vector<320x128xf32> to vector<32x128xf32>
    %72 = vector.shape_cast %71 : vector<32x128xf32> to vector<1x32x128xf32>
    %73 = vector.broadcast %70 : vector<4x1x128xf32> to vector<4x32x128xf32>
    %74 = vector.broadcast %72 : vector<1x32x128xf32> to vector<4x32x128xf32>
    %75 = arith.mulf %73, %74 : vector<4x32x128xf32>
    %76 = arith.addf %68, %75 : vector<4x32x128xf32>
    %77 = vector.extract_strided_slice %21 {offsets = [28, 0], sizes = [4, 128], strides = [1, 1]} : vector<320x128xf32> to vector<4x128xf32>
    %78 = vector.shape_cast %77 : vector<4x128xf32> to vector<4x1x128xf32>
    %79 = vector.extract_strided_slice %21 {offsets = [256, 0], sizes = [32, 128], strides = [1, 1]} : vector<320x128xf32> to vector<32x128xf32>
    %80 = vector.shape_cast %79 : vector<32x128xf32> to vector<1x32x128xf32>
    %81 = vector.broadcast %78 : vector<4x1x128xf32> to vector<4x32x128xf32>
    %82 = vector.broadcast %80 : vector<1x32x128xf32> to vector<4x32x128xf32>
    %83 = arith.mulf %81, %82 : vector<4x32x128xf32>
    %84 = arith.addf %76, %83 : vector<4x32x128xf32>
    %85 = vector.shape_cast %84 : vector<4x32x128xf32> to vector<16x8x128xf32>
    %86 = vector.extract_strided_slice %85 {offsets = [0, 0, 0], sizes = [16, 1, 128], strides = [1, 1, 1]} : vector<16x8x128xf32> to vector<16x1x128xf32>
    %87 = vector.extract_strided_slice %21 {offsets = [288, 0], sizes = [4, 128], strides = [1, 1]} : vector<320x128xf32> to vector<4x128xf32>
    %88 = vector.shape_cast %87 : vector<4x128xf32> to vector<1x4x128xf32>
    %89 = vector.broadcast %86 : vector<16x1x128xf32> to vector<16x4x128xf32>
    %90 = vector.broadcast %88 : vector<1x4x128xf32> to vector<16x4x128xf32>
    %91 = arith.mulf %89, %90 : vector<16x4x128xf32>
    %92 = vector.extract_strided_slice %85 {offsets = [0, 1, 0], sizes = [16, 1, 128], strides = [1, 1, 1]} : vector<16x8x128xf32> to vector<16x1x128xf32>
    %93 = vector.extract_strided_slice %21 {offsets = [292, 0], sizes = [4, 128], strides = [1, 1]} : vector<320x128xf32> to vector<4x128xf32>
    %94 = vector.shape_cast %93 : vector<4x128xf32> to vector<1x4x128xf32>
    %95 = vector.broadcast %92 : vector<16x1x128xf32> to vector<16x4x128xf32>
    %96 = vector.broadcast %94 : vector<1x4x128xf32> to vector<16x4x128xf32>
    %97 = arith.mulf %95, %96 : vector<16x4x128xf32>
    %98 = arith.addf %91, %97 : vector<16x4x128xf32>
    %99 = vector.extract_strided_slice %85 {offsets = [0, 2, 0], sizes = [16, 1, 128], strides = [1, 1, 1]} : vector<16x8x128xf32> to vector<16x1x128xf32>
    %100 = vector.extract_strided_slice %21 {offsets = [296, 0], sizes = [4, 128], strides = [1, 1]} : vector<320x128xf32> to vector<4x128xf32>
    %101 = vector.shape_cast %100 : vector<4x128xf32> to vector<1x4x128xf32>
    %102 = vector.broadcast %99 : vector<16x1x128xf32> to vector<16x4x128xf32>
    %103 = vector.broadcast %101 : vector<1x4x128xf32> to vector<16x4x128xf32>
    %104 = arith.mulf %102, %103 : vector<16x4x128xf32>
    %105 = arith.addf %98, %104 : vector<16x4x128xf32>
    %106 = vector.extract_strided_slice %85 {offsets = [0, 3, 0], sizes = [16, 1, 128], strides = [1, 1, 1]} : vector<16x8x128xf32> to vector<16x1x128xf32>
    %107 = vector.extract_strided_slice %21 {offsets = [300, 0], sizes = [4, 128], strides = [1, 1]} : vector<320x128xf32> to vector<4x128xf32>
    %108 = vector.shape_cast %107 : vector<4x128xf32> to vector<1x4x128xf32>
    %109 = vector.broadcast %106 : vector<16x1x128xf32> to vector<16x4x128xf32>
    %110 = vector.broadcast %108 : vector<1x4x128xf32> to vector<16x4x128xf32>
    %111 = arith.mulf %109, %110 : vector<16x4x128xf32>
    %112 = arith.addf %105, %111 : vector<16x4x128xf32>
    %113 = vector.extract_strided_slice %85 {offsets = [0, 4, 0], sizes = [16, 1, 128], strides = [1, 1, 1]} : vector<16x8x128xf32> to vector<16x1x128xf32>
    %114 = vector.extract_strided_slice %21 {offsets = [304, 0], sizes = [4, 128], strides = [1, 1]} : vector<320x128xf32> to vector<4x128xf32>
    %115 = vector.shape_cast %114 : vector<4x128xf32> to vector<1x4x128xf32>
    %116 = vector.broadcast %113 : vector<16x1x128xf32> to vector<16x4x128xf32>
    %117 = vector.broadcast %115 : vector<1x4x128xf32> to vector<16x4x128xf32>
    %118 = arith.mulf %116, %117 : vector<16x4x128xf32>
    %119 = arith.addf %112, %118 : vector<16x4x128xf32>
    %120 = vector.extract_strided_slice %85 {offsets = [0, 5, 0], sizes = [16, 1, 128], strides = [1, 1, 1]} : vector<16x8x128xf32> to vector<16x1x128xf32>
    %121 = vector.extract_strided_slice %21 {offsets = [308, 0], sizes = [4, 128], strides = [1, 1]} : vector<320x128xf32> to vector<4x128xf32>
    %122 = vector.shape_cast %121 : vector<4x128xf32> to vector<1x4x128xf32>
    %123 = vector.broadcast %120 : vector<16x1x128xf32> to vector<16x4x128xf32>
    %124 = vector.broadcast %122 : vector<1x4x128xf32> to vector<16x4x128xf32>
    %125 = arith.mulf %123, %124 : vector<16x4x128xf32>
    %126 = arith.addf %119, %125 : vector<16x4x128xf32>
    %127 = vector.extract_strided_slice %85 {offsets = [0, 6, 0], sizes = [16, 1, 128], strides = [1, 1, 1]} : vector<16x8x128xf32> to vector<16x1x128xf32>
    %128 = vector.extract_strided_slice %21 {offsets = [312, 0], sizes = [4, 128], strides = [1, 1]} : vector<320x128xf32> to vector<4x128xf32>
    %129 = vector.shape_cast %128 : vector<4x128xf32> to vector<1x4x128xf32>
    %130 = vector.broadcast %127 : vector<16x1x128xf32> to vector<16x4x128xf32>
    %131 = vector.broadcast %129 : vector<1x4x128xf32> to vector<16x4x128xf32>
    %132 = arith.mulf %130, %131 : vector<16x4x128xf32>
    %133 = arith.addf %126, %132 : vector<16x4x128xf32>
    %134 = vector.extract_strided_slice %85 {offsets = [0, 7, 0], sizes = [16, 1, 128], strides = [1, 1, 1]} : vector<16x8x128xf32> to vector<16x1x128xf32>
    %135 = vector.extract_strided_slice %21 {offsets = [316, 0], sizes = [4, 128], strides = [1, 1]} : vector<320x128xf32> to vector<4x128xf32>
    %136 = vector.shape_cast %135 : vector<4x128xf32> to vector<1x4x128xf32>
    %137 = vector.broadcast %134 : vector<16x1x128xf32> to vector<16x4x128xf32>
    %138 = vector.broadcast %136 : vector<1x4x128xf32> to vector<16x4x128xf32>
    %139 = arith.mulf %137, %138 : vector<16x4x128xf32>
    %140 = arith.addf %133, %139 : vector<16x4x128xf32>
    %c0_4 = arith.constant 0 : index
    %c0_5 = arith.constant 0 : index
    %c0_6 = arith.constant 0 : index
    %141 = vector.load %arg3[%c0_4, %c0_5, %c0_6] : memref<16x4x128xf32, #tpu.memory_space<vmem>>, vector<16x4x128xf32>
    tpu.vector_store %arg3[%c0_4, %c0_5, %c0_6], %140 {strides = array<i32>} : memref<16x4x128xf32, #tpu.memory_space<vmem>>, vector<16x4x128xf32>,
    return
  }
  func.func @transform_0(%arg0: i32) -> (i32, i32) {
    %c0_i32 = arith.constant 0 : i32
    %c0_i32_0 = arith.constant 0 : i32
    return %c0_i32, %arg0 : i32, i32
  }
  func.func @transform_1(%arg0: i32) -> (i32, i32) {
    %c0_i32 = arith.constant 0 : i32
    %c0_i32_0 = arith.constant 0 : i32
    %c0_i32_1 = arith.constant 0 : i32
    return %c0_i32, %c0_i32_0 : i32, i32
  }
  func.func @transform_2(%arg0: i32) -> (i32, i32, i32) {
    %c0_i32 = arith.constant 0 : i32
    %c0_i32_0 = arith.constant 0 : i32
    %c0_i32_1 = arith.constant 0 : i32
    return %c0_i32, %c0_i32_0, %arg0 : i32, i32, i32
  }
}

</mosaic_0001>

<bundles_post_ra>
// kernel: tpu_custom_call.1
= control target key start
LH: loop header
LB: loop body
LE: loop exit
PB: predicated region body
PF: predicated region fallthrough
CT: control target
= control target key end

     0   :  { %v12_v0 = vlaneseq  ;;  %vm77_vm0 = vcmask 130048   ;;  %s4596_s0 = inlined_call_operand.vmem [shape: s32[4,128], index: 0, kind: input, shape index: {}]   ;;  %s4597_s1 = inlined_call_operand.vmem [shape: f32[320,16], index: 1, kind: input, shape index: {}]   ;;  %s4598_s2 = inlined_call_operand.hbm [shape: f32[16,4,128], index: 2, kind: output, shape index: {}]  }
   0x1   :  { %v2533_v1 = vld [vmem:[%s4596_s0 + $0x1] ss:$0 sm:$0xff]  ;;  %v19_v2 = vld [vmem:[%s4596_s0 + $0x2] sm:$0x1]  ;;  %v26_v4 = vld [vmem:[%s4596_s0 + $0x3] sm:$0x1] }
   0x2   :  { %v20_v3 = vadd.s32 8, %v19_v2  ;;  %v57_v5 = vld [vmem:[%s4597_s1 + $0xa0] sm:$0xff]  ;;  %v13_v6 = vshrl.u32 %v12_v0, 7  ;;  %v27_v7 = vadd.s32 12, %v26_v4  ;;  %v58_v9 = vld [vmem:[%s4597_s1 + $0xa8] sm:$0xff]  ;;  %v59_v10 = vld [vmem:[%s4597_s1 + $0xb0] sm:$0xff] }
   0x3   :  { %v139_v8 = vsel %vm77_vm0, %v57_v5, 0  ;;  %v142_v13 = vsel %vm77_vm0, %v58_v9, 0  ;;  %v37_v14 = vld [vmem:[%s4597_s1] sm:$0xff]  ;;  %v145_v19 = vsel %vm77_vm0, %v59_v10, 0 }
   0x4   :  { %v21_v11 = vperm.slane %v20_v3, 0  ;;  %v2599_v12 = vand.u32 4294901760, %v139_v8  ;;  %v14_v15 = vadd.s32 8, %v13_v6  ;;  %v28_v16 = vperm.slane %v27_v7, 0 }
   0x5   :  { %vm17_vm1 = vcmp.eq.s32.totalorder %v13_v6, %v2533_v1  ;;  %v2605_v17 = vand.u32 4294901760, %v142_v13  ;;  %v79_v20 = vsel %vm77_vm0, %v37_v14, 0 }
   0x6   :  { %vm22_vm2 = vcmp.eq.s32.totalorder %v13_v6, %v21_v11  ;;  %v2608_v18 = vsub.f32 %v139_v8, %v2599_v12 }
   0x7   :  { %4765 = vst [vmem:[#allocation5_spill] sm:$0xff] %v2605_v17 }
   0x8   :  { %7 = vsyncpa [#allocation3], 0  ;;  %vm18_vm3 = vcmp.eq.s32.totalorder %v14_v15, %v2533_v1  ;;  %vm23_vm4 = vcmp.eq.s32.totalorder %v14_v15, %v21_v11  ;;  %vm30_vm5 = vcmp.eq.s32.totalorder %v14_v15, %v28_v16  ;;  %vm29_vm7 = vcmp.eq.s32.totalorder %v13_v6, %v28_v16  ;;  %v38_v21 = vld [vmem:[%s4597_s1 + $0x8] sm:$0xff]  ;;  %v39_v34 = vld [vmem:[%s4597_s1 + $0x10] sm:$0xff]  ;;  %s2504_s11 = sshll.u32 %s4598_s2, 4  ;;  %s2563_s12 = smov 64   ;;  %s2505_s11 = int_to_ptr.hbm [resolvable:$true] %s2504_s11 }
   0x9   :  { %vm24_vm6 = vmor %vm17_vm1, %vm22_vm2  ;;  %v4607_v22 = vand.u32 4294901760, %v2608_v18  ;;  %v2617_v23 = vsub.f32 %v142_v13, %v2605_v17  ;;  %v2619_v24 = vand.u32 4294901760, %v79_v20  ;;  %v2625_v26 = vand.u32 4294901760, %v145_v19  ;;  %v60_v40 = vld [vmem:[%s4597_s1 + $0xb8] sm:$0xff]  ;;  %v61_v63 = vld [vmem:[%s4597_s1 + $0xc0] sm:$0xff]  ;;  %s2564_s13 = smov 4  }
   0xa   :  { %vm25_vm8 = vmor %vm18_vm3, %vm23_vm4  ;;  %v2560_v27 = vmov 1.0   ;;  %v2561_v30 = vmov 0.0   ;;  %v82_v33 = vsel %vm77_vm0, %v38_v21, 0  ;;  %v85_v44 = vsel %vm77_vm0, %v39_v34, 0  ;;  %v40_v61 = vld [vmem:[%s4597_s1 + $0x18] sm:$0xff]  ;;  %v41_v11 = vld [vmem:[%s4597_s1 + $0x20] sm:$0xff] }
   0xb   :  { %vm2621_vm9 = vmor %vm25_vm8, %vm30_vm5  ;;  %4768 = vst [vmem:[#allocation6_spill] sm:$0xff] %v2625_v26  ;;  %v379_v29 = vsub.f32 %v2608_v18, %v4607_v22  ;;  %v4606_v32 = vand.u32 4294901760, %v2617_v23  ;;  %v2650_v37 = vsub.f32 %v79_v20, %v2619_v24  ;;  %v2662_v43 = vand.u32 4294901760, %v82_v33  ;;  %v62_v14 = vld [vmem:[%s4597_s1 + $0xc8] sm:$0xff] }
   0xc   :  { %2524 = vmatpush.msk.msra.mxu2 %vm2621_vm9, %v2560_v27  ;;  %vm2630_vm10 = vmor %vm24_vm6, %vm29_vm7  ;;  %v2517_v31 = vsel %vm2621_vm9, 1.0, %v2561_v30  ;;  %2518 = vmatpush.msk.msra.mxu0 %vm2621_vm9, %v2560_v27  ;;  %v2669_v47 = vsub.f32 %v145_v19, %v2625_v26  ;;  %v148_v50 = vsel %vm77_vm0, %v60_v40, 0  ;;  %v2678_v53 = vand.u32 4294901760, %v85_v44 }
   0xd   :  { %v552_v35 = vsub.f32 %v2517_v31, %v2517_v31  ;;  %v2516_v36 = vsel %vm2630_vm10, 1.0, %v2561_v30  ;;  %v380_v38 = vand.u32 4294901760, %v379_v29  ;;  %v4621_v42 = vand.u32 4294901760, %v2650_v37 }
   0xe   :  { %2525 = vmatpush.msk.msra.mxu2 %vm2630_vm10, %v2560_v27  ;;  %v558_v39 = vsub.f32 %v2516_v36, %v2516_v36  ;;  %2519 = vmatpush.msk.msra.mxu0 %vm2630_vm10, %v2560_v27  ;;  %v387_v45 = vsub.f32 %v2617_v23, %v4606_v32  ;;  %4771 = vst [vmem:[#allocation7_spill] sm:$0xff] %v2669_v47  ;;  %v4605_v59 = vand.u32 4294901760, %v2669_v47  ;;  %v2682_v60 = vand.u32 4294901760, %v148_v50 }
   0xf   :  { %v553_v41 = vand.u32 4294901760, %v552_v35  ;;  %381 = vmatmul.f32.vlgmr.msra.gmra.mxu2 %v380_v38  ;;  %v219_v49 = vsub.f32 %v2650_v37, %v4621_v42  ;;  %v2676_v51 = vsub.f32 %v82_v33, %v2662_v43  ;;  %v2694_v0 = vsub.f32 %v85_v44, %v2678_v53  ;;  %v42_v33 = vld [vmem:[%s4597_s1 + $0x28] sm:$0xff] }
  0x10   :  { %740 = vmatpush.msrb.mxu2 %v552_v35  ;;  %v559_v46 = vand.u32 4294901760, %v558_v39  ;;  %v388_v57 = vand.u32 4294901760, %v387_v45  ;;  %4772 = vst [vmem:[#allocation8_spill] sm:$0xff] %v2682_v60  ;;  %v88_v1 = vsel %vm77_vm0, %v40_v61, 0  ;;  %v395_v2 = vsub.f32 %v2669_v47, %v4605_v59 }
  0x11   :  { %v554_v48 = vsub.f32 %v552_v35, %v553_v41  ;;  %1221 = vmatpush.msrb.mxu0 %v553_v41  ;;  %v220_v55 = vand.u32 4294901760, %v219_v49  ;;  %v4619_v56 = vand.u32 4294901760, %v2676_v51  ;;  %v2702_v3 = vsub.f32 %v148_v50, %v2682_v60  ;;  %v63_v35 = vld [vmem:[%s4597_s1 + $0xd0] sm:$0xff] }
  0x12   :  { %743 = vmatpush.msrb.mxu2 %v558_v39  ;;  %v560_v52 = vsub.f32 %v558_v39, %v559_v46  ;;  %v151_v4 = vsel %vm77_vm0, %v61_v63, 0  ;;  %v4618_v6 = vand.u32 4294901760, %v2694_v0  ;;  %v2713_v7 = vand.u32 4294901760, %v88_v1 }
  0x13   :  { %v555_v54 = vand.u32 4294901760, %v554_v48  ;;  %1225 = vmatpush.msrb.mxu0 %v559_v46  ;;  %v227_v62 = vsub.f32 %v2676_v51, %v4619_v56  ;;  %4773 = vst [vmem:[#allocation9_spill] sm:$0xff] %v2702_v3  ;;  %v396_v8 = vand.u32 4294901760, %v395_v2  ;;  %v4604_v9 = vand.u32 4294901760, %v2702_v3 }
  0x14   :  { %v561_v58 = vand.u32 4294901760, %v560_v52  ;;  %221 = vmatmul.f32.vlgmr.msra.gmra.mxu0 %v220_v55  ;;  %v2719_v10 = vand.u32 4294901760, %v151_v4  ;;  %v235_v13 = vsub.f32 %v2694_v0, %v4618_v6  ;;  %v2734_v15 = vsub.f32 %v88_v1, %v2713_v7  ;;  %v43_v52 = vld [vmem:[%s4597_s1 + $0x30] sm:$0xff]  ;;  %v64_v55 = vld [vmem:[%s4597_s1 + $0xd8] sm:$0xff] }
  0x15   :  { %2526 = vmatpush.msra.mxu3 %v555_v54  ;;  %556 = vmatpush.msra.mxu1 %v555_v54  ;;  %v228_v5 = vand.u32 4294901760, %v227_v62  ;;  %v91_v16 = vsel %vm77_vm0, %v41_v11, 0  ;;  %v403_v19 = vsub.f32 %v2702_v3, %v4604_v9  ;;  %v154_v21 = vsel %vm77_vm0, %v62_v14, 0 }
  0x16   :  { %4774 = vst [vmem:[#allocation10_spill] sm:$0xff] %v2719_v10  ;;  %v2742_v20 = vsub.f32 %v151_v4, %v2719_v10  ;;  %v236_v25 = vand.u32 4294901760, %v235_v13  ;;  %v2747_v28 = vand.u32 4294901760, %v91_v16  ;;  %v2750_v31 = vand.u32 4294901760, %v154_v21  ;;  %v44_v13 = vld [vmem:[%s4597_s1 + $0x38] sm:$0xff] }
  0x17   :  { %2527 = vmatpush.msra.mxu3 %v561_v58  ;;  %562 = vmatpush.msra.mxu1 %v561_v58  ;;  %v404_v29 = vand.u32 4294901760, %v403_v19  ;;  %v94_v38 = vsel %vm77_vm0, %v42_v33, 0  ;;  %v157_v41 = vsel %vm77_vm0, %v63_v35, 0  ;;  %v97_v58 = vsel %vm77_vm0, %v43_v52, 0 }
  0x18   :  { %389 = vmatmul.f32.gmra.mxu2 %v388_v57  ;;  %644 = vmatmul.f32.vlgmr.msra.gmra.mxu3 %v2599_v12  ;;  %4775 = vst [vmem:[#allocation11_spill] sm:$0xff] %v2742_v20  ;;  %v4603_v30 = vand.u32 4294901760, %v2742_v20  ;;  %v2762_v36 = vsub.f32 %v91_v16, %v2747_v28  ;;  %v2770_v40 = vsub.f32 %v154_v21, %v2750_v31  ;;  %v2775_v46 = vand.u32 4294901760, %v94_v38  ;;  %v65_v16 = vld [vmem:[%s4597_s1 + $0xe0] sm:$0xff] }
  0x19   :  { %2520 = vmatpush.msk.msrb.mxu3 %vm2621_vm9, %v2560_v27  ;;  %564 = vmatmul.f32.vlgmr.msra.gmra.mxu1 %v2619_v24  ;;  %4776 = vst [vmem:[#allocation12_spill] sm:$0xff] %v2750_v31  ;;  %v2778_v50 = vand.u32 4294901760, %v157_v41  ;;  %v160_v63 = vsel %vm77_vm0, %v64_v55, 0  ;;  %v2803_v4 = vand.u32 4294901760, %v97_v58  ;;  %v100_v21 = vsel %vm77_vm0, %v44_v13, 0 }
  0x1a   :  { %2522 = vmatpush.msk.msrb.mxu1 %vm2621_vm9, %v2560_v27  ;;  %v411_v39 = vsub.f32 %v2742_v20, %v4603_v30  ;;  %4777 = vst [vmem:[#allocation13_spill] sm:$0xff] %v2770_v40  ;;  %v4615_v45 = vand.u32 4294901760, %v2762_v36  ;;  %v4601_v49 = vand.u32 4294901760, %v2770_v40  ;;  %v2790_v57 = vsub.f32 %v94_v38, %v2775_v46 }
  0x1b   :  { %2521 = vmatpush.msk.msrb.mxu3 %vm2630_vm10, %v2560_v27  ;;  %4778 = vst [vmem:[#allocation14_spill] sm:$0xff] %v2778_v50  ;;  %v2798_v62 = vsub.f32 %v157_v41, %v2778_v50  ;;  %v2806_v11 = vand.u32 4294901760, %v160_v63  ;;  %v2818_v19 = vsub.f32 %v97_v58, %v2803_v4  ;;  %v163_v33 = vsel %vm77_vm0, %v65_v16, 0 }
  0x1c   :  { %2523 = vmatpush.msk.msrb.mxu1 %vm2630_vm10, %v2560_v27  ;;  %229 = vmatmul.f32.gmra.mxu0 %v228_v5  ;;  %v4617_v27 = vand.u32 4294901760, %v2734_v15  ;;  %v412_v48 = vand.u32 4294901760, %v411_v39  ;;  %v251_v54 = vsub.f32 %v2762_v36, %v4615_v45  ;;  %v419_v61 = vsub.f32 %v2770_v40, %v4601_v49 }
  0x1d   :  { %4779 = vst [vmem:[#allocation15_spill] sm:$0xff] %v2798_v62  ;;  %v4613_v2 = vand.u32 4294901760, %v2790_v57  ;;  %v4612_v35 = vand.u32 4294901760, %v2818_v19  ;;  %v2831_v38 = vand.u32 4294901760, %v100_v21 }
  0x1e   :  { %v243_v34 = vsub.f32 %v2734_v15, %v4617_v27  ;;  %v252_v1 = vand.u32 4294901760, %v251_v54  ;;  %v420_v5 = vand.u32 4294901760, %v419_v61  ;;  %4780 = vst [vmem:[#allocation16_spill] sm:$0xff] %v2806_v11  ;;  %v66_v54 = vld [vmem:[%s4597_s1 + $0xe8] sm:$0xff] }
  0x1f   :  { %v259_v14 = vsub.f32 %v2790_v57, %v4613_v2  ;;  %v267_v52 = vsub.f32 %v2818_v19, %v4612_v35  ;;  %v2846_v55 = vsub.f32 %v100_v21, %v2831_v38 }
  0x20   :  { %397 = vmatmul.f32.gmra.mxu2 %v396_v8  ;;  %648 = vmatmul.f32.gmra.mxu3 %v2605_v17  ;;  %v244_v44 = vand.u32 4294901760, %v243_v34  ;;  %v4600_v8 = vand.u32 4294901760, %v2798_v62 }
  0x21   :  { %568 = vmatmul.f32.gmra.mxu1 %v2662_v43  ;;  %v260_v34 = vand.u32 4294901760, %v259_v14  ;;  %v4611_v13 = vand.u32 4294901760, %v2846_v55 }
  0x24   :  { %237 = vmatmul.f32.gmra.mxu0 %v236_v25  ;;  %v427_v25 = vsub.f32 %v2798_v62, %v4600_v8 }
  0x26   :  { %v428_v39 = vand.u32 4294901760, %v427_v25 }
  0x28   :  { %405 = vmatmul.f32.gmra.mxu2 %v404_v29  ;;  %652 = vmatmul.f32.gmra.mxu3 %v2625_v26  ;;  %v2826_v29 = vsub.f32 %v160_v63, %v2806_v11 }
  0x29   :  { %572 = vmatmul.f32.gmra.mxu1 %v2678_v53 }
  0x2a   :  { %4781 = vst [vmem:[#allocation17_spill] sm:$0xff] %v2826_v29  ;;  %v4599_v41 = vand.u32 4294901760, %v2826_v29 }
  0x2c   :  { %245 = vmatmul.f32.gmra.mxu0 %v244_v44  ;;  %v2834_v44 = vand.u32 4294901760, %v163_v33  ;;  %v435_v61 = vsub.f32 %v2826_v29, %v4599_v41 }
  0x2e   :  { %4782 = vst [vmem:[#allocation18_spill] sm:$0xff] %v2834_v44  ;;  %v2854_v63 = vsub.f32 %v163_v33, %v2834_v44  ;;  %v436_v16 = vand.u32 4294901760, %v435_v61  ;;  %v275_v33 = vsub.f32 %v2846_v55, %v4611_v13 }
  0x30   :  { %413 = vmatmul.f32.gmra.mxu2 %v412_v48  ;;  %656 = vmatmul.f32.gmra.mxu3 %v2682_v60  ;;  %v45_v48 = vld [vmem:[%s4597_s1 + $0x40] sm:$0xff]  ;;  %4783 = vst [vmem:[#allocation19_spill] sm:$0xff] %v2854_v63  ;;  %v4602_v21 = vand.u32 4294901760, %v2854_v63  ;;  %v276_v41 = vand.u32 4294901760, %v275_v33  ;;  %v68_v33 = vld [vmem:[%s4597_s1 + $0xf8] sm:$0xff] }
  0x31   :  { %576 = vmatmul.f32.gmra.mxu1 %v2713_v7  ;;  %v103_v58 = vsel %vm77_vm0, %v45_v48, 0  ;;  %v172_v9 = vsel %vm77_vm0, %v68_v33, 0 }
  0x32   :  { %v2859_v14 = vand.u32 4294901760, %v103_v58  ;;  %v2918_v22 = vand.u32 4294901760, %v172_v9 }
  0x34   :  { %253 = vmatmul.f32.gmra.mxu0 %v252_v1  ;;  %v166_v1 = vsel %vm77_vm0, %v66_v54, 0  ;;  %v2874_v48 = vsub.f32 %v103_v58, %v2859_v14  ;;  %v443_v54 = vsub.f32 %v2854_v63, %v4602_v21  ;;  %v47_v21 = vld [vmem:[%s4597_s1 + $0x50] sm:$0xff]  ;;  %4788 = vst [vmem:[#allocation24_spill] sm:$0xff] %v2918_v22 }
  0x35   :  { %v2862_v25 = vand.u32 4294901760, %v166_v1 }
  0x36   :  { %v4609_v58 = vand.u32 4294901760, %v2874_v48 }
  0x37   :  { %4784 = vst [vmem:[#allocation20_spill] sm:$0xff] %v2862_v25  ;;  %v2882_v61 = vsub.f32 %v166_v1, %v2862_v25 }
  0x38   :  { %421 = vmatmul.f32.gmra.mxu2 %v420_v5  ;;  %660 = vmatmul.f32.gmra.mxu3 %v2719_v10  ;;  %v268_v5 = vand.u32 4294901760, %v267_v52  ;;  %v283_v1 = vsub.f32 %v2874_v48, %v4609_v58  ;;  %v2938_v58 = vsub.f32 %v172_v9, %v2918_v22 }
  0x39   :  { %580 = vmatmul.f32.gmra.mxu1 %v2747_v28  ;;  %4785 = vst [vmem:[#allocation21_spill] sm:$0xff] %v2882_v61 }
  0x3a   :  { %v284_v59 = vand.u32 4294901760, %v283_v1  ;;  %v69_v1 = vld [vmem:[%s4597_s1 + $0x100] sm:$0xff]  ;;  %4789 = vst [vmem:[#allocation25_spill] sm:$0xff] %v2938_v58 }
  0x3c   :  { %261 = vmatmul.f32.gmra.mxu0 %v260_v34  ;;  %v46_v34 = vld [vmem:[%s4597_s1 + $0x48] sm:$0xff] }
  0x3d   :  { %v106_v52 = vsel %vm77_vm0, %v46_v34, 0  ;;  %v444_v34 = vand.u32 4294901760, %v443_v54  ;;  %v109_v54 = vsel %vm77_vm0, %v47_v21, 0 }
  0x3e   :  { %v2887_v8 = vand.u32 4294901760, %v106_v52  ;;  %v2915_v32 = vand.u32 4294901760, %v109_v54 }
  0x40   :  { %429 = vmatmul.f32.gmra.mxu2 %v428_v39  ;;  %664 = vmatmul.f32.gmra.mxu3 %v2750_v31  ;;  %v67_v39 = vld [vmem:[%s4597_s1 + $0xf0] sm:$0xff]  ;;  %v2930_v33 = vsub.f32 %v109_v54, %v2915_v32 }
  0x41   :  { %584 = vmatmul.f32.gmra.mxu1 %v2775_v46 }
  0x42   :  { %v4616_v54 = vand.u32 4294901760, %v2930_v33 }
  0x44   :  { %269 = vmatmul.f32.gmra.mxu0 %v268_v5  ;;  %v169_v5 = vsel %vm77_vm0, %v67_v39, 0  ;;  %v2902_v39 = vsub.f32 %v106_v52, %v2887_v8  ;;  %v299_v9 = vsub.f32 %v2930_v33, %v4616_v54 }
  0x45   :  { %v2890_v49 = vand.u32 4294901760, %v169_v5 }
  0x46   :  { %v4610_v52 = vand.u32 4294901760, %v2902_v39  ;;  %v300_v27 = vand.u32 4294901760, %v299_v9  ;;  %v71_v9 = vld [vmem:[%s4597_s1 + $0x110] sm:$0xff] }
  0x47   :  { %4786 = vst [vmem:[#allocation22_spill] sm:$0xff] %v2890_v49  ;;  %v2910_v30 = vsub.f32 %v169_v5, %v2890_v49 }
  0x48   :  { %437 = vmatmul.f32.gmra.mxu2 %v436_v16  ;;  %668 = vmatmul.f32.gmra.mxu3 %v2778_v50  ;;  %v4608_v16 = vand.u32 4294901760, %v2882_v61  ;;  %v291_v5 = vsub.f32 %v2902_v39, %v4610_v52  ;;  %v175_v52 = vsel %vm77_vm0, %v69_v1, 0 }
  0x49   :  { %588 = vmatmul.f32.gmra.mxu1 %v2803_v4  ;;  %4787 = vst [vmem:[#allocation23_spill] sm:$0xff] %v2910_v30  ;;  %v2946_v2 = vand.u32 4294901760, %v175_v52 }
  0x4a   :  { %v292_v13 = vand.u32 4294901760, %v291_v5  ;;  %v70_v5 = vld [vmem:[%s4597_s1 + $0x108] sm:$0xff] }
  0x4b   :  { %4790 = vst [vmem:[#allocation26_spill] sm:$0xff] %v2946_v2  ;;  %v2966_v45 = vsub.f32 %v175_v52, %v2946_v2  ;;  %v178_v54 = vsel %vm77_vm0, %v70_v5, 0 }
  0x4c   :  { %277 = vmatmul.f32.gmra.mxu0 %v276_v41  ;;  %v451_v41 = vsub.f32 %v2882_v61, %v4608_v16  ;;  %v48_v16 = vld [vmem:[%s4597_s1 + $0x58] sm:$0xff]  ;;  %v2974_v56 = vand.u32 4294901760, %v178_v54 }
  0x4d   :  { %4791 = vst [vmem:[#allocation27_spill] sm:$0xff] %v2966_v45 }
  0x4e   :  { %v452_v21 = vand.u32 4294901760, %v451_v41  ;;  %v112_v41 = vsel %vm77_vm0, %v48_v16, 0  ;;  %4792 = vst [vmem:[#allocation28_spill] sm:$0xff] %v2974_v56  ;;  %v2994_v42 = vsub.f32 %v178_v54, %v2974_v56 }
  0x4f   :  { %v2943_v35 = vand.u32 4294901760, %v112_v41 }
  0x50   :  { %445 = vmatmul.f32.gmra.mxu2 %v444_v34  ;;  %672 = vmatmul.f32.gmra.mxu3 %v2806_v11  ;;  %v4614_v34 = vand.u32 4294901760, %v2910_v30  ;;  %4793 = vst [vmem:[#allocation29_spill] sm:$0xff] %v2994_v42 }
  0x51   :  { %592 = vmatmul.f32.gmra.mxu1 %v2831_v38  ;;  %v2958_v1 = vsub.f32 %v112_v41, %v2943_v35 }
  0x53   :  { %v4622_v41 = vand.u32 4294901760, %v2958_v1 }
  0x54   :  { %285 = vmatmul.f32.gmra.mxu0 %v284_v59  ;;  %v459_v59 = vsub.f32 %v2910_v30, %v4614_v34  ;;  %v49_v34 = vld [vmem:[%s4597_s1 + $0x60] sm:$0xff] }
  0x55   :  { %v307_v52 = vsub.f32 %v2958_v1, %v4622_v41  ;;  %v181_v41 = vsel %vm77_vm0, %v71_v9, 0 }
  0x56   :  { %v460_v16 = vand.u32 4294901760, %v459_v59  ;;  %v115_v59 = vsel %vm77_vm0, %v49_v34, 0 }
  0x57   :  { %v2971_v6 = vand.u32 4294901760, %v115_v59 }
  0x58   :  { %453 = vmatmul.f32.gmra.mxu2 %v452_v21  ;;  %676 = vmatmul.f32.gmra.mxu3 %v2834_v44  ;;  %v4620_v21 = vand.u32 4294901760, %v2938_v58 }
  0x59   :  { %596 = vmatmul.f32.gmra.mxu1 %v2859_v14  ;;  %v2986_v5 = vsub.f32 %v115_v59, %v2971_v6 }
  0x5b   :  { %v4632_v59 = vand.u32 4294901760, %v2986_v5 }
  0x5c   :  { %293 = vmatmul.f32.gmra.mxu0 %v292_v13  ;;  %v467_v13 = vsub.f32 %v2938_v58, %v4620_v21  ;;  %v50_v21 = vld [vmem:[%s4597_s1 + $0x68] sm:$0xff]  ;;  %v308_v58 = vand.u32 4294901760, %v307_v52  ;;  %v72_v52 = vld [vmem:[%s4597_s1 + $0x118] sm:$0xff] }
  0x5d   :  { %v315_v54 = vsub.f32 %v2986_v5, %v4632_v59  ;;  %v184_v59 = vsel %vm77_vm0, %v72_v52, 0 }
  0x5e   :  { %v468_v34 = vand.u32 4294901760, %v467_v13  ;;  %v118_v13 = vsel %vm77_vm0, %v50_v21, 0 }
  0x5f   :  { %v2999_v30 = vand.u32 4294901760, %v118_v13 }
  0x60   :  { %461 = vmatmul.f32.gmra.mxu2 %v460_v16  ;;  %680 = vmatmul.f32.gmra.mxu3 %v2862_v25  ;;  %v4629_v16 = vand.u32 4294901760, %v2966_v45  ;;  %v316_v25 = vand.u32 4294901760, %v315_v54  ;;  %v73_v54 = vld [vmem:[%s4597_s1 + $0x120] sm:$0xff] }
  0x61   :  { %600 = vmatmul.f32.gmra.mxu1 %v2887_v8  ;;  %v3014_v9 = vsub.f32 %v118_v13, %v2999_v30 }
  0x63   :  { %v4642_v13 = vand.u32 4294901760, %v3014_v9 }
  0x64   :  { %301 = vmatmul.f32.gmra.mxu0 %v300_v27  ;;  %v475_v27 = vsub.f32 %v2966_v45, %v4629_v16  ;;  %v51_v16 = vld [vmem:[%s4597_s1 + $0x70] sm:$0xff] }
  0x66   :  { %v476_v21 = vand.u32 4294901760, %v475_v27  ;;  %v121_v27 = vsel %vm77_vm0, %v51_v16, 0 }
  0x67   :  { %v3027_v61 = vand.u32 4294901760, %v121_v27 }
  0x68   :  { %469 = vmatmul.f32.gmra.mxu2 %v468_v34  ;;  %684 = vmatmul.f32.gmra.mxu3 %v2890_v49  ;;  %v4639_v34 = vand.u32 4294901760, %v2994_v42  ;;  %v3002_v49 = vand.u32 4294901760, %v181_v41 }
  0x69   :  { %604 = vmatmul.f32.gmra.mxu1 %v2915_v32  ;;  %v3042_v52 = vsub.f32 %v121_v27, %v3027_v61 }
  0x6a   :  { %4794 = vst [vmem:[#allocation30_spill] sm:$0xff] %v3002_v49  ;;  %v3022_v45 = vsub.f32 %v181_v41, %v3002_v49  ;;  %v323_v41 = vsub.f32 %v3014_v9, %v4642_v13  ;;  %v187_v13 = vsel %vm77_vm0, %v73_v54, 0 }
  0x6b   :  { %v4652_v27 = vand.u32 4294901760, %v3042_v52 }
  0x6c   :  { %309 = vmatmul.f32.gmra.mxu0 %v308_v58  ;;  %v483_v58 = vsub.f32 %v2994_v42, %v4639_v34  ;;  %4795 = vst [vmem:[#allocation31_spill] sm:$0xff] %v3022_v45  ;;  %v52_v34 = vld [vmem:[%s4597_s1 + $0x78] sm:$0xff]  ;;  %v324_v44 = vand.u32 4294901760, %v323_v41  ;;  %v74_v41 = vld [vmem:[%s4597_s1 + $0x128] sm:$0xff] }
  0x6e   :  { %v484_v16 = vand.u32 4294901760, %v483_v58  ;;  %v124_v58 = vsel %vm77_vm0, %v52_v34, 0 }
  0x6f   :  { %v3055_v63 = vand.u32 4294901760, %v124_v58 }
  0x70   :  { %477 = vmatmul.f32.gmra.mxu2 %v476_v21  ;;  %688 = vmatmul.f32.gmra.mxu3 %v2918_v22  ;;  %v4649_v21 = vand.u32 4294901760, %v3022_v45  ;;  %v3030_v22 = vand.u32 4294901760, %v184_v59 }
  0x71   :  { %608 = vmatmul.f32.gmra.mxu1 %v2943_v35  ;;  %v3070_v54 = vsub.f32 %v124_v58, %v3055_v63 }
  0x72   :  { %4796 = vst [vmem:[#allocation32_spill] sm:$0xff] %v3030_v22  ;;  %v3050_v42 = vsub.f32 %v184_v59, %v3030_v22  ;;  %v331_v59 = vsub.f32 %v3042_v52, %v4652_v27  ;;  %v190_v27 = vsel %vm77_vm0, %v74_v41, 0 }
  0x73   :  { %v4662_v58 = vand.u32 4294901760, %v3070_v54 }
  0x74   :  { %317 = vmatmul.f32.gmra.mxu0 %v316_v25  ;;  %v491_v25 = vsub.f32 %v3022_v45, %v4649_v21  ;;  %4797 = vst [vmem:[#allocation33_spill] sm:$0xff] %v3050_v42  ;;  %v53_v21 = vld [vmem:[%s4597_s1 + $0x80] sm:$0xff]  ;;  %v332_v11 = vand.u32 4294901760, %v331_v59  ;;  %v75_v59 = vld [vmem:[%s4597_s1 + $0x130] sm:$0xff] }
  0x76   :  { %v492_v34 = vand.u32 4294901760, %v491_v25  ;;  %v127_v25 = vsel %vm77_vm0, %v53_v21, 0 }
  0x77   :  { %v3083_v29 = vand.u32 4294901760, %v127_v25 }
  0x78   :  { %485 = vmatmul.f32.gmra.mxu2 %v484_v16  ;;  %692 = vmatmul.f32.gmra.mxu3 %v2946_v2  ;;  %v4659_v16 = vand.u32 4294901760, %v3050_v42  ;;  %v3058_v2 = vand.u32 4294901760, %v187_v13 }
  0x79   :  { %612 = vmatmul.f32.gmra.mxu1 %v2971_v6  ;;  %v3098_v41 = vsub.f32 %v127_v25, %v3083_v29 }
  0x7a   :  { %4798 = vst [vmem:[#allocation34_spill] sm:$0xff] %v3058_v2  ;;  %v3078_v45 = vsub.f32 %v187_v13, %v3058_v2  ;;  %v339_v13 = vsub.f32 %v3070_v54, %v4662_v58  ;;  %v193_v58 = vsel %vm77_vm0, %v75_v59, 0 }
  0x7b   :  { %v4672_v25 = vand.u32 4294901760, %v3098_v41 }
  0x7c   :  { %325 = vmatmul.f32.gmra.mxu0 %v324_v44  ;;  %v499_v44 = vsub.f32 %v3050_v42, %v4659_v16  ;;  %4799 = vst [vmem:[#allocation35_spill] sm:$0xff] %v3078_v45  ;;  %v54_v16 = vld [vmem:[%s4597_s1 + $0x88] sm:$0xff]  ;;  %v340_v50 = vand.u32 4294901760, %v339_v13  ;;  %v76_v13 = vld [vmem:[%s4597_s1 + $0x138] sm:$0xff] }
  0x7e   :  { %v500_v21 = vand.u32 4294901760, %v499_v44  ;;  %v130_v44 = vsel %vm77_vm0, %v54_v16, 0 }
  0x7f   :  { %v3111_v62 = vand.u32 4294901760, %v130_v44 }
  0x80   :  { %493 = vmatmul.f32.gmra.mxu2 %v492_v34  ;;  %696 = vmatmul.f32.gmra.mxu3 %v2974_v56  ;;  %v4669_v34 = vand.u32 4294901760, %v3078_v45  ;;  %v3086_v56 = vand.u32 4294901760, %v190_v27 }
  0x81   :  { %616 = vmatmul.f32.gmra.mxu1 %v2999_v30  ;;  %v3126_v59 = vsub.f32 %v130_v44, %v3111_v62 }
  0x82   :  { %4800 = vst [vmem:[#allocation36_spill] sm:$0xff] %v3086_v56  ;;  %v3106_v42 = vsub.f32 %v190_v27, %v3086_v56  ;;  %v347_v27 = vsub.f32 %v3098_v41, %v4672_v25  ;;  %v196_v25 = vsel %vm77_vm0, %v76_v13, 0 }
  0x83   :  { %v4688_v44 = vand.u32 4294901760, %v3126_v59  ;;  %v3144_v20 = vand.u32 4294901760, %v196_v25 }
  0x84   :  { %333 = vmatmul.f32.gmra.mxu0 %v332_v11  ;;  %v507_v11 = vsub.f32 %v3078_v45, %v4669_v34  ;;  %4801 = vst [vmem:[#allocation37_spill] sm:$0xff] %v3106_v42  ;;  %v55_v34 = vld [vmem:[%s4597_s1 + $0x90] sm:$0xff]  ;;  %v348_v31 = vand.u32 4294901760, %v347_v27 }
  0x85   :  { %4804 = vst [vmem:[#allocation40_spill] sm:$0xff] %v3144_v20  ;;  %v355_v27 = vsub.f32 %v3126_v59, %v4688_v44  ;;  %v3163_v60 = vsub.f32 %v196_v25, %v3144_v20 }
  0x86   :  { %v508_v16 = vand.u32 4294901760, %v507_v11  ;;  %v133_v11 = vsel %vm77_vm0, %v55_v34, 0 }
  0x87   :  { %v3139_v40 = vand.u32 4294901760, %v133_v11  ;;  %4805 = vst [vmem:[#allocation41_spill] sm:$0xff] %v3163_v60  ;;  %v4703_v47 = vand.u32 4294901760, %v3163_v60 }
  0x88   :  { %501 = vmatmul.f32.gmra.mxu2 %v500_v21  ;;  %700 = vmatmul.f32.gmra.mxu3 %v3002_v49  ;;  %v4683_v21 = vand.u32 4294901760, %v3106_v42  ;;  %v3114_v49 = vand.u32 4294901760, %v193_v58 }
  0x89   :  { %620 = vmatmul.f32.gmra.mxu1 %v3027_v61  ;;  %v3155_v13 = vsub.f32 %v133_v11, %v3139_v40 }
  0x8a   :  { %4802 = vst [vmem:[#allocation38_spill] sm:$0xff] %v3114_v49  ;;  %v3134_v45 = vsub.f32 %v193_v58, %v3114_v49  ;;  %v56_v58 = vld [vmem:[%s4597_s1 + $0x98] sm:$0xff]  ;;  %s2562_s1 = smov [#allocation2]  }
  0x8b   :  { %v4700_v44 = vand.u32 4294901760, %v3155_v13  ;;  %s2502_s8 = sshll.u32 %s2562_s1, 4  ;;  %s2503_s8 = int_to_ptr.vmem [resolvable:$true] %s2502_s8 }
  0x8c   :  { %341 = vmatmul.f32.gmra.mxu0 %v340_v50  ;;  %v515_v50 = vsub.f32 %v3106_v42, %v4683_v21  ;;  %4803 = vst [vmem:[#allocation39_spill] sm:$0xff] %v3134_v45  ;;  %v4697_v10 = vand.u32 4294901760, %v3134_v45 }
  0x8d   :  { %v363_v25 = vsub.f32 %v3155_v13, %v4700_v44 }
  0x8e   :  { %v523_v42 = vsub.f32 %v3134_v45, %v4697_v10 }
  0x90   :  { %509 = vmatmul.f32.gmra.mxu2 %v508_v16  ;;  %704 = vmatmul.f32.gmra.mxu3 %v3030_v22  ;;  %v516_v22 = vand.u32 4294901760, %v515_v50  ;;  %v136_v50 = vsel %vm77_vm0, %v56_v58, 0 }
  0x91   :  { %624 = vmatmul.f32.gmra.mxu1 %v3055_v63  ;;  %v3141_v16 = vpop.f32.mrf.mxu0  ;;  %v3167_v3 = vand.u32 4294901760, %v136_v50 }
  0x92   :  { %v382_v34 = vpop.f32.mrf.mxu2 }
  0x94   :  { %349 = vmatmul.f32.gmra.mxu0 %v348_v31  ;;  %v356_v31 = vand.u32 4294901760, %v355_v27  ;;  %v3180_v27 = vsub.f32 %v136_v50, %v3167_v3 }
  0x96   :  { %v3149_v21 = vpop.f32.mrf.mxu1 }
  0x98   :  { %517 = vmatmul.f32.gmra.mxu2 %v516_v22  ;;  %708 = vmatmul.f32.gmra.mxu3 %v3058_v2  ;;  %v524_v22 = vand.u32 4294901760, %v523_v42  ;;  %v364_v42 = vand.u32 4294901760, %v363_v25 }
  0x99   :  { %628 = vmatmul.f32.gmra.mxu1 %v3083_v29  ;;  %v3171_v2 = vpop.f32.mrf.mxu0 }
  0x9b   :  { %v390_v11 = vpop.f32.mrf.mxu2  ;;  %v645_v26 = vpop.f32.mrf.mxu3 }
  0x9c   :  { %v3169_v58 = vadd.f32 %v645_v26, %v382_v34  ;;  %357 = vmatmul.f32.gmra.mxu0 %v356_v31  ;;  %v531_v26 = vsub.f32 %v3163_v60, %v4703_v47  ;;  %v4706_v34 = vand.u32 4294901760, %v3180_v27 }
  0x9e   :  { %4806 = vst [vmem:[#allocation42_spill] sm:$0xff] %v3169_v58  ;;  %v3174_v10 = vpop.f32.mrf.mxu1  ;;  %v532_v44 = vand.u32 4294901760, %v531_v26 }
  0xa0   :  { %525 = vmatmul.f32.gmra.mxu2 %v524_v22  ;;  %712 = vmatmul.f32.gmra.mxu3 %v3086_v56  ;;  %v371_v22 = vsub.f32 %v3180_v27, %v4706_v34 }
  0xa1   :  { %632 = vmatmul.f32.gmra.mxu1 %v3111_v62  ;;  %v3190_v17 = vpop.f32.mrf.mxu0 }
  0xa2   :  { %v372_v25 = vand.u32 4294901760, %v371_v22 }
  0xa3   :  { %v398_v31 = vpop.f32.mrf.mxu2  ;;  %v649_v45 = vpop.f32.mrf.mxu3 }
  0xa4   :  { %v3188_v58 = vadd.f32 %v649_v45, %v390_v11  ;;  %365 = vmatmul.f32.gmra.mxu0 %v364_v42 }
  0xa6   :  { %4807 = vst [vmem:[#allocation43_spill] sm:$0xff] %v3188_v58  ;;  %v3192_v50 = vpop.f32.mrf.mxu1 }
  0xa8   :  { %533 = vmatmul.f32.gmra.mxu2 %v532_v44  ;;  %716 = vmatmul.f32.gmra.mxu3 %v3114_v49 }
  0xa9   :  { %636 = vmatmul.f32.gmra.mxu1 %v3139_v40  ;;  %v3201_v11 = vpop.f32.mrf.mxu0 }
  0xab   :  { %v406_v47 = vpop.f32.mrf.mxu2  ;;  %v653_v60 = vpop.f32.mrf.mxu3 }
  0xac   :  { %v3199_v45 = vadd.f32 %v653_v60, %v398_v31  ;;  %373 = vmatmul.f32.gmra.mxu0 %v372_v25  ;;  %v4810_v60 = vand.u32 4294901760, %v2650_v37 }
  0xae   :  { %4808 = vst [vmem:[#allocation44_spill] sm:$0xff] %v3199_v45  ;;  %v3203_v26 = vpop.f32.mrf.mxu1 }
  0xb0   :  { %746 = vmatmul.f32.vlgmr.msrb.gmra.mxu2 %v2650_v37  ;;  %720 = vmatmul.f32.gmra.mxu3 %v3144_v20 }
  0xb1   :  { %640 = vmatmul.f32.gmra.mxu1 %v3167_v3  ;;  %v3210_v22 = vpop.f32.mrf.mxu0 }
  0xb3   :  { %v414_v44 = vpop.f32.mrf.mxu2  ;;  %v657_v42 = vpop.f32.mrf.mxu3 }
  0xb4   :  { %v3208_v34 = vadd.f32 %v657_v42, %v406_v47  ;;  %1227 = vmatmul.f32.vlgmr.msrb.gmra.mxu0 %v2619_v24  ;;  %v4812_v42 = vand.u32 4294901760, %v2676_v51 }
  0xb6   :  { %4809 = vst [vmem:[#allocation45_spill] sm:$0xff] %v3208_v34  ;;  %v3212_v49 = vpop.f32.mrf.mxu1 }
  0xb8   :  { %751 = vmatmul.f32.gmra.mxu2 %v2676_v51  ;;  %966 = vmatmul.f32.vlgmr.msrb.gmra.mxu3 %v4810_v60 }
  0xb9   :  { %1406 = vmatmul.f32.vlgmr.msrb.gmra.mxu1 %v2619_v24  ;;  %v3221_v45 = vpop.f32.mrf.mxu0 }
  0xbb   :  { %v422_v31 = vpop.f32.mrf.mxu2  ;;  %v661_v25 = vpop.f32.mrf.mxu3 }
  0xbc   :  { %v3219_v20 = vadd.f32 %v661_v25, %v414_v44  ;;  %1231 = vmatmul.f32.gmra.mxu0 %v2662_v43  ;;  %v4814_v25 = vand.u32 4294901760, %v2694_v0 }
  0xbe   :  { %4811 = vst [vmem:[#allocation46_spill] sm:$0xff] %v3219_v20  ;;  %v3223_v47 = vpop.f32.mrf.mxu1 }
  0xc0   :  { %756 = vmatmul.f32.gmra.mxu2 %v2694_v0  ;;  %972 = vmatmul.f32.gmra.mxu3 %v4812_v42 }
  0xc1   :  { %1410 = vmatmul.f32.gmra.mxu1 %v2662_v43  ;;  %v3232_v34 = vpop.f32.mrf.mxu0 }
  0xc3   :  { %v430_v37 = vpop.f32.mrf.mxu2  ;;  %v665_v60 = vpop.f32.mrf.mxu3 }
  0xc4   :  { %v3230_v24 = vadd.f32 %v665_v60, %v422_v31  ;;  %1235 = vmatmul.f32.gmra.mxu0 %v2678_v53  ;;  %v4816_v60 = vand.u32 4294901760, %v2734_v15 }
  0xc6   :  { %4813 = vst [vmem:[#allocation47_spill] sm:$0xff] %v3230_v24  ;;  %v3234_v44 = vpop.f32.mrf.mxu1 }
  0xc8   :  { %761 = vmatmul.f32.gmra.mxu2 %v2734_v15  ;;  %978 = vmatmul.f32.gmra.mxu3 %v4814_v25 }
  0xc9   :  { %1414 = vmatmul.f32.gmra.mxu1 %v2678_v53  ;;  %v3243_v20 = vpop.f32.mrf.mxu0 }
  0xcb   :  { %v438_v51 = vpop.f32.mrf.mxu2  ;;  %v669_v42 = vpop.f32.mrf.mxu3 }
  0xcc   :  { %v3241_v43 = vadd.f32 %v669_v42, %v430_v37  ;;  %1239 = vmatmul.f32.gmra.mxu0 %v2713_v7  ;;  %v4818_v42 = vand.u32 4294901760, %v2762_v36 }
  0xce   :  { %4815 = vst [vmem:[#allocation48_spill] sm:$0xff] %v3241_v43  ;;  %v3245_v31 = vpop.f32.mrf.mxu1 }
  0xd0   :  { %766 = vmatmul.f32.gmra.mxu2 %v2762_v36  ;;  %984 = vmatmul.f32.gmra.mxu3 %v4816_v60 }
  0xd1   :  { %1418 = vmatmul.f32.gmra.mxu1 %v2713_v7  ;;  %v3254_v24 = vpop.f32.mrf.mxu0 }
  0xd3   :  { %v446_v0 = vpop.f32.mrf.mxu2  ;;  %v673_v25 = vpop.f32.mrf.mxu3 }
  0xd4   :  { %v3252_v53 = vadd.f32 %v673_v25, %v438_v51  ;;  %1243 = vmatmul.f32.gmra.mxu0 %v2747_v28  ;;  %v4820_v25 = vand.u32 4294901760, %v2790_v57 }
  0xd6   :  { %4817 = vst [vmem:[#allocation49_spill] sm:$0xff] %v3252_v53  ;;  %v3256_v37 = vpop.f32.mrf.mxu1 }
  0xd8   :  { %771 = vmatmul.f32.gmra.mxu2 %v2790_v57  ;;  %990 = vmatmul.f32.gmra.mxu3 %v4818_v42 }
  0xd9   :  { %1422 = vmatmul.f32.gmra.mxu1 %v2747_v28  ;;  %v3265_v43 = vpop.f32.mrf.mxu0 }
  0xdb   :  { %v454_v15 = vpop.f32.mrf.mxu2  ;;  %v677_v60 = vpop.f32.mrf.mxu3 }
  0xdc   :  { %v3263_v7 = vadd.f32 %v677_v60, %v446_v0  ;;  %1247 = vmatmul.f32.gmra.mxu0 %v2775_v46  ;;  %v4822_v60 = vand.u32 4294901760, %v2818_v19 }
  0xde   :  { %4819 = vst [vmem:[#allocation50_spill] sm:$0xff] %v3263_v7  ;;  %v3267_v51 = vpop.f32.mrf.mxu1 }
  0xe0   :  { %776 = vmatmul.f32.gmra.mxu2 %v2818_v19  ;;  %996 = vmatmul.f32.gmra.mxu3 %v4820_v25 }
  0xe1   :  { %1426 = vmatmul.f32.gmra.mxu1 %v2775_v46  ;;  %v3276_v53 = vpop.f32.mrf.mxu0 }
  0xe3   :  { %v462_v36 = vpop.f32.mrf.mxu2  ;;  %v681_v42 = vpop.f32.mrf.mxu3 }
  0xe4   :  { %v3274_v28 = vadd.f32 %v681_v42, %v454_v15  ;;  %1251 = vmatmul.f32.gmra.mxu0 %v2803_v4  ;;  %v4824_v42 = vand.u32 4294901760, %v2846_v55 }
  0xe6   :  { %4821 = vst [vmem:[#allocation51_spill] sm:$0xff] %v3274_v28  ;;  %v3278_v0 = vpop.f32.mrf.mxu1 }
  0xe8   :  { %781 = vmatmul.f32.gmra.mxu2 %v2846_v55  ;;  %1002 = vmatmul.f32.gmra.mxu3 %v4822_v60 }
  0xe9   :  { %1430 = vmatmul.f32.gmra.mxu1 %v2803_v4  ;;  %v3287_v7 = vpop.f32.mrf.mxu0 }
  0xeb   :  { %v470_v57 = vpop.f32.mrf.mxu2  ;;  %v685_v25 = vpop.f32.mrf.mxu3 }
  0xec   :  { %v3285_v46 = vadd.f32 %v685_v25, %v462_v36  ;;  %1255 = vmatmul.f32.gmra.mxu0 %v2831_v38  ;;  %v4826_v25 = vand.u32 4294901760, %v2874_v48 }
  0xee   :  { %4823 = vst [vmem:[#allocation52_spill] sm:$0xff] %v3285_v46  ;;  %v3289_v15 = vpop.f32.mrf.mxu1 }
  0xf0   :  { %786 = vmatmul.f32.gmra.mxu2 %v2874_v48  ;;  %1008 = vmatmul.f32.gmra.mxu3 %v4824_v42 }
  0xf1   :  { %1434 = vmatmul.f32.gmra.mxu1 %v2831_v38  ;;  %v3298_v28 = vpop.f32.mrf.mxu0 }
  0xf3   :  { %v478_v19 = vpop.f32.mrf.mxu2  ;;  %v689_v60 = vpop.f32.mrf.mxu3 }
  0xf4   :  { %v3296_v4 = vadd.f32 %v689_v60, %v470_v57  ;;  %1259 = vmatmul.f32.gmra.mxu0 %v2859_v14  ;;  %v4828_v60 = vand.u32 4294901760, %v2902_v39 }
  0xf6   :  { %4825 = vst [vmem:[#allocation53_spill] sm:$0xff] %v3296_v4  ;;  %v3300_v36 = vpop.f32.mrf.mxu1 }
  0xf8   :  { %791 = vmatmul.f32.gmra.mxu2 %v2902_v39  ;;  %1014 = vmatmul.f32.gmra.mxu3 %v4826_v25 }
  0xf9   :  { %1438 = vmatmul.f32.gmra.mxu1 %v2859_v14  ;;  %v3309_v46 = vpop.f32.mrf.mxu0 }
  0xfb   :  { %v486_v55 = vpop.f32.mrf.mxu2  ;;  %v693_v42 = vpop.f32.mrf.mxu3 }
  0xfc   :  { %v3307_v38 = vadd.f32 %v693_v42, %v478_v19  ;;  %1263 = vmatmul.f32.gmra.mxu0 %v2887_v8  ;;  %v4830_v42 = vand.u32 4294901760, %v2930_v33 }
  0xfe   :  { %4827 = vst [vmem:[#allocation54_spill] sm:$0xff] %v3307_v38  ;;  %v3311_v57 = vpop.f32.mrf.mxu1 }
 0x100   :  { %796 = vmatmul.f32.gmra.mxu2 %v2930_v33  ;;  %1020 = vmatmul.f32.gmra.mxu3 %v4828_v60 }
 0x101   :  { %1442 = vmatmul.f32.gmra.mxu1 %v2887_v8  ;;  %v3320_v4 = vpop.f32.mrf.mxu0 }
 0x103   :  { %v494_v48 = vpop.f32.mrf.mxu2  ;;  %v697_v25 = vpop.f32.mrf.mxu3 }
 0x104   :  { %v3318_v14 = vadd.f32 %v697_v25, %v486_v55  ;;  %1267 = vmatmul.f32.gmra.mxu0 %v2915_v32  ;;  %v4832_v25 = vand.u32 4294901760, %v2958_v1 }
 0x106   :  { %4829 = vst [vmem:[#allocation55_spill] sm:$0xff] %v3318_v14  ;;  %v3322_v19 = vpop.f32.mrf.mxu1 }
 0x108   :  { %801 = vmatmul.f32.gmra.mxu2 %v2958_v1  ;;  %1026 = vmatmul.f32.gmra.mxu3 %v4830_v42 }
 0x109   :  { %1446 = vmatmul.f32.gmra.mxu1 %v2915_v32  ;;  %v3331_v38 = vpop.f32.mrf.mxu0 }
 0x10b   :  { %v502_v39 = vpop.f32.mrf.mxu2  ;;  %v701_v60 = vpop.f32.mrf.mxu3 }
 0x10c   :  { %v3329_v8 = vadd.f32 %v701_v60, %v494_v48  ;;  %1271 = vmatmul.f32.gmra.mxu0 %v2943_v35  ;;  %v4834_v60 = vand.u32 4294901760, %v2986_v5 }
 0x10e   :  { %4831 = vst [vmem:[#allocation56_spill] sm:$0xff] %v3329_v8  ;;  %v3333_v55 = vpop.f32.mrf.mxu1 }
 0x110   :  { %806 = vmatmul.f32.gmra.mxu2 %v2986_v5  ;;  %1032 = vmatmul.f32.gmra.mxu3 %v4832_v25 }
 0x111   :  { %1450 = vmatmul.f32.gmra.mxu1 %v2943_v35  ;;  %v3342_v14 = vpop.f32.mrf.mxu0 }
 0x113   :  { %v510_v33 = vpop.f32.mrf.mxu2  ;;  %v705_v42 = vpop.f32.mrf.mxu3 }
 0x114   :  { %v3340_v32 = vadd.f32 %v705_v42, %v502_v39  ;;  %1275 = vmatmul.f32.gmra.mxu0 %v2971_v6  ;;  %v4836_v42 = vand.u32 4294901760, %v3014_v9 }
 0x116   :  { %4833 = vst [vmem:[#allocation57_spill] sm:$0xff] %v3340_v32  ;;  %v3344_v48 = vpop.f32.mrf.mxu1 }
 0x118   :  { %811 = vmatmul.f32.gmra.mxu2 %v3014_v9  ;;  %1038 = vmatmul.f32.gmra.mxu3 %v4834_v60 }
 0x119   :  { %1454 = vmatmul.f32.gmra.mxu1 %v2971_v6  ;;  %v3353_v8 = vpop.f32.mrf.mxu0 }
 0x11b   :  { %v518_v1 = vpop.f32.mrf.mxu2  ;;  %v709_v25 = vpop.f32.mrf.mxu3 }
 0x11c   :  { %v3351_v35 = vadd.f32 %v709_v25, %v510_v33  ;;  %1279 = vmatmul.f32.gmra.mxu0 %v2999_v30  ;;  %v4838_v25 = vand.u32 4294901760, %v3042_v52 }
 0x11e   :  { %4835 = vst [vmem:[#allocation58_spill] sm:$0xff] %v3351_v35  ;;  %v3355_v39 = vpop.f32.mrf.mxu1 }
 0x120   :  { %816 = vmatmul.f32.gmra.mxu2 %v3042_v52  ;;  %1044 = vmatmul.f32.gmra.mxu3 %v4836_v42 }
 0x121   :  { %1458 = vmatmul.f32.gmra.mxu1 %v2999_v30  ;;  %v3364_v32 = vpop.f32.mrf.mxu0 }
 0x123   :  { %v526_v5 = vpop.f32.mrf.mxu2  ;;  %v713_v60 = vpop.f32.mrf.mxu3 }
 0x124   :  { %v3362_v6 = vadd.f32 %v713_v60, %v518_v1  ;;  %1283 = vmatmul.f32.gmra.mxu0 %v3027_v61  ;;  %v4842_v60 = vand.u32 4294901760, %v3070_v54 }
 0x126   :  { %4837 = vst [vmem:[#allocation59_spill] sm:$0xff] %v3362_v6  ;;  %v3366_v33 = vpop.f32.mrf.mxu1 }
 0x128   :  { %821 = vmatmul.f32.gmra.mxu2 %v3070_v54  ;;  %1050 = vmatmul.f32.gmra.mxu3 %v4838_v25 }
 0x129   :  { %1462 = vmatmul.f32.gmra.mxu1 %v3027_v61  ;;  %v3375_v35 = vpop.f32.mrf.mxu0 }
 0x12a   :  { %4840 = vst [vmem:[#allocation61_spill] sm:$0xff] %v3375_v35  ;;  %v4867_v35 = vld [vmem:[#allocation12_spill] sm:$0xff] }
 0x12b   :  { %v534_v9 = vpop.f32.mrf.mxu2  ;;  %v717_v42 = vpop.f32.mrf.mxu3 }
 0x12c   :  { %v3373_v30 = vadd.f32 %v717_v42, %v526_v5  ;;  %1287 = vmatmul.f32.gmra.mxu0 %v3055_v63  ;;  %v566_v42 = vadd.f32 %v3149_v21, %v3141_v16  ;;  %v4845_v21 = vand.u32 4294901760, %v3126_v59 }
 0x12e   :  { %4839 = vst [vmem:[#allocation60_spill] sm:$0xff] %v3373_v30  ;;  %v3377_v1 = vpop.f32.mrf.mxu1  ;;  %v4844_v30 = vand.u32 4294901760, %v3098_v41 }
 0x12f   :  { %4841 = vst [vmem:[#allocation62_spill] sm:$0xff] %v3377_v1  ;;  %v602_v1 = vadd.f32 %v3267_v51, %v3265_v43  ;;  %v4868_v51 = vld [vmem:[#allocation15_spill] sm:$0xff] }
 0x130   :  { %826 = vmatmul.f32.gmra.mxu2 %v3098_v41  ;;  %1056 = vmatmul.f32.gmra.mxu3 %v4842_v60  ;;  %v570_v41 = vadd.f32 %v3174_v10, %v3171_v2  ;;  %v4846_v10 = vand.u32 4294901760, %v3155_v13 }
 0x131   :  { %1466 = vmatmul.f32.gmra.mxu1 %v3055_v63  ;;  %v1228_v6 = vpop.f32.mrf.mxu0 }
 0x133   :  { %v747_v52 = vpop.f32.mrf.mxu2  ;;  %v721_v25 = vpop.f32.mrf.mxu3 }
 0x134   :  { %v3384_v61 = vadd.f32 %v721_v25, %v534_v9  ;;  %1291 = vmatmul.f32.gmra.mxu0 %v3083_v29  ;;  %v748_v54 = vadd.f32 %v747_v52, %v566_v42 }
 0x136   :  { %4843 = vst [vmem:[#allocation63_spill] sm:$0xff] %v3384_v61  ;;  %v1407_v5 = vpop.f32.mrf.mxu1 }
 0x138   :  { %831 = vmatmul.f32.gmra.mxu2 %v3126_v59  ;;  %1062 = vmatmul.f32.gmra.mxu3 %v4844_v30  ;;  %v574_v59 = vadd.f32 %v3192_v50, %v3190_v17 }
 0x139   :  { %1470 = vmatmul.f32.gmra.mxu1 %v3083_v29  ;;  %v1232_v9 = vpop.f32.mrf.mxu0 }
 0x13b   :  { %v752_v63 = vpop.f32.mrf.mxu2  ;;  %v967_v60 = vpop.f32.mrf.mxu3 }
 0x13c   :  { %v968_v56 = vadd.f32 %v967_v60, %v748_v54  ;;  %1295 = vmatmul.f32.gmra.mxu0 %v3111_v62  ;;  %v753_v29 = vadd.f32 %v752_v63, %v570_v41  ;;  %v4848_v41 = vand.u32 4294901760, %v3180_v27 }
 0x13e   :  { %v1229_v25 = vadd.f32 %v1228_v6, %v968_v56  ;;  %v1411_v61 = vpop.f32.mrf.mxu1 }
 0x140   :  { %836 = vmatmul.f32.gmra.mxu2 %v3155_v13  ;;  %v3395_v58 = vadd.f32 %v1407_v5, %v1229_v25  ;;  %1068 = vmatmul.f32.gmra.mxu3 %v4845_v21 }
 0x141   :  { %1474 = vmatmul.f32.gmra.mxu1 %v3111_v62  ;;  %v1236_v6 = vpop.f32.mrf.mxu0 }
 0x142   :  { %1594 = vst [vmem:[#allocation1] sm:$0xff] %v3395_v58 }
 0x143   :  { %v757_v16 = vpop.f32.mrf.mxu2  ;;  %v973_v56 = vpop.f32.mrf.mxu3 }
 0x144   :  { %v974_v30 = vadd.f32 %v973_v56, %v753_v29  ;;  %1299 = vmatmul.f32.gmra.mxu0 %v3139_v40  ;;  %v758_v63 = vadd.f32 %v757_v16, %v574_v59  ;;  %v582_v29 = vadd.f32 %v3212_v49, %v3210_v22 }
 0x146   :  { %v1415_v52 = vpop.f32.mrf.mxu1  ;;  %v1233_v5 = vadd.f32 %v1232_v9, %v974_v30 }
 0x148   :  { %841 = vmatmul.f32.gmra.mxu2 %v3180_v27  ;;  %1074 = vmatmul.f32.gmra.mxu3 %v4846_v10  ;;  %v3409_v62 = vadd.f32 %v1411_v61, %v1233_v5 }
 0x149   :  { %v3411_v2 = vld [vmem:[#allocation1 + $0x4] ss:$9 sm:$0xff]  ;;  %v3415_v54 = vld [vmem:[#allocation1 + $0x6] ss:$9 sm:$0xff]  ;;  %1478 = vmatmul.f32.gmra.mxu1 %v3139_v40  ;;  %v1240_v13 = vpop.f32.mrf.mxu0  ;;  %v578_v40 = vadd.f32 %v3203_v26, %v3201_v11  ;;  %v4849_v26 = vand.u32 4294901760, %v2608_v18 }
 0x14a   :  { %v3413_v42 = vld [vmem:[#allocation1 + $0x5] ss:$9 sm:$0xff]  ;;  %v3418_v60 = vld [vmem:[#allocation1 + $0x7] ss:$9 sm:$0xff]  ;;  %v3525_v43 = vperm.slane %v3411_v2, 0 }
 0x14b   :  { %1687 = vst [vmem:[#allocation1] sm:$0xff] %v3409_v62  ;;  %v762_v17 = vpop.f32.mrf.mxu2  ;;  %v979_v50 = vpop.f32.mrf.mxu3 }
 0x14c   :  { %v980_v9 = vadd.f32 %v979_v50, %v758_v63  ;;  %1303 = vmatmul.f32.gmra.mxu0 %v3167_v3  ;;  %v763_v56 = vadd.f32 %v762_v17, %v578_v40  ;;  %v586_v63 = vadd.f32 %v3223_v47, %v3221_v45  ;;  %v1567_v17 = vrot.slane %v3395_v58, 1 }
 0x14d   :  { %v1568_v50 = vrot.slane %v3395_v58, 2 }
 0x14e   :  { %v1237_v25 = vadd.f32 %v1236_v6, %v980_v9  ;;  %v1419_v61 = vpop.f32.mrf.mxu1  ;;  %v1569_v9 = vrot.slane %v3395_v58, 3 }
 0x150   :  { %846 = vmatmul.f32.gmra.mxu2 %v2608_v18  ;;  %v3423_v21 = vadd.f32 %v1415_v52, %v1237_v25  ;;  %1080 = vmatmul.f32.gmra.mxu3 %v4848_v41 }
 0x151   :  { %1482 = vmatmul.f32.gmra.mxu1 %v3167_v3  ;;  %v1244_v10 = vpop.f32.mrf.mxu0 }
 0x152   :  { %4847 = vst [vmem:[#allocation64_spill] sm:$0xff] %v3423_v21  ;;  %v3432_v16 = vld [vmem:[#allocation1 + $0x4] ss:$9 sm:$0xff]  ;;  %v3436_v52 = vld [vmem:[#allocation1 + $0x6] ss:$9 sm:$0xff] }
 0x153   :  { %v767_v6 = vpop.f32.mrf.mxu2  ;;  %v985_v30 = vpop.f32.mrf.mxu3  ;;  %v3434_v5 = vld [vmem:[#allocation1 + $0x5] ss:$9 sm:$0xff]  ;;  %v3438_v59 = vld [vmem:[#allocation1 + $0x7] ss:$9 sm:$0xff] }
 0x154   :  { %v768_v27 = vadd.f32 %v767_v6, %v582_v29  ;;  %1780 = vst [vmem:[#allocation1] sm:$0xff] %v3423_v21  ;;  %v986_v11 = vadd.f32 %v985_v30, %v763_v56  ;;  %1307 = vmatmul.f32.gmra.mxu0 %v2599_v12  ;;  %v4855_v6 = vld [vmem:[#allocation5_spill] sm:$0xff]  ;;  %v1570_v30 = vperm.slane %v3395_v58, 0  ;;  %v4864_v21 = vld [vmem:[#allocation10_spill] sm:$0xff] }
 0x156   :  { %v1423_v3 = vpop.f32.mrf.mxu1  ;;  %v1241_v49 = vadd.f32 %v1240_v13, %v986_v11  ;;  %v1571_v11 = vperm.slane %v1567_v17, 0 }
 0x158   :  { %851 = vmatmul.f32.gmra.mxu2 %v2617_v23  ;;  %1086 = vmatmul.f32.gmra.mxu3 %v4849_v26  ;;  %v3445_v22 = vadd.f32 %v1419_v61, %v1241_v49  ;;  %v1572_v49 = vperm.slane %v1568_v50, 0  ;;  %v1573_v26 = vperm.slane %v1569_v9, 0 }
 0x159   :  { %1486 = vmatmul.f32.gmra.mxu1 %v2599_v12  ;;  %v1248_v29 = vpop.f32.mrf.mxu0 }
 0x15a   :  { %4850 = vst [vmem:[#allocation65_spill] sm:$0xff] %v3445_v22 }
 0x15b   :  { %v772_v25 = vpop.f32.mrf.mxu2  ;;  %v991_v13 = vpop.f32.mrf.mxu3  ;;  %v3453_v41 = vld [vmem:[#allocation1 + $0x4] ss:$9 sm:$0xff]  ;;  %v3457_v56 = vld [vmem:[#allocation1 + $0x6] ss:$9 sm:$0xff] }
 0x15c   :  { %4851 = vst [vmem:[#allocation66_spill] sm:$0xff] %v3453_v41  ;;  %v773_v40 = vadd.f32 %v772_v25, %v586_v63  ;;  %v992_v18 = vadd.f32 %v991_v13, %v768_v27  ;;  %v3455_v61 = vld [vmem:[#allocation1 + $0x5] ss:$9 sm:$0xff]  ;;  %v3459_v12 = vld [vmem:[#allocation1 + $0x7] ss:$9 sm:$0xff]  ;;  %1311 = vmatmul.f32.gmra.mxu0 %v4855_v6  ;;  %v4857_v25 = vand.u32 4294901760, %v2617_v23  ;;  %v590_v13 = vadd.f32 %v3234_v44, %v3232_v34 }
 0x15d   :  { %4852 = vst [vmem:[#allocation67_spill] sm:$0xff] %v3455_v61  ;;  %v4856_v63 = vld [vmem:[#allocation7_spill] sm:$0xff]  ;;  %v4859_v34 = vld [vmem:[#allocation9_spill] sm:$0xff]  ;;  %v4861_v61 = vld [vmem:[#allocation8_spill] sm:$0xff]  ;;  %v598_v41 = vadd.f32 %v3256_v37, %v3254_v24 }
 0x15e   :  { %4853 = vst [vmem:[#allocation68_spill] sm:$0xff] %v3457_v56  ;;  %v1245_v45 = vadd.f32 %v1244_v10, %v992_v18  ;;  %v1427_v47 = vpop.f32.mrf.mxu1  ;;  %v594_v56 = vadd.f32 %v3245_v31, %v3243_v20  ;;  %v4862_v20 = vld [vmem:[#allocation11_spill] sm:$0xff]  ;;  %v4865_v24 = vld [vmem:[#allocation13_spill] sm:$0xff] }
 0x15f   :  { %4854 = vst [vmem:[#allocation69_spill] sm:$0xff] %v3459_v12  ;;  %v4858_v12 = vld [vmem:[#allocation6_spill] sm:$0xff] }
 0x160   :  { %1873 = vst [vmem:[#allocation1] sm:$0xff] %v3445_v22  ;;  %856 = vmatmul.f32.gmra.mxu2 %v4856_v63  ;;  %v1424_v27 = vadd.f32 %v1423_v3, %v1245_v45  ;;  %1092 = vmatmul.f32.gmra.mxu3 %v4857_v25 }
 0x161   :  { %1490 = vmatmul.f32.gmra.mxu1 %v4855_v6  ;;  %v1252_v45 = vpop.f32.mrf.mxu0  ;;  %v4860_v6 = vand.u32 4294901760, %v4856_v63 }
 0x162   :  { %v3470_v10 = vmul.f32 %v1570_v30, %v1424_v27  ;;  %v3472_v18 = vmul.f32 %v1571_v11, %v1424_v27  ;;  %v3474_v22 = vmul.f32 %v1572_v49, %v1424_v27  ;;  %v3476_v58 = vmul.f32 %v1573_v26, %v1424_v27 }
 0x163   :  { %v777_v17 = vpop.f32.mrf.mxu2  ;;  %v997_v50 = vpop.f32.mrf.mxu3 }
 0x164   :  { %v778_v9 = vadd.f32 %v777_v17, %v590_v13  ;;  %v998_v3 = vadd.f32 %v997_v50, %v773_v40  ;;  %1315 = vmatmul.f32.gmra.mxu0 %v4858_v12 }
 0x166   :  { %v1249_v23 = vadd.f32 %v1248_v29, %v998_v3  ;;  %v1431_v25 = vpop.f32.mrf.mxu1 }
 0x168   :  { %861 = vmatmul.f32.gmra.mxu2 %v4859_v34  ;;  %v1428_v44 = vadd.f32 %v1427_v47, %v1249_v23  ;;  %1098 = vmatmul.f32.gmra.mxu3 %v4860_v6 }
 0x169   :  { %1494 = vmatmul.f32.gmra.mxu1 %v4858_v12  ;;  %v1256_v23 = vpop.f32.mrf.mxu0  ;;  %v4863_v12 = vand.u32 4294901760, %v4859_v34 }
 0x16a   :  { %v3485_v27 = vmul.f32 %v1570_v30, %v1428_v44  ;;  %v3487_v13 = vmul.f32 %v1571_v11, %v1428_v44  ;;  %v3489_v40 = vmul.f32 %v1572_v49, %v1428_v44  ;;  %v3491_v29 = vmul.f32 %v1573_v26, %v1428_v44 }
 0x16b   :  { %v782_v17 = vpop.f32.mrf.mxu2  ;;  %v1003_v50 = vpop.f32.mrf.mxu3 }
 0x16c   :  { %v783_v3 = vadd.f32 %v782_v17, %v594_v56  ;;  %v1004_v47 = vadd.f32 %v1003_v50, %v778_v9  ;;  %1319 = vmatmul.f32.gmra.mxu0 %v4861_v61 }
 0x16e   :  { %v1253_v63 = vadd.f32 %v1252_v45, %v1004_v47  ;;  %v1435_v6 = vpop.f32.mrf.mxu1 }
 0x170   :  { %866 = vmatmul.f32.gmra.mxu2 %v4862_v20  ;;  %v1432_v31 = vadd.f32 %v1431_v25, %v1253_v63  ;;  %1104 = vmatmul.f32.gmra.mxu3 %v4863_v12 }
 0x171   :  { %1498 = vmatmul.f32.gmra.mxu1 %v4861_v61  ;;  %v1260_v63 = vpop.f32.mrf.mxu0  ;;  %v4866_v61 = vand.u32 4294901760, %v4862_v20 }
 0x172   :  { %v3500_v44 = vmul.f32 %v1570_v30, %v1432_v31  ;;  %v3502_v56 = vmul.f32 %v1571_v11, %v1432_v31  ;;  %v3504_v9 = vmul.f32 %v1572_v49, %v1432_v31  ;;  %v3506_v45 = vmul.f32 %v1573_v26, %v1432_v31 }
 0x173   :  { %v787_v17 = vpop.f32.mrf.mxu2  ;;  %v1009_v50 = vpop.f32.mrf.mxu3 }
 0x174   :  { %v788_v47 = vadd.f32 %v787_v17, %v598_v41  ;;  %v1010_v25 = vadd.f32 %v1009_v50, %v783_v3  ;;  %1323 = vmatmul.f32.gmra.mxu0 %v4864_v21 }
 0x176   :  { %v1257_v34 = vadd.f32 %v1256_v23, %v1010_v25  ;;  %v1439_v12 = vpop.f32.mrf.mxu1 }
 0x178   :  { %871 = vmatmul.f32.gmra.mxu2 %v4865_v24  ;;  %v1436_v37 = vadd.f32 %v1435_v6, %v1257_v34  ;;  %1110 = vmatmul.f32.gmra.mxu3 %v4866_v61 }
 0x179   :  { %1502 = vmatmul.f32.gmra.mxu1 %v4864_v21  ;;  %v1264_v34 = vpop.f32.mrf.mxu0 }
 0x17a   :  { %v3515_v31 = vmul.f32 %v1570_v30, %v1436_v37  ;;  %v3517_v41 = vmul.f32 %v1571_v11, %v1436_v37  ;;  %v3519_v3 = vmul.f32 %v1572_v49, %v1436_v37  ;;  %v3521_v23 = vmul.f32 %v1573_v26, %v1436_v37 }
 0x17b   :  { %v792_v17 = vpop.f32.mrf.mxu2  ;;  %v1015_v50 = vpop.f32.mrf.mxu3  ;;  %v3529_v30 = vperm.slane %v3413_v42, 0  ;;  %v3532_v11 = vperm.slane %v3415_v54, 0  ;;  %v4869_v49 = vand.u32 4294901760, %v4865_v24  ;;  %v606_v54 = vadd.f32 %v3278_v0, %v3276_v53  ;;  %v4871_v0 = vld [vmem:[#allocation17_spill] sm:$0xff] }
 0x17c   :  { %v793_v25 = vadd.f32 %v792_v17, %v602_v1  ;;  %v1016_v6 = vadd.f32 %v1015_v50, %v788_v47  ;;  %1327 = vmatmul.f32.gmra.mxu0 %v4867_v35  ;;  %v3535_v1 = vperm.slane %v3418_v60, 0 }
 0x17e   :  { %v1261_v20 = vadd.f32 %v1260_v63, %v1016_v6  ;;  %v1443_v61 = vpop.f32.mrf.mxu1 }
 0x180   :  { %876 = vmatmul.f32.gmra.mxu2 %v4868_v51  ;;  %v1440_v21 = vadd.f32 %v1439_v12, %v1261_v20  ;;  %1116 = vmatmul.f32.gmra.mxu3 %v4869_v49 }
 0x181   :  { %1506 = vmatmul.f32.gmra.mxu1 %v4867_v35  ;;  %v1268_v17 = vpop.f32.mrf.mxu0 }
 0x182   :  { %v1611_v2 = vmul.f32 %v3525_v43, %v1440_v21  ;;  %v1615_v26 = vmul.f32 %v3529_v30, %v1440_v21  ;;  %v1619_v47 = vmul.f32 %v3532_v11, %v1440_v21  ;;  %v1623_v42 = vmul.f32 %v3535_v1, %v1440_v21  ;;  %v4870_v21 = vld [vmem:[#allocation14_spill] sm:$0xff] }
 0x183   :  { %v797_v63 = vpop.f32.mrf.mxu2  ;;  %v1021_v12 = vpop.f32.mrf.mxu3 }
 0x184   :  { %v3547_v60 = vadd.f32 %v1611_v2, %v3470_v10  ;;  %v3550_v24 = vadd.f32 %v1615_v26, %v3472_v18  ;;  %v3553_v35 = vadd.f32 %v1619_v47, %v3474_v22  ;;  %v3556_v37 = vadd.f32 %v1623_v42, %v3476_v58  ;;  %1331 = vmatmul.f32.gmra.mxu0 %v4870_v21 }
 0x185   :  { %v798_v50 = vadd.f32 %v797_v63, %v606_v54  ;;  %v1022_v6 = vadd.f32 %v1021_v12, %v793_v25  ;;  %v4872_v10 = vand.u32 4294901760, %v4868_v51  ;;  %v610_v22 = vadd.f32 %v3289_v15, %v3287_v7 }
 0x186   :  { %v1447_v20 = vpop.f32.mrf.mxu1 }
 0x187   :  { %v1265_v53 = vadd.f32 %v1264_v34, %v1022_v6  ;;  %v4873_v6 = vld [vmem:[#allocation16_spill] sm:$0xff] }
 0x188   :  { %881 = vmatmul.f32.gmra.mxu2 %v4871_v0  ;;  %1122 = vmatmul.f32.gmra.mxu3 %v4872_v10 }
 0x189   :  { %v1444_v18 = vadd.f32 %v1443_v61, %v1265_v53  ;;  %1510 = vmatmul.f32.gmra.mxu1 %v4870_v21  ;;  %v1272_v51 = vpop.f32.mrf.mxu0  ;;  %v4874_v21 = vld [vmem:[#allocation19_spill] sm:$0xff]  ;;  %v4875_v53 = vand.u32 4294901760, %v4871_v0 }
 0x18b   :  { %v1612_v58 = vmul.f32 %v3525_v43, %v1444_v18  ;;  %v1616_v49 = vmul.f32 %v3529_v30, %v1444_v18  ;;  %v1620_v25 = vmul.f32 %v3532_v11, %v1444_v18  ;;  %v1624_v2 = vmul.f32 %v3535_v1, %v1444_v18  ;;  %v802_v34 = vpop.f32.mrf.mxu2  ;;  %v1027_v26 = vpop.f32.mrf.mxu3 }
 0x18c   :  { %v803_v47 = vadd.f32 %v802_v34, %v610_v22  ;;  %v1028_v42 = vadd.f32 %v1027_v26, %v798_v50  ;;  %1335 = vmatmul.f32.gmra.mxu0 %v4873_v6  ;;  %v4876_v26 = vld [vmem:[#allocation18_spill] sm:$0xff] }
 0x18d   :  { %v3570_v61 = vadd.f32 %v1612_v58, %v3485_v27  ;;  %v3573_v54 = vadd.f32 %v1616_v49, %v3487_v13  ;;  %v3576_v7 = vadd.f32 %v1620_v25, %v3489_v40  ;;  %v3579_v15 = vadd.f32 %v1624_v2, %v3491_v29 }
 0x18e   :  { %v1269_v63 = vadd.f32 %v1268_v17, %v1028_v42  ;;  %v1451_v12 = vpop.f32.mrf.mxu1  ;;  %v614_v17 = vadd.f32 %v3300_v36, %v3298_v28  ;;  %v4877_v36 = vld [vmem:[#allocation21_spill] sm:$0xff] }
 0x190   :  { %886 = vmatmul.f32.gmra.mxu2 %v4874_v21  ;;  %v1448_v50 = vadd.f32 %v1447_v20, %v1269_v63  ;;  %1128 = vmatmul.f32.gmra.mxu3 %v4875_v53 }
 0x191   :  { %1514 = vmatmul.f32.gmra.mxu1 %v4873_v6  ;;  %v1276_v49 = vpop.f32.mrf.mxu0 }
 0x192   :  { %v1613_v27 = vmul.f32 %v3525_v43, %v1448_v50  ;;  %v1617_v13 = vmul.f32 %v3529_v30, %v1448_v50  ;;  %v1621_v40 = vmul.f32 %v3532_v11, %v1448_v50  ;;  %v1625_v29 = vmul.f32 %v3535_v1, %v1448_v50 }
 0x193   :  { %v807_v10 = vpop.f32.mrf.mxu2  ;;  %v1033_v18 = vpop.f32.mrf.mxu3 }
 0x194   :  { %v3593_v20 = vadd.f32 %v1613_v27, %v3500_v44  ;;  %v3596_v0 = vadd.f32 %v1617_v13, %v3502_v56  ;;  %v3599_v22 = vadd.f32 %v1621_v40, %v3504_v9  ;;  %v3602_v58 = vadd.f32 %v1625_v29, %v3506_v45  ;;  %1339 = vmatmul.f32.gmra.mxu0 %v4876_v26  ;;  %v4879_v40 = vld [vmem:[#allocation20_spill] sm:$0xff] }
 0x195   :  { %v808_v25 = vadd.f32 %v807_v10, %v614_v17  ;;  %v1034_v2 = vadd.f32 %v1033_v18, %v803_v47  ;;  %v4878_v44 = vand.u32 4294901760, %v4874_v21  ;;  %v618_v9 = vadd.f32 %v3311_v57, %v3309_v46 }
 0x196   :  { %v1455_v34 = vpop.f32.mrf.mxu1  ;;  %v1644_v45 = vrot.slane %v3409_v62, 1  ;;  %v1645_v21 = vrot.slane %v3409_v62, 2  ;;  %v3632_v29 = vperm.slane %v3409_v62, 0  ;;  %v4881_v18 = vand.u32 4294901760, %v4877_v36 }
 0x197   :  { %v1273_v28 = vadd.f32 %v1272_v51, %v1034_v2  ;;  %v622_v2 = vadd.f32 %v3322_v19, %v3320_v4  ;;  %v4883_v19 = vld [vmem:[#allocation25_spill] sm:$0xff] }
 0x198   :  { %891 = vmatmul.f32.gmra.mxu2 %v4877_v36  ;;  %1134 = vmatmul.f32.gmra.mxu3 %v4878_v44  ;;  %v3634_v17 = vperm.slane %v1644_v45, 0 }
 0x199   :  { %v1452_v56 = vadd.f32 %v1451_v12, %v1273_v28  ;;  %1518 = vmatmul.f32.gmra.mxu1 %v4876_v26  ;;  %v1646_v12 = vrot.slane %v3409_v62, 3  ;;  %v1280_v13 = vpop.f32.mrf.mxu0 }
 0x19b   :  { %v1614_v42 = vmul.f32 %v3525_v43, %v1452_v56  ;;  %v1618_v47 = vmul.f32 %v3529_v30, %v1452_v56  ;;  %v1622_v63 = vmul.f32 %v3532_v11, %v1452_v56  ;;  %v1626_v51 = vmul.f32 %v3535_v1, %v1452_v56  ;;  %v812_v6 = vpop.f32.mrf.mxu2  ;;  %v1039_v50 = vpop.f32.mrf.mxu3 }
 0x19c   :  { %v813_v53 = vadd.f32 %v812_v6, %v618_v9  ;;  %v1040_v27 = vadd.f32 %v1039_v50, %v808_v25  ;;  %1343 = vmatmul.f32.gmra.mxu0 %v4879_v40  ;;  %v3638_v10 = vperm.slane %v1646_v12, 0 }
 0x19d   :  { %v3619_v46 = vadd.f32 %v1614_v42, %v3515_v31  ;;  %v3622_v57 = vadd.f32 %v1618_v47, %v3517_v41  ;;  %v3625_v43 = vadd.f32 %v1622_v63, %v3519_v3  ;;  %v3628_v30 = vadd.f32 %v1626_v51, %v3521_v23  ;;  %v4880_v41 = vld [vmem:[#allocation23_spill] sm:$0xff]  ;;  %v4882_v63 = vld [vmem:[#allocation22_spill] sm:$0xff] }
 0x19e   :  { %v1277_v11 = vadd.f32 %v1276_v49, %v1040_v27  ;;  %v1459_v1 = vpop.f32.mrf.mxu1  ;;  %v3636_v31 = vperm.slane %v1645_v21, 0 }
 0x1a0   :  { %896 = vmatmul.f32.gmra.mxu2 %v4880_v41  ;;  %v1456_v3 = vadd.f32 %v1455_v34, %v1277_v11  ;;  %1140 = vmatmul.f32.gmra.mxu3 %v4881_v18  ;;  %v4886_v18 = vld [vmem:[#allocation27_spill] sm:$0xff] }
 0x1a1   :  { %1522 = vmatmul.f32.gmra.mxu1 %v4879_v40  ;;  %v1284_v9 = vpop.f32.mrf.mxu0 }
 0x1a2   :  { %v1655_v23 = vmul.f32 %v3632_v29, %v1456_v3  ;;  %v1659_v49 = vmul.f32 %v3634_v17, %v1456_v3  ;;  %v1663_v62 = vmul.f32 %v3636_v31, %v1456_v3  ;;  %v1667_v25 = vmul.f32 %v3638_v10, %v1456_v3  ;;  %v4885_v3 = vld [vmem:[#allocation24_spill] sm:$0xff] }
 0x1a3   :  { %v817_v26 = vpop.f32.mrf.mxu2  ;;  %v1045_v28 = vpop.f32.mrf.mxu3 }
 0x1a4   :  { %v3651_v34 = vadd.f32 %v1655_v23, %v3547_v60  ;;  %v3654_v36 = vadd.f32 %v1659_v49, %v3550_v24  ;;  %v3657_v44 = vadd.f32 %v1663_v62, %v3553_v35  ;;  %v3660_v56 = vadd.f32 %v1667_v25, %v3556_v37  ;;  %1347 = vmatmul.f32.gmra.mxu0 %v4882_v63 }
 0x1a5   :  { %v818_v45 = vadd.f32 %v817_v26, %v622_v2  ;;  %v1046_v42 = vadd.f32 %v1045_v28, %v813_v53  ;;  %v4884_v60 = vand.u32 4294901760, %v4880_v41  ;;  %v626_v35 = vadd.f32 %v3333_v55, %v3331_v38 }
 0x1a6   :  { %v1463_v47 = vpop.f32.mrf.mxu1  ;;  %v4887_v49 = vand.u32 4294901760, %v4883_v19  ;;  %v630_v62 = vadd.f32 %v3344_v48, %v3342_v14  ;;  %v4889_v48 = vld [vmem:[#allocation29_spill] sm:$0xff] }
 0x1a7   :  { %v1281_v4 = vadd.f32 %v1280_v13, %v1046_v42 }
 0x1a8   :  { %901 = vmatmul.f32.gmra.mxu2 %v4883_v19  ;;  %1146 = vmatmul.f32.gmra.mxu3 %v4884_v60  ;;  %v4888_v19 = vld [vmem:[#allocation26_spill] sm:$0xff] }
 0x1a9   :  { %v1460_v24 = vadd.f32 %v1459_v1, %v1281_v4  ;;  %1526 = vmatmul.f32.gmra.mxu1 %v4882_v63  ;;  %v1288_v13 = vpop.f32.mrf.mxu0 }
 0x1ab   :  { %v1656_v37 = vmul.f32 %v3632_v29, %v1460_v24  ;;  %v1660_v51 = vmul.f32 %v3634_v17, %v1460_v24  ;;  %v1664_v6 = vmul.f32 %v3636_v31, %v1460_v24  ;;  %v1668_v50 = vmul.f32 %v3638_v10, %v1460_v24  ;;  %v822_v21 = vpop.f32.mrf.mxu2  ;;  %v1051_v12 = vpop.f32.mrf.mxu3 }
 0x1ac   :  { %v823_v53 = vadd.f32 %v822_v21, %v626_v35  ;;  %v1052_v27 = vadd.f32 %v1051_v12, %v818_v45  ;;  %1351 = vmatmul.f32.gmra.mxu0 %v4885_v3 }
 0x1ad   :  { %v3674_v11 = vadd.f32 %v1656_v37, %v3570_v61  ;;  %v3677_v1 = vadd.f32 %v1660_v51, %v3573_v54  ;;  %v3680_v38 = vadd.f32 %v1664_v6, %v3576_v7  ;;  %v3683_v55 = vadd.f32 %v1668_v50, %v3579_v15 }
 0x1ae   :  { %v1285_v40 = vadd.f32 %v1284_v9, %v1052_v27  ;;  %v1467_v41 = vpop.f32.mrf.mxu1  ;;  %v4892_v27 = vld [vmem:[#allocation31_spill] sm:$0xff] }
 0x1b0   :  { %906 = vmatmul.f32.gmra.mxu2 %v4886_v18  ;;  %v1464_v23 = vadd.f32 %v1463_v47, %v1285_v40  ;;  %1152 = vmatmul.f32.gmra.mxu3 %v4887_v49 }
 0x1b1   :  { %1530 = vmatmul.f32.gmra.mxu1 %v4885_v3  ;;  %v1292_v42 = vpop.f32.mrf.mxu0 }
 0x1b2   :  { %v1657_v61 = vmul.f32 %v3632_v29, %v1464_v23  ;;  %v1661_v54 = vmul.f32 %v3634_v17, %v1464_v23  ;;  %v1665_v7 = vmul.f32 %v3636_v31, %v1464_v23  ;;  %v1669_v15 = vmul.f32 %v3638_v10, %v1464_v23 }
 0x1b3   :  { %v827_v25 = vpop.f32.mrf.mxu2  ;;  %v1057_v2 = vpop.f32.mrf.mxu3 }
 0x1b4   :  { %v3697_v26 = vadd.f32 %v1657_v61, %v3593_v20  ;;  %v3700_v28 = vadd.f32 %v1661_v54, %v3596_v0  ;;  %v3703_v9 = vadd.f32 %v1665_v7, %v3599_v22  ;;  %v3706_v45 = vadd.f32 %v1669_v15, %v3602_v58  ;;  %1355 = vmatmul.f32.gmra.mxu0 %v4888_v19 }
 0x1b5   :  { %v828_v47 = vadd.f32 %v827_v25, %v630_v62  ;;  %v1058_v63 = vadd.f32 %v1057_v2, %v823_v53  ;;  %v4890_v20 = vand.u32 4294901760, %v4886_v18  ;;  %v634_v22 = vadd.f32 %v3355_v39, %v3353_v8  ;;  %v4894_v25 = vld [vmem:[#allocation30_spill] sm:$0xff] }
 0x1b6   :  { %v1471_v4 = vpop.f32.mrf.mxu1  ;;  %v4898_v2 = vld [vmem:[#allocation62_spill] sm:$0xff] }
 0x1b7   :  { %v1289_v14 = vadd.f32 %v1288_v13, %v1058_v63  ;;  %v3737_v13 = vperm.slane %v3434_v5, 0 }
 0x1b8   :  { %911 = vmatmul.f32.gmra.mxu2 %v4889_v48  ;;  %1158 = vmatmul.f32.gmra.mxu3 %v4890_v20 }
 0x1b9   :  { %v1468_v0 = vadd.f32 %v1467_v41, %v1289_v14  ;;  %1534 = vmatmul.f32.gmra.mxu1 %v4888_v19  ;;  %v1296_v21 = vpop.f32.mrf.mxu0 }
 0x1bb   :  { %v1658_v58 = vmul.f32 %v3632_v29, %v1468_v0  ;;  %v1662_v60 = vmul.f32 %v3634_v17, %v1468_v0  ;;  %v1666_v24 = vmul.f32 %v3636_v31, %v1468_v0  ;;  %v1670_v35 = vmul.f32 %v3638_v10, %v1468_v0  ;;  %v832_v37 = vpop.f32.mrf.mxu2  ;;  %v1063_v51 = vpop.f32.mrf.mxu3  ;;  %v4891_v31 = vld [vmem:[#allocation28_spill] sm:$0xff] }
 0x1bc   :  { %v833_v6 = vadd.f32 %v832_v37, %v634_v22  ;;  %v1064_v50 = vadd.f32 %v1063_v51, %v828_v47  ;;  %1359 = vmatmul.f32.gmra.mxu0 %v4891_v31  ;;  %v3733_v10 = vperm.slane %v3432_v16, 0  ;;  %v4899_v51 = vld [vmem:[#allocation32_spill] sm:$0xff] }
 0x1bd   :  { %v3720_v12 = vadd.f32 %v1658_v58, %v3619_v46  ;;  %v3723_v53 = vadd.f32 %v1662_v60, %v3622_v57  ;;  %v3726_v8 = vadd.f32 %v1666_v24, %v3625_v43  ;;  %v3729_v39 = vadd.f32 %v1670_v35, %v3628_v30 }
 0x1be   :  { %v1293_v29 = vadd.f32 %v1292_v42, %v1064_v50  ;;  %v1475_v17 = vpop.f32.mrf.mxu1  ;;  %v3740_v57 = vperm.slane %v3436_v52, 0  ;;  %v3743_v43 = vperm.slane %v3438_v59, 0  ;;  %v4893_v30 = vand.u32 4294901760, %v4889_v48 }
 0x1bf   :  { %v638_v52 = vadd.f32 %v3366_v33, %v3364_v32  ;;  %v4895_v33 = vld [vmem:[#allocation33_spill] sm:$0xff] }
 0x1c0   :  { %916 = vmatmul.f32.gmra.mxu2 %v4892_v27  ;;  %v1472_v46 = vadd.f32 %v1471_v4, %v1293_v29  ;;  %1164 = vmatmul.f32.gmra.mxu3 %v4893_v30 }
 0x1c1   :  { %1538 = vmatmul.f32.gmra.mxu1 %v4891_v31  ;;  %v1300_v54 = vpop.f32.mrf.mxu0 }
 0x1c2   :  { %v1704_v16 = vmul.f32 %v3733_v10, %v1472_v46  ;;  %v1708_v40 = vmul.f32 %v3737_v13, %v1472_v46  ;;  %v1712_v41 = vmul.f32 %v3740_v57, %v1472_v46  ;;  %v1716_v5 = vmul.f32 %v3743_v43, %v1472_v46 }
 0x1c3   :  { %v837_v3 = vpop.f32.mrf.mxu2  ;;  %v1069_v18 = vpop.f32.mrf.mxu3 }
 0x1c4   :  { %v3755_v59 = vadd.f32 %v1704_v16, %v3651_v34  ;;  %v3758_v23 = vadd.f32 %v1708_v40, %v3654_v36  ;;  %v3761_v49 = vadd.f32 %v1712_v41, %v3657_v44  ;;  %v3764_v61 = vadd.f32 %v1716_v5, %v3660_v56  ;;  %1363 = vmatmul.f32.gmra.mxu0 %v4894_v25  ;;  %v4897_v44 = vld [vmem:[#allocation61_spill] sm:$0xff]  ;;  %v4902_v40 = vld [vmem:[#allocation42_spill] sm:$0xff] }
 0x1c5   :  { %v838_v7 = vadd.f32 %v837_v3, %v638_v52  ;;  %v1070_v15 = vadd.f32 %v1069_v18, %v833_v6  ;;  %v4896_v34 = vand.u32 4294901760, %v4892_v27  ;;  %v642_v42 = vadd.f32 %v4898_v2, %v4897_v44  ;;  %v4900_v6 = vld [vmem:[#allocation35_spill] sm:$0xff]  ;;  %v4903_v3 = vld [vmem:[#allocation34_spill] sm:$0xff] }
 0x1c6   :  { %v1479_v62 = vpop.f32.mrf.mxu1  ;;  %v4907_v44 = vld [vmem:[#allocation43_spill] sm:$0xff] }
 0x1c7   :  { %v1297_v32 = vadd.f32 %v1296_v21, %v1070_v15  ;;  %v4901_v21 = vand.u32 4294901760, %v4895_v33 }
 0x1c8   :  { %921 = vmatmul.f32.gmra.mxu2 %v4895_v33  ;;  %1170 = vmatmul.f32.gmra.mxu3 %v4896_v34 }
 0x1c9   :  { %v1476_v36 = vadd.f32 %v1475_v17, %v1297_v32  ;;  %1542 = vmatmul.f32.gmra.mxu1 %v4894_v25  ;;  %v1304_v0 = vpop.f32.mrf.mxu0 }
 0x1cb   :  { %v1705_v56 = vmul.f32 %v3733_v10, %v1476_v36  ;;  %v1709_v47 = vmul.f32 %v3737_v13, %v1476_v36  ;;  %v1713_v63 = vmul.f32 %v3740_v57, %v1476_v36  ;;  %v1717_v4 = vmul.f32 %v3743_v43, %v1476_v36  ;;  %v842_v19 = vpop.f32.mrf.mxu2  ;;  %v1075_v14 = vpop.f32.mrf.mxu3 }
 0x1cc   :  { %v843_v48 = vadd.f32 %v842_v19, %v642_v42  ;;  %v1076_v20 = vadd.f32 %v1075_v14, %v838_v7  ;;  %1367 = vmatmul.f32.gmra.mxu0 %v4899_v51 }
 0x1cd   :  { %v3778_v22 = vadd.f32 %v1705_v56, %v3674_v11  ;;  %v3781_v58 = vadd.f32 %v1709_v47, %v3677_v1  ;;  %v3784_v60 = vadd.f32 %v1713_v63, %v3680_v38  ;;  %v3787_v24 = vadd.f32 %v1717_v4, %v3683_v55  ;;  %v4908_v4 = vld [vmem:[#allocation36_spill] sm:$0xff] }
 0x1ce   :  { %v1301_v35 = vadd.f32 %v1300_v54, %v1076_v20  ;;  %v1483_v37 = vpop.f32.mrf.mxu1  ;;  %v4904_v54 = vld [vmem:[#allocation37_spill] sm:$0xff] }
 0x1cf   :  { %v4910_v20 = vand.u32 4294901760, %v4904_v54 }
 0x1d0   :  { %926 = vmatmul.f32.gmra.mxu2 %v4900_v6  ;;  %v1480_v50 = vadd.f32 %v1479_v62, %v1301_v35  ;;  %1176 = vmatmul.f32.gmra.mxu3 %v4901_v21 }
 0x1d1   :  { %1546 = vmatmul.f32.gmra.mxu1 %v4899_v51  ;;  %v1308_v16 = vpop.f32.mrf.mxu0 }
 0x1d2   :  { %v1706_v11 = vmul.f32 %v3733_v10, %v1480_v50  ;;  %v1710_v1 = vmul.f32 %v3737_v13, %v1480_v50  ;;  %v1714_v38 = vmul.f32 %v3740_v57, %v1480_v50  ;;  %v1718_v55 = vmul.f32 %v3743_v43, %v1480_v50 }
 0x1d3   :  { %v847_v29 = vpop.f32.mrf.mxu2  ;;  %v1081_v17 = vpop.f32.mrf.mxu3 }
 0x1d4   :  { %v3799_v31 = vadd.f32 %v1706_v11, %v3697_v26  ;;  %v3802_v27 = vadd.f32 %v1710_v1, %v3700_v28  ;;  %v3805_v46 = vadd.f32 %v1714_v38, %v3703_v9  ;;  %v3808_v30 = vadd.f32 %v1718_v55, %v3706_v45  ;;  %1371 = vmatmul.f32.gmra.mxu0 %v4903_v3  ;;  %v4906_v9 = vld [vmem:[#allocation64_spill] sm:$0xff] }
 0x1d5   :  { %v848_v41 = vadd.f32 %v847_v29, %v4902_v40  ;;  %v1082_v5 = vadd.f32 %v1081_v17, %v843_v48  ;;  %v4905_v26 = vand.u32 4294901760, %v4900_v6  ;;  %v1737_v7 = vrot.slane %v4906_v9, 1  ;;  %v4911_v55 = vld [vmem:[#allocation44_spill] sm:$0xff]  ;;  %v4912_v40 = vld [vmem:[#allocation38_spill] sm:$0xff] }
 0x1d6   :  { %v1487_v52 = vpop.f32.mrf.mxu1  ;;  %v1738_v34 = vrot.slane %v4906_v9, 2  ;;  %v1739_v36 = vrot.slane %v4906_v9, 3  ;;  %v3838_v19 = vperm.slane %v4906_v9, 0 }
 0x1d7   :  { %v1305_v18 = vadd.f32 %v1304_v0, %v1082_v5  ;;  %v3840_v14 = vperm.slane %v1737_v7, 0  ;;  %v4913_v5 = vld [vmem:[#allocation41_spill] sm:$0xff] }
 0x1d8   :  { %931 = vmatmul.f32.gmra.mxu2 %v4904_v54  ;;  %1182 = vmatmul.f32.gmra.mxu3 %v4905_v26  ;;  %v3844_v48 = vperm.slane %v1739_v36, 0  ;;  %v4915_v26 = vld [vmem:[#allocation45_spill] sm:$0xff] }
 0x1d9   :  { %v1484_v28 = vadd.f32 %v1483_v37, %v1305_v18  ;;  %1550 = vmatmul.f32.gmra.mxu1 %v4903_v3  ;;  %v1312_v56 = vpop.f32.mrf.mxu0 }
 0x1db   :  { %v1707_v45 = vmul.f32 %v3733_v10, %v1484_v28  ;;  %v1711_v15 = vmul.f32 %v3737_v13, %v1484_v28  ;;  %v1715_v62 = vmul.f32 %v3740_v57, %v1484_v28  ;;  %v1719_v25 = vmul.f32 %v3743_v43, %v1484_v28  ;;  %v852_v32 = vpop.f32.mrf.mxu2  ;;  %v1087_v33 = vpop.f32.mrf.mxu3 }
 0x1dc   :  { %v853_v2 = vadd.f32 %v852_v32, %v4907_v44  ;;  %v1088_v42 = vadd.f32 %v1087_v33, %v848_v41  ;;  %1375 = vmatmul.f32.gmra.mxu0 %v4908_v4  ;;  %v4917_v44 = vand.u32 4294901760, %v4913_v5 }
 0x1dd   :  { %v3825_v47 = vadd.f32 %v1707_v45, %v3720_v12  ;;  %v3828_v10 = vadd.f32 %v1711_v15, %v3723_v53  ;;  %v3831_v13 = vadd.f32 %v1715_v62, %v3726_v8  ;;  %v3834_v57 = vadd.f32 %v1719_v25, %v3729_v39  ;;  %v4909_v53 = vld [vmem:[#allocation39_spill] sm:$0xff] }
 0x1de   :  { %v1309_v43 = vadd.f32 %v1308_v16, %v1088_v42  ;;  %v1491_v63 = vpop.f32.mrf.mxu1  ;;  %v3842_v12 = vperm.slane %v1738_v34, 0  ;;  %v4916_v34 = vld [vmem:[#allocation40_spill] sm:$0xff] }
 0x1e0   :  { %936 = vmatmul.f32.gmra.mxu2 %v4909_v53  ;;  %v1488_v8 = vadd.f32 %v1487_v52, %v1309_v43  ;;  %1188 = vmatmul.f32.gmra.mxu3 %v4910_v20 }
 0x1e1   :  { %1554 = vmatmul.f32.gmra.mxu1 %v4908_v4  ;;  %v1316_v38 = vpop.f32.mrf.mxu0 }
 0x1e2   :  { %v1748_v39 = vmul.f32 %v3838_v19, %v1488_v8  ;;  %v1752_v0 = vmul.f32 %v3840_v14, %v1488_v8  ;;  %v1756_v35 = vmul.f32 %v3842_v12, %v1488_v8  ;;  %v1760_v37 = vmul.f32 %v3844_v48, %v1488_v8  ;;  %v4918_v8 = vld [vmem:[#allocation46_spill] sm:$0xff] }
 0x1e3   :  { %v857_v51 = vpop.f32.mrf.mxu2  ;;  %v1093_v6 = vpop.f32.mrf.mxu3 }
 0x1e4   :  { %v3855_v50 = vadd.f32 %v1748_v39, %v3755_v59  ;;  %v3858_v21 = vadd.f32 %v1752_v0, %v3758_v23  ;;  %v3861_v11 = vadd.f32 %v1756_v35, %v3761_v49  ;;  %v3864_v1 = vadd.f32 %v1760_v37, %v3764_v61  ;;  %1379 = vmatmul.f32.gmra.mxu0 %v4912_v40 }
 0x1e5   :  { %v858_v29 = vadd.f32 %v857_v51, %v4911_v55  ;;  %v1094_v17 = vadd.f32 %v1093_v6, %v853_v2  ;;  %v4914_v59 = vand.u32 4294901760, %v4909_v53  ;;  %v4919_v55 = vld [vmem:[#allocation47_spill] sm:$0xff] }
 0x1e6   :  { %v1495_v16 = vpop.f32.mrf.mxu1 }
 0x1e7   :  { %v1313_v41 = vadd.f32 %v1312_v56, %v1094_v17 }
 0x1e8   :  { %941 = vmatmul.f32.gmra.mxu2 %v4913_v5  ;;  %1194 = vmatmul.f32.gmra.mxu3 %v4914_v59 }
 0x1e9   :  { %v1492_v23 = vadd.f32 %v1491_v63, %v1313_v41  ;;  %1558 = vmatmul.f32.gmra.mxu1 %v4912_v40  ;;  %v1320_v7 = vpop.f32.mrf.mxu0  ;;  %v4920_v41 = vld [vmem:[#allocation66_spill] sm:$0xff] }
 0x1ea   :  { %v1789_v5 = vperm.slane %v4920_v41, 0 }
 0x1eb   :  { %v1749_v49 = vmul.f32 %v3838_v19, %v1492_v23  ;;  %v1753_v61 = vmul.f32 %v3840_v14, %v1492_v23  ;;  %v1757_v52 = vmul.f32 %v3842_v12, %v1492_v23  ;;  %v1761_v3 = vmul.f32 %v3844_v48, %v1492_v23  ;;  %v862_v18 = vpop.f32.mrf.mxu2  ;;  %v1099_v54 = vpop.f32.mrf.mxu3  ;;  %v4921_v23 = vld [vmem:[#allocation67_spill] sm:$0xff] }
 0x1ec   :  { %v863_v28 = vadd.f32 %v862_v18, %v4915_v26  ;;  %v1100_v9 = vadd.f32 %v1099_v54, %v858_v29  ;;  %1383 = vmatmul.f32.gmra.mxu0 %v4916_v34 }
 0x1ed   :  { %v3878_v45 = vadd.f32 %v1749_v49, %v3778_v22  ;;  %v3881_v15 = vadd.f32 %v1753_v61, %v3781_v58  ;;  %v3884_v62 = vadd.f32 %v1757_v52, %v3784_v60  ;;  %v3887_v25 = vadd.f32 %v1761_v3, %v3787_v24  ;;  %v4922_v61 = vld [vmem:[#allocation68_spill] sm:$0xff] }
 0x1ee   :  { %v1317_v32 = vadd.f32 %v1316_v38, %v1100_v9  ;;  %v1499_v33 = vpop.f32.mrf.mxu1  ;;  %v1790_v49 = vperm.slane %v4921_v23, 0  ;;  %v1791_v52 = vperm.slane %v4922_v61, 0 }
 0x1f0   :  { %v1496_v36 = vadd.f32 %v1495_v16, %v1317_v32  ;;  %1200 = vmatmul.f32.gmra.mxu3 %v4917_v44 }
 0x1f1   :  { %1562 = vmatmul.f32.gmra.mxu1 %v4916_v34  ;;  %v1324_v53 = vpop.f32.mrf.mxu0  ;;  %v4924_v34 = vld [vmem:[#allocation48_spill] sm:$0xff] }
 0x1f2   :  { %v1750_v22 = vmul.f32 %v3838_v19, %v1496_v36  ;;  %v1754_v58 = vmul.f32 %v3840_v14, %v1496_v36  ;;  %v1758_v60 = vmul.f32 %v3842_v12, %v1496_v36  ;;  %v1762_v2 = vmul.f32 %v3844_v48, %v1496_v36 }
 0x1f3   :  { %v867_v24 = vpop.f32.mrf.mxu2  ;;  %v1105_v42 = vpop.f32.mrf.mxu3 }
 0x1f4   :  { %v3898_v56 = vadd.f32 %v1750_v22, %v3799_v31  ;;  %v3901_v43 = vadd.f32 %v1754_v58, %v3802_v27  ;;  %v3904_v63 = vadd.f32 %v1758_v60, %v3805_v46  ;;  %v3907_v4 = vadd.f32 %v1762_v2, %v3808_v30 }
 0x1f5   :  { %v868_v20 = vadd.f32 %v867_v24, %v4918_v8  ;;  %v1106_v39 = vadd.f32 %v1105_v42, %v863_v28  ;;  %v4925_v8 = vld [vmem:[#allocation49_spill] sm:$0xff] }
 0x1f6   :  { %v1503_v0 = vpop.f32.mrf.mxu1 }
 0x1f7   :  { %v1321_v35 = vadd.f32 %v1320_v7, %v1106_v39 }
 0x1f9   :  { %v1500_v37 = vadd.f32 %v1499_v33, %v1321_v35  ;;  %v1328_v17 = vpop.f32.mrf.mxu0 }
 0x1fb   :  { %v1751_v51 = vmul.f32 %v3838_v19, %v1500_v37  ;;  %v1755_v31 = vmul.f32 %v3840_v14, %v1500_v37  ;;  %v1759_v27 = vmul.f32 %v3842_v12, %v1500_v37  ;;  %v1763_v6 = vmul.f32 %v3844_v48, %v1500_v37  ;;  %v872_v46 = vpop.f32.mrf.mxu2  ;;  %v1111_v38 = vpop.f32.mrf.mxu3 }
 0x1fc   :  { %v873_v30 = vadd.f32 %v872_v46, %v4919_v55  ;;  %v1112_v29 = vadd.f32 %v1111_v38, %v868_v20 }
 0x1fd   :  { %v3916_v16 = vadd.f32 %v1751_v51, %v3825_v47  ;;  %v3919_v40 = vadd.f32 %v1755_v31, %v3828_v10  ;;  %v3922_v19 = vadd.f32 %v1759_v27, %v3831_v13  ;;  %v3925_v14 = vadd.f32 %v1763_v6, %v3834_v57  ;;  %v4923_v47 = vld [vmem:[#allocation69_spill] sm:$0xff] }
 0x1fe   :  { %v1325_v12 = vadd.f32 %v1324_v53, %v1112_v29  ;;  %v1507_v48 = vpop.f32.mrf.mxu1  ;;  %v1792_v3 = vperm.slane %v4923_v47, 0 }
 0x200   :  { %v1504_v59 = vadd.f32 %v1503_v0, %v1325_v12  ;;  %v4926_v12 = vld [vmem:[#allocation50_spill] sm:$0xff] }
 0x201   :  { %v1332_v33 = vpop.f32.mrf.mxu0 }
 0x202   :  { %v1797_v18 = vmul.f32 %v1789_v5, %v1504_v59  ;;  %v1801_v10 = vmul.f32 %v1790_v49, %v1504_v59  ;;  %v1805_v54 = vmul.f32 %v1791_v52, %v1504_v59  ;;  %v1809_v26 = vmul.f32 %v1792_v3, %v1504_v59 }
 0x203   :  { %v877_v13 = vpop.f32.mrf.mxu2  ;;  %v1117_v28 = vpop.f32.mrf.mxu3 }
 0x204   :  { %v3932_v57 = vadd.f32 %v1797_v18, %v3855_v50  ;;  %v3935_v9 = vadd.f32 %v1801_v10, %v3858_v21  ;;  %v3938_v7 = vadd.f32 %v1805_v54, %v3861_v11  ;;  %v3941_v32 = vadd.f32 %v1809_v26, %v3864_v1  ;;  %v4927_v26 = vld [vmem:[#allocation65_spill] sm:$0xff] }
 0x205   :  { %v878_v36 = vadd.f32 %v877_v13, %v4924_v34  ;;  %v1118_v44 = vadd.f32 %v1117_v28, %v873_v30  ;;  %v1830_v13 = vrot.slane %v4927_v26, 1 }
 0x206   :  { %v1511_v22 = vpop.f32.mrf.mxu1 }
 0x207   :  { %v1329_v58 = vadd.f32 %v1328_v17, %v1118_v44  ;;  %v1833_v44 = vperm.slane %v4927_v26, 0 }
 0x209   :  { %v1508_v60 = vadd.f32 %v1507_v48, %v1329_v58  ;;  %v1336_v39 = vpop.f32.mrf.mxu0 }
 0x20b   :  { %v1798_v2 = vmul.f32 %v1789_v5, %v1508_v60  ;;  %v1802_v24 = vmul.f32 %v1790_v49, %v1508_v60  ;;  %v1806_v50 = vmul.f32 %v1791_v52, %v1508_v60  ;;  %v1810_v42 = vmul.f32 %v1792_v3, %v1508_v60  ;;  %v882_v53 = vpop.f32.mrf.mxu2  ;;  %v1123_v21 = vpop.f32.mrf.mxu3 }
 0x20c   :  { %v883_v20 = vadd.f32 %v882_v53, %v4925_v8  ;;  %v1124_v11 = vadd.f32 %v1123_v21, %v878_v36 }
 0x20d   :  { %v3946_v1 = vadd.f32 %v1798_v2, %v3878_v45  ;;  %v3949_v0 = vadd.f32 %v1802_v24, %v3881_v15  ;;  %v3952_v35 = vadd.f32 %v1806_v50, %v3884_v62  ;;  %v3955_v37 = vadd.f32 %v1810_v42, %v3887_v25 }
 0x20e   :  { %v1333_v51 = vadd.f32 %v1332_v33, %v1124_v11  ;;  %v1515_v31 = vpop.f32.mrf.mxu1 }
 0x210   :  { %v1512_v27 = vadd.f32 %v1511_v22, %v1333_v51  ;;  %v1834_v22 = vperm.slane %v1830_v13, 0 }
 0x211   :  { %v1340_v17 = vpop.f32.mrf.mxu0 }
 0x212   :  { %v1799_v6 = vmul.f32 %v1789_v5, %v1512_v27  ;;  %v1803_v46 = vmul.f32 %v1790_v49, %v1512_v27  ;;  %v1807_v38 = vmul.f32 %v1791_v52, %v1512_v27  ;;  %v1811_v55 = vmul.f32 %v1792_v3, %v1512_v27 }
 0x213   :  { %v887_v30 = vpop.f32.mrf.mxu2  ;;  %v1129_v29 = vpop.f32.mrf.mxu3 }
 0x214   :  { %v3958_v45 = vadd.f32 %v1799_v6, %v3898_v56  ;;  %v3961_v15 = vadd.f32 %v1803_v46, %v3901_v43  ;;  %v3964_v62 = vadd.f32 %v1807_v38, %v3904_v63  ;;  %v3967_v25 = vadd.f32 %v1811_v55, %v3907_v4  ;;  %v4929_v46 = vld [vmem:[#allocation52_spill] sm:$0xff] }
 0x215   :  { %v888_v48 = vadd.f32 %v887_v30, %v4926_v12  ;;  %v1130_v41 = vadd.f32 %v1129_v29, %v883_v20  ;;  %v1831_v63 = vrot.slane %v4927_v26, 2  ;;  %v1832_v4 = vrot.slane %v4927_v26, 3 }
 0x216   :  { %v1519_v59 = vpop.f32.mrf.mxu1 }
 0x217   :  { %v1337_v23 = vadd.f32 %v1336_v39, %v1130_v41  ;;  %v1835_v58 = vperm.slane %v1831_v63, 0  ;;  %v1836_v60 = vperm.slane %v1832_v4, 0 }
 0x219   :  { %v1516_v61 = vadd.f32 %v1515_v31, %v1337_v23  ;;  %v1344_v33 = vpop.f32.mrf.mxu0 }
 0x21b   :  { %v1800_v47 = vmul.f32 %v1789_v5, %v1516_v61  ;;  %v1804_v18 = vmul.f32 %v1790_v49, %v1516_v61  ;;  %v1808_v56 = vmul.f32 %v1791_v52, %v1516_v61  ;;  %v1812_v10 = vmul.f32 %v1792_v3, %v1516_v61  ;;  %v892_v54 = vpop.f32.mrf.mxu2  ;;  %v1135_v43 = vpop.f32.mrf.mxu3 }
 0x21c   :  { %v1136_v28 = vadd.f32 %v1135_v43, %v888_v48  ;;  %v4930_v43 = vld [vmem:[#allocation53_spill] sm:$0xff] }
 0x21d   :  { %v3974_v34 = vadd.f32 %v1800_v47, %v3916_v16  ;;  %v3977_v36 = vadd.f32 %v1804_v18, %v3919_v40  ;;  %v3980_v5 = vadd.f32 %v1808_v56, %v3922_v19  ;;  %v3983_v49 = vadd.f32 %v1812_v10, %v3925_v14  ;;  %v4928_v40 = vld [vmem:[#allocation51_spill] sm:$0xff] }
 0x21e   :  { %v1341_v52 = vadd.f32 %v1340_v17, %v1136_v28  ;;  %v1523_v3 = vpop.f32.mrf.mxu1  ;;  %v893_v53 = vadd.f32 %v892_v54, %v4928_v40 }
 0x220   :  { %v1520_v2 = vadd.f32 %v1519_v59, %v1341_v52 }
 0x221   :  { %v1348_v39 = vpop.f32.mrf.mxu0 }
 0x222   :  { %v1841_v24 = vmul.f32 %v1833_v44, %v1520_v2  ;;  %v1845_v16 = vmul.f32 %v1834_v22, %v1520_v2  ;;  %v1849_v50 = vmul.f32 %v1835_v58, %v1520_v2  ;;  %v1853_v42 = vmul.f32 %v1836_v60, %v1520_v2 }
 0x223   :  { %v897_v21 = vpop.f32.mrf.mxu2  ;;  %v1141_v19 = vpop.f32.mrf.mxu3 }
 0x224   :  { %v3988_v8 = vadd.f32 %v1841_v24, %v3932_v57  ;;  %v3991_v14 = vadd.f32 %v1845_v16, %v3935_v9  ;;  %v3994_v20 = vadd.f32 %v1849_v50, %v3938_v7  ;;  %v3997_v11 = vadd.f32 %v1853_v42, %v3941_v32 }
 0x225   :  { %v1142_v51 = vadd.f32 %v1141_v19, %v893_v53  ;;  %v898_v38 = vadd.f32 %v897_v21, %v4929_v46  ;;  %v1875_v53 = vld [vmem:[#allocation1 + $0x4] ss:$9 sm:$0xff] }
 0x226   :  { %v1527_v27 = vpop.f32.mrf.mxu1 }
 0x227   :  { %v1345_v31 = vadd.f32 %v1344_v33, %v1142_v51  ;;  %v4038_v51 = vperm.slane %v1875_v53, 0 }
 0x229   :  { %v1524_v6 = vadd.f32 %v1523_v3, %v1345_v31  ;;  %v1352_v23 = vpop.f32.mrf.mxu0  ;;  %v4931_v3 = vld [vmem:[#allocation54_spill] sm:$0xff] }
 0x22b   :  { %v1842_v55 = vmul.f32 %v1833_v44, %v1524_v6  ;;  %v1846_v30 = vmul.f32 %v1834_v22, %v1524_v6  ;;  %v1850_v57 = vmul.f32 %v1835_v58, %v1524_v6  ;;  %v1854_v29 = vmul.f32 %v1836_v60, %v1524_v6  ;;  %v902_v17 = vpop.f32.mrf.mxu2  ;;  %v1147_v9 = vpop.f32.mrf.mxu3 }
 0x22c   :  { %v1148_v12 = vadd.f32 %v1147_v9, %v898_v38 }
 0x22d   :  { %v4001_v7 = vadd.f32 %v1842_v55, %v3946_v1  ;;  %v4004_v32 = vadd.f32 %v1846_v30, %v3949_v0  ;;  %v4007_v48 = vadd.f32 %v1850_v57, %v3952_v35  ;;  %v4010_v41 = vadd.f32 %v1854_v29, %v3955_v37 }
 0x22e   :  { %v1349_v59 = vadd.f32 %v1348_v39, %v1148_v12  ;;  %v1531_v54 = vpop.f32.mrf.mxu1  ;;  %v903_v1 = vadd.f32 %v902_v17, %v4930_v43  ;;  %v4936_v12 = vld [vmem:[#allocation55_spill] sm:$0xff] }
 0x230   :  { %v1528_v61 = vadd.f32 %v1527_v27, %v1349_v59 }
 0x231   :  { %v1356_v33 = vpop.f32.mrf.mxu0 }
 0x232   :  { %v1843_v47 = vmul.f32 %v1833_v44, %v1528_v61  ;;  %v1847_v18 = vmul.f32 %v1834_v22, %v1528_v61  ;;  %v1851_v56 = vmul.f32 %v1835_v58, %v1528_v61  ;;  %v1855_v10 = vmul.f32 %v1836_v60, %v1528_v61 }
 0x233   :  { %v907_v26 = vpop.f32.mrf.mxu2  ;;  %v1153_v13 = vpop.f32.mrf.mxu3 }
 0x234   :  { %v4014_v0 = vadd.f32 %v1843_v47, %v3958_v45  ;;  %v4017_v35 = vadd.f32 %v1847_v18, %v3961_v15  ;;  %v4020_v37 = vadd.f32 %v1851_v56, %v3964_v62  ;;  %v4023_v63 = vadd.f32 %v1855_v10, %v3967_v25  ;;  %v4937_v18 = vld [vmem:[#allocation56_spill] sm:$0xff] }
 0x235   :  { %v1154_v4 = vadd.f32 %v1153_v13, %v903_v1  ;;  %v908_v2 = vadd.f32 %v907_v26, %v4931_v3 }
 0x237   :  { %v1353_v28 = vadd.f32 %v1352_v23, %v1154_v4 }
 0x239   :  { %v1532_v52 = vadd.f32 %v1531_v54, %v1353_v28  ;;  %v1360_v38 = vpop.f32.mrf.mxu0 }
 0x23b   :  { %v1844_v24 = vmul.f32 %v1833_v44, %v1532_v52  ;;  %v1848_v16 = vmul.f32 %v1834_v22, %v1532_v52  ;;  %v1852_v50 = vmul.f32 %v1835_v58, %v1532_v52  ;;  %v1856_v45 = vmul.f32 %v1836_v60, %v1532_v52  ;;  %v912_v42 = vpop.f32.mrf.mxu2  ;;  %v1159_v40 = vpop.f32.mrf.mxu3  ;;  %v1877_v22 = vld [vmem:[#allocation1 + $0x5] ss:$9 sm:$0xff]  ;;  %v1881_v60 = vld [vmem:[#allocation1 + $0x7] ss:$9 sm:$0xff] }
 0x23c   :  { %v1160_v15 = vadd.f32 %v1159_v40, %v908_v2  ;;  %v1535_v44 = vpop.f32.mrf.mxu1  ;;  %v1879_v58 = vld [vmem:[#allocation1 + $0x6] ss:$9 sm:$0xff]  ;;  %v4040_v27 = vperm.slane %v1877_v22, 0  ;;  %v913_v59 = vadd.f32 %v912_v42, %v4936_v12 }
 0x23d   :  { %v4027_v62 = vadd.f32 %v1844_v24, %v3974_v34  ;;  %v4030_v25 = vadd.f32 %v1848_v16, %v3977_v36  ;;  %v4033_v21 = vadd.f32 %v1852_v50, %v3980_v5  ;;  %v4036_v19 = vadd.f32 %v1856_v45, %v3983_v49 }
 0x23e   :  { %v1357_v39 = vadd.f32 %v1356_v33, %v1160_v15  ;;  %v4042_v34 = vperm.slane %v1879_v58, 0  ;;  %v4044_v36 = vperm.slane %v1881_v60, 0 }
 0x240   :  { %v1536_v31 = vadd.f32 %v1535_v44, %v1357_v39 }
 0x241   :  { %v1364_v10 = vpop.f32.mrf.mxu0 }
 0x242   :  { %v1890_v5 = vmul.f32 %v4038_v51, %v1536_v31  ;;  %v1894_v6 = vmul.f32 %v4040_v27, %v1536_v31  ;;  %v1898_v49 = vmul.f32 %v4042_v34, %v1536_v31  ;;  %v1902_v46 = vmul.f32 %v4044_v36, %v1536_v31 }
 0x243   :  { %v1165_v55 = vpop.f32.mrf.mxu3  ;;  %v917_v9 = vpop.f32.mrf.mxu2 }
 0x244   :  { %v4051_v30 = vadd.f32 %v1890_v5, %v3988_v8  ;;  %v4054_v57 = vadd.f32 %v1894_v6, %v3991_v14  ;;  %v4057_v29 = vadd.f32 %v1898_v49, %v3994_v20  ;;  %v4060_v17 = vadd.f32 %v1902_v46, %v3997_v11  ;;  %v1539_v23 = vpop.f32.mrf.mxu1 }
 0x245   :  { %v1166_v61 = vadd.f32 %v1165_v55, %v913_v59  ;;  %v918_v56 = vadd.f32 %v917_v9, %v4937_v18 }
 0x246   :  { %4932 = vst [vmem:[#allocation5_spill] sm:$0xff] %v4051_v30  ;;  %v1922_v1 = vperm.slane %v4051_v30, 0  ;;  %v1926_v33 = vperm.slane %v4054_v57, 0  ;;  %v1930_v52 = vperm.slane %v4057_v29, 0  ;;  %v1934_v3 = vperm.slane %v4060_v17, 0 }
 0x247   :  { %4933 = vst [vmem:[#allocation7_spill] sm:$0xff] %v4054_v57  ;;  %v1361_v8 = vadd.f32 %v1360_v38, %v1166_v61  ;;  %v1954_v2 = vperm.slane %v4051_v30, 1  ;;  %v1958_v40 = vperm.slane %v4054_v57, 1  ;;  %v1962_v15 = vperm.slane %v4057_v29, 1 }
 0x248   :  { %4934 = vst [vmem:[#allocation6_spill] sm:$0xff] %v4057_v29  ;;  %v1966_v53 = vperm.slane %v4060_v17, 1 }
 0x249   :  { %4935 = vst [vmem:[#allocation9_spill] sm:$0xff] %v4060_v17  ;;  %v1540_v14 = vadd.f32 %v1539_v23, %v1361_v8 }
 0x24b   :  { %v1171_v47 = vpop.f32.mrf.mxu3  ;;  %v922_v43 = vpop.f32.mrf.mxu2  ;;  %v1891_v26 = vmul.f32 %v4038_v51, %v1540_v14  ;;  %v1895_v11 = vmul.f32 %v4040_v27, %v1540_v14  ;;  %v1899_v13 = vmul.f32 %v4042_v34, %v1540_v14  ;;  %v1903_v4 = vmul.f32 %v4044_v36, %v1540_v14 }
 0x24c   :  { %v1172_v54 = vadd.f32 %v1171_v47, %v918_v56  ;;  %v1543_v28 = vpop.f32.mrf.mxu1  ;;  %v4942_v56 = vld [vmem:[#allocation57_spill] sm:$0xff] }
 0x24d   :  { %v4076_v16 = vadd.f32 %v1891_v26, %v4001_v7  ;;  %v4079_v50 = vadd.f32 %v1895_v11, %v4004_v32  ;;  %v4082_v45 = vadd.f32 %v1899_v13, %v4007_v48  ;;  %v4085_v42 = vadd.f32 %v1903_v4, %v4010_v41  ;;  %v4094_v48 = vpop.f32.mrf.mxu0  ;;  %v4948_v41 = vld [vmem:[#allocation59_spill] sm:$0xff] }
 0x24e   :  { %v1365_v20 = vadd.f32 %v1364_v10, %v1172_v54  ;;  %v923_v8 = vadd.f32 %v922_v43, %v4942_v56 }
 0x24f   :  { %4938 = vst [vmem:[#allocation8_spill] sm:$0xff] %v4076_v16  ;;  %v1931_v10 = vperm.slane %v4082_v45, 0  ;;  %v1955_v12 = vperm.slane %v4076_v16, 1  ;;  %v1959_v9 = vperm.slane %v4079_v50, 1  ;;  %v1963_v43 = vperm.slane %v4082_v45, 1 }
 0x250   :  { %4939 = vst [vmem:[#allocation11_spill] sm:$0xff] %v4079_v50  ;;  %v1544_v58 = vadd.f32 %v1543_v28, %v1365_v20  ;;  %v1923_v28 = vperm.slane %v4076_v16, 0  ;;  %v1935_v20 = vperm.slane %v4085_v42, 0 }
 0x251   :  { %4940 = vst [vmem:[#allocation10_spill] sm:$0xff] %v4082_v45 }
 0x252   :  { %4941 = vst [vmem:[#allocation13_spill] sm:$0xff] %v4085_v42  ;;  %v1892_v23 = vmul.f32 %v4038_v51, %v1544_v58  ;;  %v1896_v61 = vmul.f32 %v4040_v27, %v1544_v58  ;;  %v1900_v47 = vmul.f32 %v4042_v34, %v1544_v58  ;;  %v1904_v18 = vmul.f32 %v4044_v36, %v1544_v58 }
 0x253   :  { %v4073_v24 = vpop.f32.mrf.mxu3  ;;  %v927_v59 = vpop.f32.mrf.mxu2  ;;  %v1927_v58 = vperm.slane %v4079_v50, 0 }
 0x254   :  { %v1547_v13 = vpop.f32.mrf.mxu1  ;;  %v4125_v54 = vadd.f32 %v1892_v23, %v4014_v0  ;;  %v4128_v14 = vadd.f32 %v1896_v61, %v4017_v35  ;;  %v4131_v26 = vadd.f32 %v1900_v47, %v4020_v37  ;;  %v4134_v11 = vadd.f32 %v1904_v18, %v4023_v63  ;;  %v4947_v47 = vld [vmem:[#allocation58_spill] sm:$0xff] }
 0x255   :  { %v1967_v0 = vperm.slane %v4085_v42, 1  ;;  %v1372_v61 = vpop.f32.mrf.mxu0  ;;  %v1178_v38 = vadd.f32 %v4073_v24, %v923_v8  ;;  %v928_v18 = vadd.f32 %v927_v59, %v4947_v47 }
 0x256   :  { %4943 = vst [vmem:[#allocation12_spill] sm:$0xff] %v4125_v54  ;;  %v1924_v24 = vperm.slane %v4125_v54, 0  ;;  %v1928_v8 = vperm.slane %v4128_v14, 0  ;;  %v1932_v49 = vperm.slane %v4131_v26, 0  ;;  %v1936_v6 = vperm.slane %v4134_v11, 0 }
 0x257   :  { %4944 = vst [vmem:[#allocation15_spill] sm:$0xff] %v4128_v14  ;;  %v1956_v5 = vperm.slane %v4125_v54, 1  ;;  %v1960_v31 = vperm.slane %v4128_v14, 1  ;;  %v1369_v39 = vadd.f32 %v4094_v48, %v1178_v38  ;;  %v1964_v59 = vperm.slane %v4131_v26, 1 }
 0x258   :  { %4945 = vst [vmem:[#allocation14_spill] sm:$0xff] %v4131_v26 }
 0x259   :  { %4946 = vst [vmem:[#allocation17_spill] sm:$0xff] %v4134_v11  ;;  %v1548_v22 = vadd.f32 %v1547_v13, %v1369_v39 }
 0x25b   :  { %v1183_v4 = vpop.f32.mrf.mxu3  ;;  %v932_v60 = vpop.f32.mrf.mxu2 }
 0x25c   :  { %v933_v56 = vadd.f32 %v932_v60, %v4948_v41  ;;  %v1551_v63 = vpop.f32.mrf.mxu1  ;;  %v1184_v46 = vadd.f32 %v1183_v4, %v928_v18  ;;  %v1968_v41 = vperm.slane %v4134_v11, 1  ;;  %v1893_v4 = vmul.f32 %v4038_v51, %v1548_v22 }
 0x25d   :  { %v1376_v7 = vpop.f32.mrf.mxu0  ;;  %v1897_v18 = vmul.f32 %v4040_v27, %v1548_v22 }
 0x25e   :  { %v1373_v35 = vadd.f32 %v1372_v61, %v1184_v46  ;;  %v4193_v44 = vadd.f32 %v1893_v4, %v4027_v62 }
 0x25f   :  { %v4196_v38 = vadd.f32 %v1897_v18, %v4030_v25 }
 0x260   :  { %v4190_v13 = vadd.f32 %v1551_v63, %v1373_v35  ;;  %4949 = vst [vmem:[#allocation16_spill] sm:$0xff] %v4193_v44  ;;  %v1957_v18 = vperm.slane %v4193_v44, 1 }
 0x261   :  { %4950 = vst [vmem:[#allocation19_spill] sm:$0xff] %v4196_v38 }
 0x262   :  { %v4215_v62 = vmul.f32 %v1924_v24, %v4190_v13  ;;  %v4220_v25 = vmul.f32 %v1926_v33, %v4190_v13  ;;  %v1925_v24 = vperm.slane %v4193_v44, 0  ;;  %v1943_v23 = vmul.f32 %v1927_v58, %v4190_v13 }
 0x263   :  { %v1189_v55 = vpop.f32.mrf.mxu3  ;;  %v1947_v39 = vmul.f32 %v1931_v10, %v4190_v13 }
 0x264   :  { %v1190_v47 = vadd.f32 %v1189_v55, %v933_v56  ;;  %v1901_v55 = vmul.f32 %v4042_v34, %v1548_v22  ;;  %v1905_v56 = vmul.f32 %v4044_v36, %v1548_v22  ;;  %v4207_v34 = vmul.f32 %v1922_v1, %v4190_v13  ;;  %v937_v22 = vpop.f32.mrf.mxu2  ;;  %v1555_v35 = vpop.f32.mrf.mxu1  ;;  %v4953_v1 = vld [vmem:[#allocation60_spill] sm:$0xff] }
 0x265   :  { %v4212_v36 = vmul.f32 %v1923_v28, %v4190_v13  ;;  %v4237_v28 = vadd.f32 %v937_v22, %v4953_v1  ;;  %v1941_v48 = vmul.f32 %v1925_v24, %v4190_v13  ;;  %v1944_v22 = vmul.f32 %v1928_v8, %v4190_v13 }
 0x266   :  { %v1377_v61 = vadd.f32 %v1376_v7, %v1190_v47  ;;  %v4199_v51 = vadd.f32 %v1901_v55, %v4033_v21  ;;  %v4202_v27 = vadd.f32 %v1905_v56, %v4036_v19  ;;  %v1929_v47 = vperm.slane %v4196_v38, 0 }
 0x267   :  { %4954 = vst [vmem:[#allocation20_spill] sm:$0xff] %v4237_v28  ;;  %v1961_v55 = vperm.slane %v4196_v38, 1  ;;  %v1946_v21 = vmul.f32 %v1930_v52, %v4190_v13  ;;  %v1948_v24 = vmul.f32 %v1932_v49, %v4190_v13  ;;  %v1950_v8 = vmul.f32 %v1934_v3, %v4190_v13 }
 0x268   :  { %4951 = vst [vmem:[#allocation18_spill] sm:$0xff] %v4199_v51  ;;  %v4239_v63 = vadd.f32 %v1555_v35, %v1377_v61  ;;  %v1933_v33 = vperm.slane %v4199_v51, 0  ;;  %v1937_v4 = vperm.slane %v4202_v27, 0  ;;  %v1965_v56 = vperm.slane %v4199_v51, 1 }
 0x269   :  { %4952 = vst [vmem:[#allocation21_spill] sm:$0xff] %v4202_v27  ;;  %v1969_v7 = vperm.slane %v4202_v27, 1  ;;  %v1945_v35 = vmul.f32 %v1929_v47, %v4190_v13  ;;  %v1951_v47 = vmul.f32 %v1935_v20, %v4190_v13  ;;  %v1952_v52 = vmul.f32 %v1936_v6, %v4190_v13 }
 0x26a   :  { %v1949_v58 = vmul.f32 %v1933_v33, %v4190_v13  ;;  %v1953_v10 = vmul.f32 %v1937_v4, %v4190_v13  ;;  %v1970_v49 = vmul.f32 %v1954_v2, %v4190_v13  ;;  %v1971_v33 = vmul.f32 %v1955_v12, %v4190_v13 }
 0x26b   :  { %v1972_v3 = vmul.f32 %v1956_v5, %v4190_v13  ;;  %v1973_v20 = vmul.f32 %v1957_v18, %v4190_v13  ;;  %v1974_v6 = vmul.f32 %v1958_v40, %v4190_v13  ;;  %v1975_v4 = vmul.f32 %v1959_v9, %v4190_v13 }
 0x26c   :  { %v1976_v2 = vmul.f32 %v1960_v31, %v4190_v13  ;;  %v1977_v12 = vmul.f32 %v1961_v55, %v4190_v13  ;;  %v1978_v5 = vmul.f32 %v1962_v15, %v4190_v13  ;;  %v1979_v18 = vmul.f32 %v1963_v43, %v4190_v13 }
 0x26d   :  { %v1980_v40 = vmul.f32 %v1964_v59, %v4190_v13  ;;  %v1981_v9 = vmul.f32 %v1965_v56, %v4190_v13  ;;  %v1982_v31 = vmul.f32 %v1966_v53, %v4190_v13  ;;  %v1983_v55 = vmul.f32 %v1967_v0, %v4190_v13 }
 0x26e   :  { %v1984_v15 = vmul.f32 %v1968_v41, %v4190_v13  ;;  %v1985_v43 = vmul.f32 %v1969_v7, %v4190_v13  ;;  %v2002_v46 = vrot.slane %v1970_v49, 4  ;;  %v2003_v19 = vrot.slane %v1971_v33, 4 }
 0x26f   :  { %v2004_v37 = vrot.slane %v1972_v3, 4  ;;  %v2005_v59 = vrot.slane %v1973_v20, 4  ;;  %v2006_v61 = vrot.slane %v1974_v6, 4  ;;  %v2007_v56 = vrot.slane %v1975_v4, 4 }
 0x270   :  { %v2008_v32 = vrot.slane %v1976_v2, 4  ;;  %v2009_v1 = vrot.slane %v1977_v12, 4  ;;  %v2010_v60 = vrot.slane %v1978_v5, 4  ;;  %v2011_v53 = vrot.slane %v1979_v18, 4 }
 0x271   :  { %v2012_v28 = vrot.slane %v1980_v40, 4  ;;  %v2013_v27 = vrot.slane %v1981_v9, 4  ;;  %v2014_v42 = vrot.slane %v1982_v31, 4  ;;  %v2015_v0 = vrot.slane %v1983_v55, 4  ;;  %v4970_v55 = vld [vmem:[#allocation13_spill] sm:$0xff] }
 0x272   :  { %v2016_v17 = vrot.slane %v1984_v15, 4  ;;  %v2017_v51 = vrot.slane %v1985_v43, 4  ;;  %v2034_v41 = vadd.f32 %v2002_v46, %v4207_v34  ;;  %v2035_v13 = vadd.f32 %v2003_v19, %v4212_v36 }
 0x273   :  { %v2036_v7 = vadd.f32 %v2004_v37, %v4215_v62  ;;  %v2037_v49 = vadd.f32 %v2005_v59, %v1941_v48  ;;  %v2038_v33 = vadd.f32 %v2006_v61, %v4220_v25  ;;  %v2039_v3 = vadd.f32 %v2007_v56, %v1943_v23 }
 0x274   :  { %v2040_v20 = vadd.f32 %v2008_v32, %v1944_v22  ;;  %v2041_v6 = vadd.f32 %v2009_v1, %v1945_v35  ;;  %v2042_v4 = vadd.f32 %v2010_v60, %v1946_v21  ;;  %v2043_v2 = vadd.f32 %v2011_v53, %v1947_v39  ;;  %v4973_v53 = vld [vmem:[#allocation21_spill] sm:$0xff] }
 0x275   :  { %v2044_v12 = vadd.f32 %v2012_v28, %v1948_v24  ;;  %v2045_v5 = vadd.f32 %v2013_v27, %v1949_v58  ;;  %v2046_v18 = vadd.f32 %v2014_v42, %v1950_v8  ;;  %v2047_v40 = vadd.f32 %v2015_v0, %v1951_v47  ;;  %v4966_v24 = vld [vmem:[#allocation18_spill] sm:$0xff]  ;;  %v4968_v47 = vld [vmem:[#allocation9_spill] sm:$0xff] }
 0x276   :  { %v2048_v9 = vadd.f32 %v2016_v17, %v1952_v52  ;;  %v2049_v31 = vadd.f32 %v2017_v51, %v1953_v10  ;;  %v4955_v46 = vperm.slane %v4051_v30, 2  ;;  %v4956_v37 = vperm.slane %v4076_v16, 2 }
 0x277   :  { %v4957_v32 = vperm.slane %v4125_v54, 2  ;;  %v4958_v60 = vperm.slane %v4193_v44, 2  ;;  %v4959_v17 = vperm.slane %v4054_v57, 2  ;;  %v4960_v51 = vperm.slane %v4079_v50, 2 }
 0x278   :  { %v2066_v34 = vmul.f32 %v4955_v46, %v4239_v63  ;;  %v2067_v48 = vmul.f32 %v4956_v37, %v4239_v63  ;;  %v4961_v36 = vperm.slane %v4128_v14, 2  ;;  %v4962_v25 = vperm.slane %v4196_v38, 2 }
 0x279   :  { %v2068_v23 = vmul.f32 %v4957_v32, %v4239_v63  ;;  %v2069_v39 = vmul.f32 %v4958_v60, %v4239_v63  ;;  %v2070_v42 = vmul.f32 %v4959_v17, %v4239_v63  ;;  %v2071_v27 = vmul.f32 %v4960_v51, %v4239_v63 }
 0x27a   :  { %v2072_v62 = vmul.f32 %v4961_v36, %v4239_v63  ;;  %v2073_v21 = vmul.f32 %v4962_v25, %v4239_v63  ;;  %v4963_v19 = vperm.slane %v4057_v29, 2  ;;  %v4964_v1 = vperm.slane %v4082_v45, 2 }
 0x27b   :  { %v4965_v22 = vperm.slane %v4131_v26, 2  ;;  %v4967_v58 = vperm.slane %v4966_v24, 2  ;;  %v4969_v52 = vperm.slane %v4968_v47, 2  ;;  %v4971_v15 = vperm.slane %v4970_v55, 2 }
 0x27c   :  { %v2074_v28 = vmul.f32 %v4963_v19, %v4239_v63  ;;  %v2075_v61 = vmul.f32 %v4964_v1, %v4239_v63  ;;  %v4972_v59 = vperm.slane %v4134_v11, 2  ;;  %v4974_v0 = vperm.slane %v4973_v53, 2 }
 0x27d   :  { %v2076_v35 = vmul.f32 %v4965_v22, %v4239_v63  ;;  %v2077_v8 = vmul.f32 %v4967_v58, %v4239_v63  ;;  %v2078_v10 = vmul.f32 %v4969_v52, %v4239_v63  ;;  %v2079_v43 = vmul.f32 %v4971_v15, %v4239_v63 }
 0x27e   :  { %v2080_v56 = vmul.f32 %v4972_v59, %v4239_v63  ;;  %v2081_v46 = vmul.f32 %v4974_v0, %v4239_v63  ;;  %v4975_v37 = vperm.slane %v4051_v30, 3  ;;  %v4976_v60 = vperm.slane %v4076_v16, 3  ;;  %v1195_v16 = vpop.f32.mrf.mxu3  ;;  %v4991_v30 = vld [vmem:[#allocation63_spill] sm:$0xff] }
 0x27f   :  { %v4977_v51 = vperm.slane %v4125_v54, 3  ;;  %v4978_v25 = vperm.slane %v4193_v44, 3  ;;  %v4979_v1 = vperm.slane %v4054_v57, 3  ;;  %v4980_v58 = vperm.slane %v4079_v50, 3 }
 0x280   :  { %v2114_v32 = vmul.f32 %v4975_v37, %v4239_v63  ;;  %v2115_v17 = vmul.f32 %v4976_v60, %v4239_v63  ;;  %v4981_v15 = vperm.slane %v4128_v14, 3  ;;  %v4982_v0 = vperm.slane %v4196_v38, 3  ;;  %v942_v60 = vpop.f32.mrf.mxu2 }
 0x281   :  { %v2116_v36 = vmul.f32 %v4977_v51, %v4239_v63  ;;  %v2117_v19 = vmul.f32 %v4978_v25, %v4239_v63  ;;  %v2118_v22 = vmul.f32 %v4979_v1, %v4239_v63  ;;  %v2119_v52 = vmul.f32 %v4980_v58, %v4239_v63 }
 0x282   :  { %v2120_v59 = vmul.f32 %v4981_v15, %v4239_v63  ;;  %v2121_v37 = vmul.f32 %v4982_v0, %v4239_v63  ;;  %v4983_v51 = vperm.slane %v4057_v29, 3  ;;  %v4984_v1 = vperm.slane %v4082_v45, 3 }
 0x283   :  { %v4985_v58 = vperm.slane %v4131_v26, 3  ;;  %v4986_v15 = vperm.slane %v4966_v24, 3  ;;  %v4987_v0 = vperm.slane %v4968_v47, 3  ;;  %v4988_v29 = vperm.slane %v4970_v55, 3 }
 0x284   :  { %v2122_v25 = vmul.f32 %v4983_v51, %v4239_v63  ;;  %v2123_v57 = vmul.f32 %v4984_v1, %v4239_v63  ;;  %v4989_v45 = vperm.slane %v4134_v11, 3  ;;  %v4990_v26 = vperm.slane %v4973_v53, 3 }
 0x285   :  { %v2124_v50 = vmul.f32 %v4985_v58, %v4239_v63  ;;  %v2125_v14 = vmul.f32 %v4986_v15, %v4239_v63  ;;  %v2126_v54 = vmul.f32 %v4987_v0, %v4239_v63  ;;  %v2127_v51 = vmul.f32 %v4988_v29, %v4239_v63 }
 0x286   :  { %v2128_v1 = vmul.f32 %v4989_v45, %v4239_v63  ;;  %v2129_v58 = vmul.f32 %v4990_v26, %v4239_v63  ;;  %v943_v24 = vadd.f32 %v942_v60, %v4991_v30  ;;  %v2082_v15 = vadd.f32 %v2066_v34, %v2034_v41  ;;  %v1380_v63 = vpop.f32.mrf.mxu0 }
 0x287   :  { %v2083_v38 = vadd.f32 %v2067_v48, %v2035_v13  ;;  %v2084_v44 = vadd.f32 %v2068_v23, %v2036_v7  ;;  %v2085_v47 = vadd.f32 %v2069_v39, %v2037_v49  ;;  %v2086_v0 = vadd.f32 %v2070_v42, %v2038_v33 }
 0x288   :  { %v2087_v55 = vadd.f32 %v2071_v27, %v2039_v3  ;;  %v2088_v29 = vadd.f32 %v2072_v62, %v2040_v20  ;;  %v2089_v11 = vadd.f32 %v2073_v21, %v2041_v6  ;;  %v2090_v45 = vadd.f32 %v2074_v28, %v2042_v4 }
 0x289   :  { %v2091_v53 = vadd.f32 %v2075_v61, %v2043_v2  ;;  %v2092_v26 = vadd.f32 %v2076_v35, %v2044_v12  ;;  %v2093_v30 = vadd.f32 %v2077_v8, %v2045_v5  ;;  %v2094_v60 = vadd.f32 %v2078_v10, %v2046_v18  ;;  %v4992_v18 = vld [vmem:[#allocation20_spill] sm:$0xff]  ;;  %v1559_v10 = vpop.f32.mrf.mxu1 }
 0x28a   :  { %v2095_v34 = vadd.f32 %v2079_v43, %v2047_v40  ;;  %v2096_v41 = vadd.f32 %v2080_v56, %v2048_v9  ;;  %v2097_v13 = vadd.f32 %v2081_v46, %v2049_v31  ;;  %v2146_v48 = vrot.slane %v2114_v32, 4  ;;  %v4993_v32 = vld [vmem:[#allocation17_spill] sm:$0xff] }
 0x28b   :  { %v2147_v7 = vrot.slane %v2115_v17, 4  ;;  %v2148_v23 = vrot.slane %v2116_v36, 4  ;;  %v2149_v39 = vrot.slane %v2117_v19, 4  ;;  %v2150_v49 = vrot.slane %v2118_v22, 4  ;;  %v4995_v19 = vld [vmem:[#allocation19_spill] sm:$0xff] }
 0x28c   :  { %v2151_v33 = vrot.slane %v2119_v52, 4  ;;  %v2152_v42 = vrot.slane %v2120_v59, 4  ;;  %v2153_v3 = vrot.slane %v2121_v37, 4  ;;  %v2154_v27 = vrot.slane %v2122_v25, 4  ;;  %v4996_v52 = vld [vmem:[#allocation18_spill] sm:$0xff]  ;;  %v4997_v37 = vld [vmem:[#allocation21_spill] sm:$0xff] }
 0x28d   :  { %v2155_v20 = vrot.slane %v2123_v57, 4  ;;  %v2156_v6 = vrot.slane %v2124_v50, 4  ;;  %v2157_v4 = vrot.slane %v2125_v14, 4  ;;  %v2158_v2 = vrot.slane %v2126_v54, 4  ;;  %v1201_v57 = vpop.f32.mrf.mxu3 }
 0x28e   :  { %v2159_v12 = vrot.slane %v2127_v51, 4  ;;  %v2160_v62 = vrot.slane %v2128_v1, 4  ;;  %v2161_v5 = vrot.slane %v2129_v58, 4  ;;  %v1196_v40 = vadd.f32 %v1195_v16, %v4992_v18  ;;  %v1384_v46 = vpop.f32.mrf.mxu0 }
 0x28f   :  { %v4427_v9 = vadd.f32 %v2146_v48, %v2082_v15  ;;  %v4429_v31 = vadd.f32 %v2147_v7, %v2083_v38  ;;  %v4431_v21 = vadd.f32 %v2148_v23, %v2084_v44  ;;  %v4433_v28 = vadd.f32 %v2149_v39, %v2085_v47  ;;  %v5005_v23 = vld [vmem:[#allocation7_spill] sm:$0xff] }
 0x290   :  { %v4435_v61 = vadd.f32 %v2150_v49, %v2086_v0  ;;  %v4437_v35 = vadd.f32 %v2151_v33, %v2087_v55  ;;  %v4439_v50 = vadd.f32 %v2152_v42, %v2088_v29  ;;  %v4441_v54 = vadd.f32 %v2153_v3, %v2089_v11  ;;  %v5007_v33 = vld [vmem:[#allocation11_spill] sm:$0xff] }
 0x291   :  { %v4443_v14 = vadd.f32 %v2154_v27, %v2090_v45  ;;  %v4445_v16 = vadd.f32 %v2155_v20, %v2091_v53  ;;  %v4447_v8 = vadd.f32 %v2156_v6, %v2092_v26  ;;  %v4449_v38 = vadd.f32 %v2157_v4, %v2093_v30  ;;  %v4994_v53 = vld [vmem:[#allocation16_spill] sm:$0xff]  ;;  %v4999_v45 = vld [vmem:[#allocation5_spill] sm:$0xff]  ;;  %v5009_v27 = vld [vmem:[#allocation15_spill] sm:$0xff] }
 0x292   :  { %v4451_v44 = vadd.f32 %v2158_v2, %v2094_v60  ;;  %v4453_v47 = vadd.f32 %v2159_v12, %v2095_v34  ;;  %v4455_v55 = vadd.f32 %v2160_v62, %v2096_v41  ;;  %v4457_v43 = vadd.f32 %v2161_v5, %v2097_v13  ;;  %v5001_v30 = vld [vmem:[#allocation8_spill] sm:$0xff]  ;;  %v5011_v2 = vld [vmem:[#allocation6_spill] sm:$0xff] }
 0x293   :  { %v1381_v56 = vadd.f32 %v1380_v63, %v1196_v40  ;;  %v1202_v11 = vadd.f32 %v1201_v57, %v943_v24  ;;  %v2197_v36 = vperm.slane %v4994_v53, 4  ;;  %v2201_v22 = vperm.slane %v4995_v19, 4  ;;  %v5003_v41 = vld [vmem:[#allocation12_spill] sm:$0xff]  ;;  %v5013_v5 = vld [vmem:[#allocation10_spill] sm:$0xff] }
 0x294   :  { %v2205_v59 = vperm.slane %v4996_v52, 4  ;;  %v2209_v25 = vperm.slane %v4997_v37, 4  ;;  %v2245_v51 = vperm.slane %v4994_v53, 5  ;;  %v2249_v1 = vperm.slane %v4995_v19, 5  ;;  %v5015_v57 = vld [vmem:[#allocation14_spill] sm:$0xff] }
 0x295   :  { %v1560_v58 = vadd.f32 %v1559_v10, %v1381_v56  ;;  %v2253_v15 = vperm.slane %v4996_v52, 5  ;;  %v2257_v24 = vperm.slane %v4997_v37, 5  ;;  %v4469_v29 = vadd.f32 %v1384_v46, %v1202_v11  ;;  %v5017_v46 = vld [vmem:[#allocation9_spill] sm:$0xff] }
 0x296   :  { %v5000_v26 = vperm.slane %v4999_v45, 4  ;;  %v5002_v60 = vperm.slane %v5001_v30, 4  ;;  %v5004_v13 = vperm.slane %v5003_v41, 4  ;;  %v5006_v39 = vperm.slane %v5005_v23, 4 }
 0x297   :  { %4998 = vst [vmem:[#allocation23_spill] sm:$0xff] %v4469_v29  ;;  %v2213_v7 = vmul.f32 %v2197_v36, %v1560_v58  ;;  %v5008_v42 = vperm.slane %v5007_v33, 4  ;;  %v5010_v20 = vperm.slane %v5009_v27, 4  ;;  %v2217_v4 = vmul.f32 %v2201_v22, %v1560_v58 }
 0x298   :  { %v2210_v63 = vmul.f32 %v5000_v26, %v1560_v58  ;;  %v2211_v34 = vmul.f32 %v5002_v60, %v1560_v58  ;;  %v2212_v48 = vmul.f32 %v5004_v13, %v1560_v58  ;;  %v2214_v49 = vmul.f32 %v5006_v39, %v1560_v58  ;;  %v5019_v60 = vld [vmem:[#allocation13_spill] sm:$0xff] }
 0x299   :  { %v2215_v3 = vmul.f32 %v5008_v42, %v1560_v58  ;;  %v2216_v6 = vmul.f32 %v5010_v20, %v1560_v58  ;;  %v5012_v12 = vperm.slane %v5011_v2, 4  ;;  %v5014_v18 = vperm.slane %v5013_v5, 4 }
 0x29a   :  { %v5016_v10 = vperm.slane %v5015_v57, 4  ;;  %v2221_v11 = vmul.f32 %v2205_v59, %v1560_v58  ;;  %v5018_v36 = vperm.slane %v5017_v46, 4  ;;  %v5020_v13 = vperm.slane %v5019_v60, 4 }
 0x29b   :  { %v2218_v62 = vmul.f32 %v5012_v12, %v1560_v58  ;;  %v2219_v40 = vmul.f32 %v5014_v18, %v1560_v58  ;;  %v5021_v42 = vperm.slane %v4993_v32, 4  ;;  %v2225_v22 = vmul.f32 %v2209_v25, %v1560_v58 }
 0x29c   :  { %v2220_v56 = vmul.f32 %v5016_v10, %v1560_v58  ;;  %v2222_v26 = vmul.f32 %v5018_v36, %v1560_v58  ;;  %v2223_v39 = vmul.f32 %v5020_v13, %v1560_v58  ;;  %v5022_v17 = vperm.slane %v4999_v45, 5 }
 0x29d   :  { %v2224_v20 = vmul.f32 %v5021_v42, %v1560_v58  ;;  %v5023_v0 = vperm.slane %v5001_v30, 5  ;;  %v5024_v53 = vperm.slane %v5003_v41, 5  ;;  %v2261_v59 = vmul.f32 %v2245_v51, %v1560_v58 }
 0x29e   :  { %v2258_v12 = vmul.f32 %v5022_v17, %v1560_v58  ;;  %v5025_v29 = vperm.slane %v5005_v23, 5  ;;  %v5026_v37 = vperm.slane %v5007_v33, 5  ;;  %v5027_v52 = vperm.slane %v5009_v27, 5 }
 0x29f   :  { %v2259_v18 = vmul.f32 %v5023_v0, %v1560_v58  ;;  %v2260_v10 = vmul.f32 %v5024_v53, %v1560_v58  ;;  %v2265_v25 = vmul.f32 %v2249_v1, %v1560_v58  ;;  %v5028_v45 = vperm.slane %v5011_v2, 5 }
 0x2a0   :  { %v2262_v36 = vmul.f32 %v5025_v29, %v1560_v58  ;;  %v2263_v13 = vmul.f32 %v5026_v37, %v1560_v58  ;;  %v2264_v42 = vmul.f32 %v5027_v52, %v1560_v58  ;;  %v5029_v30 = vperm.slane %v5013_v5, 5 }
 0x2a1   :  { %v2266_v17 = vmul.f32 %v5028_v45, %v1560_v58  ;;  %v5030_v41 = vperm.slane %v5015_v57, 5  ;;  %v2269_v51 = vmul.f32 %v2253_v15, %v1560_v58  ;;  %v5031_v23 = vperm.slane %v5017_v46, 5 }
 0x2a2   :  { %v2267_v0 = vmul.f32 %v5029_v30, %v1560_v58  ;;  %v5032_v33 = vperm.slane %v5019_v60, 5  ;;  %v5033_v27 = vperm.slane %v4993_v32, 5  ;;  %v2273_v1 = vmul.f32 %v2257_v24, %v1560_v58 }
 0x2a3   :  { %v2268_v53 = vmul.f32 %v5030_v41, %v1560_v58  ;;  %v2270_v29 = vmul.f32 %v5031_v23, %v1560_v58  ;;  %v2226_v2 = vadd.f32 %v2210_v63, %v4427_v9  ;;  %v2227_v45 = vadd.f32 %v2211_v34, %v4429_v31 }
 0x2a4   :  { %v2271_v37 = vmul.f32 %v5032_v33, %v1560_v58  ;;  %v2272_v52 = vmul.f32 %v5033_v27, %v1560_v58  ;;  %v2228_v30 = vadd.f32 %v2212_v48, %v4431_v21  ;;  %v2229_v57 = vadd.f32 %v2213_v7, %v4433_v28 }
 0x2a5   :  { %v2230_v15 = vadd.f32 %v2214_v49, %v4435_v61  ;;  %v2231_v41 = vadd.f32 %v2215_v3, %v4437_v35  ;;  %v2232_v23 = vadd.f32 %v2216_v6, %v4439_v50  ;;  %v2233_v33 = vadd.f32 %v2217_v4, %v4441_v54 }
 0x2a6   :  { %v2234_v32 = vadd.f32 %v2218_v62, %v4443_v14  ;;  %v2235_v58 = vadd.f32 %v2219_v40, %v4445_v16  ;;  %v2236_v9 = vadd.f32 %v2220_v56, %v4447_v8  ;;  %v2237_v31 = vadd.f32 %v2221_v11, %v4449_v38 }
 0x2a7   :  { %v2238_v21 = vadd.f32 %v2222_v26, %v4451_v44  ;;  %v2239_v28 = vadd.f32 %v2223_v39, %v4453_v47  ;;  %v2240_v61 = vadd.f32 %v2224_v20, %v4455_v55  ;;  %v2241_v35 = vadd.f32 %v2225_v22, %v4457_v43  ;;  %v1563_v26 = vpop.f32.mrf.mxu1 }
 0x2a8   :  { %v2290_v24 = vrot.slane %v2258_v12, 4  ;;  %v2291_v50 = vrot.slane %v2259_v18, 4  ;;  %v2292_v63 = vrot.slane %v2260_v10, 4  ;;  %v2293_v54 = vrot.slane %v2261_v59, 4 }
 0x2a9   :  { %v2294_v34 = vrot.slane %v2262_v36, 4  ;;  %v2295_v14 = vrot.slane %v2263_v13, 4  ;;  %v2296_v48 = vrot.slane %v2264_v42, 4  ;;  %v2297_v16 = vrot.slane %v2265_v25, 4  ;;  %v5034_v42 = vld [vmem:[#allocation18_spill] sm:$0xff]  ;;  %v5035_v25 = vld [vmem:[#allocation21_spill] sm:$0xff] }
 0x2aa   :  { %v2298_v7 = vrot.slane %v2266_v17, 4  ;;  %v2299_v8 = vrot.slane %v2267_v0, 4  ;;  %v2300_v49 = vrot.slane %v2268_v53, 4  ;;  %v2301_v38 = vrot.slane %v2269_v51, 4  ;;  %v5037_v53 = vld [vmem:[#allocation16_spill] sm:$0xff] }
 0x2ab   :  { %v2302_v3 = vrot.slane %v2270_v29, 4  ;;  %v2303_v44 = vrot.slane %v2271_v37, 4  ;;  %v2304_v27 = vrot.slane %v2272_v52, 4  ;;  %v2305_v47 = vrot.slane %v2273_v1, 4  ;;  %v5038_v52 = vld [vmem:[#allocation5_spill] sm:$0xff] }
 0x2ac   :  { %v2322_v6 = vadd.f32 %v2290_v24, %v2226_v2  ;;  %v2323_v55 = vadd.f32 %v2291_v50, %v2227_v45  ;;  %v2324_v4 = vadd.f32 %v2292_v63, %v2228_v30  ;;  %v2325_v43 = vadd.f32 %v2293_v54, %v2229_v57  ;;  %v5036_v57 = vld [vmem:[#allocation23_spill] sm:$0xff]  ;;  %v5040_v30 = vld [vmem:[#allocation8_spill] sm:$0xff] }
 0x2ad   :  { %v2326_v62 = vadd.f32 %v2294_v34, %v2230_v15  ;;  %v2327_v40 = vadd.f32 %v2295_v14, %v2231_v41  ;;  %v2328_v56 = vadd.f32 %v2296_v48, %v2232_v23  ;;  %v2329_v11 = vadd.f32 %v2297_v16, %v2233_v33  ;;  %v5042_v23 = vld [vmem:[#allocation12_spill] sm:$0xff]  ;;  %v5049_v50 = vld [vmem:[#allocation15_spill] sm:$0xff]  ;;  %v5051_v14 = vld [vmem:[#allocation6_spill] sm:$0xff] }
 0x2ae   :  { %v2330_v39 = vadd.f32 %v2298_v7, %v2234_v32  ;;  %v2331_v20 = vadd.f32 %v2299_v8, %v2235_v58  ;;  %v2332_v22 = vadd.f32 %v2300_v49, %v2236_v9  ;;  %v2333_v12 = vadd.f32 %v2301_v38, %v2237_v31  ;;  %v5054_v49 = vld [vmem:[#allocation14_spill] sm:$0xff] }
 0x2af   :  { %v2334_v18 = vadd.f32 %v2302_v3, %v2238_v21  ;;  %v2335_v10 = vadd.f32 %v2303_v44, %v2239_v28  ;;  %v2336_v59 = vadd.f32 %v2304_v27, %v2240_v61  ;;  %v2337_v36 = vadd.f32 %v2305_v47, %v2241_v35  ;;  %v5045_v21 = vld [vmem:[#allocation7_spill] sm:$0xff] }
 0x2b0   :  { %v2345_v13 = vperm.slane %v4995_v19, 6  ;;  %v2349_v2 = vperm.slane %v5034_v42, 6  ;;  %v2353_v17 = vperm.slane %v5035_v25, 6  ;;  %v1564_v0 = vadd.f32 %v1563_v26, %v5036_v57 }
 0x2b1   :  { %v2389_v51 = vperm.slane %v5037_v53, 7  ;;  %v2393_v29 = vperm.slane %v4995_v19, 7  ;;  %v2397_v32 = vperm.slane %v5034_v42, 7  ;;  %v2401_v37 = vperm.slane %v5035_v25, 7  ;;  %v5047_v19 = vld [vmem:[#allocation11_spill] sm:$0xff]  ;;  %v5058_v25 = vld [vmem:[#allocation17_spill] sm:$0xff] }
 0x2b2   :  { %v5039_v1 = vperm.slane %v5038_v52, 6  ;;  %v5041_v15 = vperm.slane %v5040_v30, 6  ;;  %v5043_v33 = vperm.slane %v5042_v23, 6  ;;  %v5044_v9 = vperm.slane %v5037_v53, 6 }
 0x2b3   :  { %v5046_v28 = vperm.slane %v5045_v21, 6  ;;  %v5048_v35 = vperm.slane %v5047_v19, 6  ;;  %v5050_v63 = vperm.slane %v5049_v50, 6  ;;  %v2361_v34 = vmul.f32 %v2345_v13, %v1564_v0 }
 0x2b4   :  { %v2354_v45 = vmul.f32 %v5039_v1, %v1564_v0  ;;  %v2355_v41 = vmul.f32 %v5041_v15, %v1564_v0  ;;  %v2356_v58 = vmul.f32 %v5043_v33, %v1564_v0  ;;  %v2357_v31 = vmul.f32 %v5044_v9, %v1564_v0 }
 0x2b5   :  { %v2358_v61 = vmul.f32 %v5046_v28, %v1564_v0  ;;  %v2359_v24 = vmul.f32 %v5048_v35, %v1564_v0  ;;  %v2360_v54 = vmul.f32 %v5050_v63, %v1564_v0  ;;  %v5052_v48 = vperm.slane %v5051_v14, 6 }
 0x2b6   :  { %v5053_v7 = vperm.slane %v5013_v5, 6  ;;  %v5055_v38 = vperm.slane %v5054_v49, 6  ;;  %v2365_v44 = vmul.f32 %v2349_v2, %v1564_v0  ;;  %v5056_v27 = vperm.slane %v5017_v46, 6 }
 0x2b7   :  { %v2362_v16 = vmul.f32 %v5052_v48, %v1564_v0  ;;  %v5057_v26 = vperm.slane %v5019_v60, 6  ;;  %v5059_v57 = vperm.slane %v5058_v25, 6  ;;  %v2369_v13 = vmul.f32 %v2353_v17, %v1564_v0 }
 0x2b8   :  { %v2363_v8 = vmul.f32 %v5053_v7, %v1564_v0  ;;  %v2364_v3 = vmul.f32 %v5055_v38, %v1564_v0  ;;  %v2366_v47 = vmul.f32 %v5056_v27, %v1564_v0  ;;  %v5060_v1 = vperm.slane %v5038_v52, 7 }
 0x2b9   :  { %v2367_v42 = vmul.f32 %v5057_v26, %v1564_v0  ;;  %v2368_v53 = vmul.f32 %v5059_v57, %v1564_v0  ;;  %v5061_v33 = vperm.slane %v5040_v30, 7  ;;  %v5062_v28 = vperm.slane %v5042_v23, 7 }
 0x2ba   :  { %v2402_v15 = vmul.f32 %v5060_v1, %v1564_v0  ;;  %v2405_v2 = vmul.f32 %v2389_v51, %v1564_v0  ;;  %v5063_v63 = vperm.slane %v5045_v21, 7  ;;  %v5064_v7 = vperm.slane %v5047_v19, 7 }
 0x2bb   :  { %v2403_v9 = vmul.f32 %v5061_v33, %v1564_v0  ;;  %v2404_v35 = vmul.f32 %v5062_v28, %v1564_v0  ;;  %v5065_v27 = vperm.slane %v5049_v50, 7  ;;  %v2409_v17 = vmul.f32 %v2393_v29, %v1564_v0 }
 0x2bc   :  { %v2406_v48 = vmul.f32 %v5063_v63, %v1564_v0  ;;  %v2407_v38 = vmul.f32 %v5064_v7, %v1564_v0  ;;  %v5066_v52 = vperm.slane %v5051_v14, 7  ;;  %v5067_v30 = vperm.slane %v5013_v5, 7 }
 0x2bd   :  { %v2408_v26 = vmul.f32 %v5065_v27, %v1564_v0  ;;  %v5068_v23 = vperm.slane %v5054_v49, 7  ;;  %v2413_v51 = vmul.f32 %v2397_v32, %v1564_v0  ;;  %v5069_v21 = vperm.slane %v5017_v46, 7 }
 0x2be   :  { %v2410_v57 = vmul.f32 %v5066_v52, %v1564_v0  ;;  %v2411_v1 = vmul.f32 %v5067_v30, %v1564_v0  ;;  %v5070_v19 = vperm.slane %v5019_v60, 7  ;;  %v5071_v50 = vperm.slane %v5058_v25, 7 }
 0x2bf   :  { %v2412_v33 = vmul.f32 %v5068_v23, %v1564_v0  ;;  %v2414_v28 = vmul.f32 %v5069_v21, %v1564_v0  ;;  %v2417_v29 = vmul.f32 %v2401_v37, %v1564_v0  ;;  %v2370_v27 = vadd.f32 %v2354_v45, %v2322_v6 }
 0x2c0   :  { %v2415_v63 = vmul.f32 %v5070_v19, %v1564_v0  ;;  %v2416_v7 = vmul.f32 %v5071_v50, %v1564_v0  ;;  %v2371_v14 = vadd.f32 %v2355_v41, %v2323_v55  ;;  %v2372_v52 = vadd.f32 %v2356_v58, %v2324_v4 }
 0x2c1   :  { %v2373_v5 = vadd.f32 %v2357_v31, %v2325_v43  ;;  %v2374_v30 = vadd.f32 %v2358_v61, %v2326_v62  ;;  %v2375_v49 = vadd.f32 %v2359_v24, %v2327_v40  ;;  %v2376_v23 = vadd.f32 %v2360_v54, %v2328_v56 }
 0x2c2   :  { %v2377_v32 = vadd.f32 %v2361_v34, %v2329_v11  ;;  %v2378_v46 = vadd.f32 %v2362_v16, %v2330_v39  ;;  %v2379_v21 = vadd.f32 %v2363_v8, %v2331_v20  ;;  %v2380_v60 = vadd.f32 %v2364_v3, %v2332_v22 }
 0x2c3   :  { %v2381_v19 = vadd.f32 %v2365_v44, %v2333_v12  ;;  %v2382_v25 = vadd.f32 %v2366_v47, %v2334_v18  ;;  %v2383_v50 = vadd.f32 %v2367_v42, %v2335_v10  ;;  %v2384_v0 = vadd.f32 %v2368_v53, %v2336_v59 }
 0x2c4   :  { %v2385_v37 = vadd.f32 %v2369_v13, %v2337_v36  ;;  %v2434_v6 = vrot.slane %v2402_v15, 4  ;;  %v2435_v45 = vrot.slane %v2403_v9, 4  ;;  %v2436_v41 = vrot.slane %v2404_v35, 4 }
 0x2c5   :  { %v2437_v55 = vrot.slane %v2405_v2, 4  ;;  %v2438_v4 = vrot.slane %v2406_v48, 4  ;;  %v2439_v58 = vrot.slane %v2407_v38, 4  ;;  %v2440_v31 = vrot.slane %v2408_v26, 4 }
 0x2c6   :  { %v2441_v43 = vrot.slane %v2409_v17, 4  ;;  %v2442_v62 = vrot.slane %v2410_v57, 4  ;;  %v2443_v40 = vrot.slane %v2411_v1, 4  ;;  %v2444_v56 = vrot.slane %v2412_v33, 4 }
 0x2c7   :  { %v2445_v11 = vrot.slane %v2413_v51, 4  ;;  %v2446_v39 = vrot.slane %v2414_v28, 4  ;;  %v2447_v20 = vrot.slane %v2415_v63, 4  ;;  %v2448_v22 = vrot.slane %v2416_v7, 4 }
 0x2c8   :  { %v2449_v12 = vrot.slane %v2417_v29, 4  ;;  %v2466_v18 = vadd.f32 %v2434_v6, %v2370_v27  ;;  %v2467_v10 = vadd.f32 %v2435_v45, %v2371_v14  ;;  %v2468_v59 = vadd.f32 %v2436_v41, %v2372_v52 }
 0x2c9   :  { %v2469_v36 = vadd.f32 %v2437_v55, %v2373_v5  ;;  %v2470_v61 = vadd.f32 %v2438_v4, %v2374_v30  ;;  %v2471_v24 = vadd.f32 %v2439_v58, %v2375_v49  ;;  %v2472_v54 = vadd.f32 %v2440_v31, %v2376_v23 }
 0x2ca   :  { %v2473_v34 = vadd.f32 %v2441_v43, %v2377_v32  ;;  %v2474_v16 = vadd.f32 %v2442_v62, %v2378_v46  ;;  %v2475_v8 = vadd.f32 %v2443_v40, %v2379_v21  ;;  %v2476_v3 = vadd.f32 %v2444_v56, %v2380_v60  ;;  %2482 = vst [vmem:[#allocation2] sm:$0xf] %v2466_v18 }
 0x2cb   :  { %v2477_v44 = vadd.f32 %v2445_v11, %v2381_v19  ;;  %v2478_v47 = vadd.f32 %v2446_v39, %v2382_v25  ;;  %v2479_v42 = vadd.f32 %v2447_v20, %v2383_v50  ;;  %v2480_v53 = vadd.f32 %v2448_v22, %v2384_v0  ;;  %2483 = vst [vmem:[#allocation2 + $0x4] sm:$0xf] %v2467_v10 }
 0x2cc   :  { %v2481_v13 = vadd.f32 %v2449_v12, %v2385_v37  ;;  %2484 = vst [vmem:[#allocation2 + $0x8] sm:$0xf] %v2468_v59 }
 0x2cd   :  { %2485 = vst [vmem:[#allocation2 + $0xc] sm:$0xf] %v2469_v36 }
 0x2ce   :  { %2486 = vst [vmem:[#allocation2 + $0x10] sm:$0xf] %v2470_v61 }
 0x2cf   :  { %2487 = vst [vmem:[#allocation2 + $0x14] sm:$0xf] %v2471_v24 }
 0x2d0   :  { %2488 = vst [vmem:[#allocation2 + $0x18] sm:$0xf] %v2472_v54 }
 0x2d1   :  { %2489 = vst [vmem:[#allocation2 + $0x1c] sm:$0xf] %v2473_v34 }
 0x2d2   :  { %2490 = vst [vmem:[#allocation2 + $0x20] sm:$0xf] %v2474_v16 }
 0x2d3   :  { %2491 = vst [vmem:[#allocation2 + $0x24] sm:$0xf] %v2475_v8 }
 0x2d4   :  { %2492 = vst [vmem:[#allocation2 + $0x28] sm:$0xf] %v2476_v3 }
 0x2d5   :  { %2493 = vst [vmem:[#allocation2 + $0x2c] sm:$0xf] %v2477_v44 }
 0x2d6   :  { %2494 = vst [vmem:[#allocation2 + $0x30] sm:$0xf] %v2478_v47 }
 0x2d7   :  { %2495 = vst [vmem:[#allocation2 + $0x34] sm:$0xf] %v2479_v42 }
 0x2d8   :  { %2496 = vst [vmem:[#allocation2 + $0x38] sm:$0xf] %v2480_v53 }
 0x2d9   :  { %2497 = vst [vmem:[#allocation2 + $0x3c] sm:$0xf] %v2481_v13 }
 0x2da   :  { %2510 = dma.vmem_to_hbm [thread:$0]  %s2503_s8, 1024, %s2505_s11, [#allocation3], %s2563_s12, %s2563_s12, %s2564_s13  }
 0x2db   :  { %2558 = dma.done.wait [#allocation3], 1024  }
 0x2dc   :  { %2559 = vsyncadd [#allocation3], 4294966272 }
 0x2dd   :  { %2515 = vsyncpa [#allocation3], 1 }

</bundles_post_ra>
